<compile_context>
chip_gen: v7x
topology: tpu7x:2x2x1
jax: 0.10.0
libtpu: 0.0.40
codegen_flags: <defaults>
</compile_context>

<pallas_src>
import functools

import jax
import jax.numpy as jnp
from jax import lax
from jax.experimental import pallas as pl
from jax.experimental.pallas import tpu as pltpu


def _elu(x):
    # torch.nn.ELU(alpha=1): x if x > 0 else expm1(x).  min() keeps the exp
    # argument <= 0 so no inf intermediate; difference vs expm1 is < 1e-7 f32.
    return jnp.where(x > 0, x, jnp.exp(jnp.minimum(x, 0.0)) - 1.0)


def _write_reflect_pad(pad_ref, val, H, W):
    """Write val (N,H,W,C) into pad_ref (N,H+2,W+2,C) as ReflectionPad2d(1).

    Ref-level writes only: one interior store, two column-reflection ref copies
    (sublane gather of a single column), two row-reflection ref copies (outer
    dim -> pure address offsets).  Row copies go last so the corners become
    reflect-of-reflect, exactly like nn.ReflectionPad2d.
    """
    pad_ref[:, pl.ds(1, H), pl.ds(1, W), :] = val
    # width reflection on the interior rows: padded col 0 <- padded col 2,
    # padded col W+1 <- padded col W-1.
    pad_ref[:, pl.ds(1, H), pl.ds(0, 1), :] = pad_ref[:, pl.ds(1, H), pl.ds(2, 1), :]
    pad_ref[:, pl.ds(1, H), pl.ds(W + 1, 1), :] = pad_ref[:, pl.ds(1, H), pl.ds(W - 1, 1), :]
    # height reflection of full padded rows (includes the already-reflected cols).
    pad_ref[:, pl.ds(0, 1), :, :] = pad_ref[:, pl.ds(2, 1), :, :]
    pad_ref[:, pl.ds(H + 1, 1), :, :] = pad_ref[:, pl.ds(H - 1, 1), :, :]


def _conv3x3(pad_ref, w_ref, b_ref, N, H, W):
    """3x3 VALID conv over the padded scratch as 9 MXU matmuls, f32 accumulation.

    pad_ref: (N, H+2, W+2, Cin) VMEM scratch (f32)
    w_ref:   (9, Cin, Cout)  -- (ky*3 + kx) major; dtype = MXU operand dtype
    b_ref:   (1, Cout) f32
    returns: (N*H*W, Cout) f32
    """
    c_in = pad_ref.shape[-1]
    M = N * H * W
    acc = None
    for ky in range(3):
        for kx in range(3):
            # ky -> outer-dim address offset; kx -> static sublane-offset window.
            patch = pad_ref[:, pl.ds(ky, H), pl.ds(kx, W), :].reshape(M, c_in)
            d = jnp.dot(patch.astype(w_ref.dtype), w_ref[3 * ky + kx],
                        preferred_element_type=jnp.float32)
            acc = d if acc is None else acc + d
    return acc + b_ref[...]


def _fused_refine_kernel(x_ref, w1_ref, b1_ref, w2_ref, b2_ref, o_ref,
                         xpad_ref, ypad_ref):
    """Whole batch in one step; both (pad -> conv3x3 -> ELU) layers fused.

    x_ref:    (N, H, W, Cin)
    w1_ref:   (9, Cin, C1), b1_ref: (1, C1) f32
    w2_ref:   (9, C1, C2),  b2_ref: (1, C2) f32
    o_ref:    (N, H, W, C2)
    xpad_ref: (N, H+2, W+2, Cin) f32 VMEM scratch (layer-1 padded input)
    ypad_ref: (N, H+2, W+2, C1)  f32 VMEM scratch (layer-2 padded input)
    """
    N, H, W, _ = x_ref.shape
    C1 = w1_ref.shape[-1]
    C2 = o_ref.shape[-1]

    # ------------- layer 1: reflect-pad in VMEM -> 9 matmuls -> bias -> ELU ---
    _write_reflect_pad(xpad_ref, x_ref[...].astype(xpad_ref.dtype), H, W)
    y = _elu(_conv3x3(xpad_ref, w1_ref, b1_ref, N, H, W))        # (N*H*W, C1) f32

    # ------------- layer 2 ----------------------------------------------------
    _write_reflect_pad(ypad_ref, y.reshape(N, H, W, C1).astype(ypad_ref.dtype), H, W)
    out = _elu(_conv3x3(ypad_ref, w2_ref, b2_ref, N, H, W))      # (N*H*W, C2) f32

    o_ref[...] = out.reshape(N, H, W, C2).astype(o_ref.dtype)


def refine_upsample_block_nhwc(x_nhwc, params, *, compute_dtype=jnp.float32):
    """Fused (ReflectionPad(1) -> Conv3x3 -> ELU) x 2, NHWC, one pallas_call."""
    N, H, W, Cin = x_nhwc.shape
    C1 = params["b1"].shape[0]
    C2 = params["b2"].shape[0]
    assert H >= 2 and W >= 2, "ReflectionPad2d(1) needs H, W >= 2"
    # TODO(synk): pad W up to a multiple of 8 in the wrapper (and mask the
    # output) instead of asserting, if odd widths ever show up.
    assert W % 8 == 0, "W must be a multiple of 8 for layout-free in-kernel reshapes"

    out_dtype = x_nhwc.dtype
    Hp, Wp = H + 2, W + 2

    # HWIO (3,3,Cin,Cout) -> (ky*3 + kx, Cin, Cout); cast MXU operands.
    w1 = params["w1"].reshape(9, Cin, C1).astype(compute_dtype)
    w2 = params["w2"].reshape(9, C1, C2).astype(compute_dtype)
    b1 = params["b1"].reshape(1, C1).astype(jnp.float32)
    b2 = params["b2"].reshape(1, C2).astype(jnp.float32)

    return pl.pallas_call(
        _fused_refine_kernel,
        out_shape=jax.ShapeDtypeStruct((N, H, W, C2), out_dtype),
        grid_spec=pltpu.PrefetchScalarGridSpec(
            num_scalar_prefetch=0,
            grid=(1,),
            in_specs=[
                pl.BlockSpec((N, H, W, Cin), lambda i: (0, 0, 0, 0)),
                pl.BlockSpec((9, Cin, C1), lambda i: (0, 0, 0)),
                pl.BlockSpec((1, C1), lambda i: (0, 0)),
                pl.BlockSpec((9, C1, C2), lambda i: (0, 0, 0)),
                pl.BlockSpec((1, C2), lambda i: (0, 0)),
            ],
            out_specs=pl.BlockSpec((N, H, W, C2), lambda i: (0, 0, 0, 0)),
            scratch_shapes=[
                pltpu.VMEM((N, Hp, Wp, Cin), jnp.float32),
                pltpu.VMEM((N, Hp, Wp, C1), jnp.float32),
            ],
        ),
        compiler_params=pltpu.CompilerParams(
            dimension_semantics=("arbitrary",)),
    )(x_nhwc, w1, b1, w2, b2)


def make_params(in_channels=128, key=jax.random.PRNGKey(0)):
    """Deterministic synthetic parameters (shapes match the PyTorch module)."""
    k1, k2, k3, k4 = jax.random.split(key, 4)
    # Kept in HWIO (3, 3, Cin, Cout); PyTorch stores (Cout, Cin, kH, kW).
    w1 = jax.random.normal(k1, (3, 3, in_channels, 128), jnp.float32) * 0.05
    b1 = jax.random.normal(k2, (128,), jnp.float32) * 0.05
    w2 = jax.random.normal(k3, (3, 3, 128, 128), jnp.float32) * 0.05
    b2 = jax.random.normal(k4, (128,), jnp.float32) * 0.05
    return {"w1": w1, "b1": b1, "w2": w2, "b2": b2}


@functools.partial(jax.jit, static_argnames=("compute_dtype",))
def refine_upsample_block(x_nchw, params, *, compute_dtype=jnp.float32):
    """Forward pass of RefineUpsampleBlock; input/output NCHW (PyTorch convention).

    NOTE: at production sizes the two boundary transposes are full HBM round
    trips -- keep the surrounding model NHWC and call the *_nhwc entry point.
    """
    x = jnp.transpose(x_nchw, (0, 2, 3, 1))                 # NCHW -> NHWC
    y = refine_upsample_block_nhwc(x, params, compute_dtype=compute_dtype)
    return jnp.transpose(y, (0, 3, 1, 2))                   # NHWC -> NCHW


def _reference(x_nchw, params):
    """Pure-JAX reference (lax.conv, expm1-based ELU) for correctness checking."""
    def block(x, w, b):
        xp = jnp.pad(x, ((0, 0), (1, 1), (1, 1), (0, 0)), mode="reflect")
        y = lax.conv_general_dilated(
            xp, w, window_strides=(1, 1), padding="VALID",
            dimension_numbers=("NHWC", "HWIO", "NHWC"))
        y = y + b
        return jnp.where(y > 0, y, jnp.expm1(y))            # == torch.nn.ELU

    x = jnp.transpose(x_nchw, (0, 2, 3, 1))
    x = block(x, params["w1"], params["b1"])
    x = block(x, params["w2"], params["b2"])
    return jnp.transpose(x, (0, 3, 1, 2))


if __name__ == "__main__":
    # Small shapes consistent with the module (in_channels defaults to 128).
    N, C, H, W = 2, 128, 8, 8
    key = jax.random.PRNGKey(0)
    kx, kp = jax.random.split(key)
    x = jax.random.normal(kx, (N, C, H, W), jnp.float32)
    params = make_params(in_channels=C, key=kp)

    ref = jax.block_until_ready(_reference(x, params))

    # f32 MXU operands: strict check against the reference.
    out = jax.block_until_ready(refine_upsample_block(x, params))
    assert out.shape == (N, 128, H, W), out.shape
    assert jnp.allclose(out, ref, atol=1e-4, rtol=1e-4), \
        float(jnp.max(jnp.abs(out - ref)))

    # bf16 MXU operands, f32 accumulation: looser tolerance (bf16 rounding).
    out_bf16 = jax.block_until_ready(
        refine_upsample_block(x, params, compute_dtype=jnp.bfloat16))
    assert out_bf16.shape == (N, 128, H, W), out_bf16.shape
    assert jnp.allclose(out_bf16, ref, atol=2.5e-1, rtol=5e-2), \
        float(jnp.max(jnp.abs(out_bf16 - ref)))

    print("KERNEL_OK")
</pallas_src>

<mosaic_0001>
module attributes {stable_mosaic.version = 11 : i64} {
  func.func @_fused_refine_kernel(%arg0: i32, %arg1: memref<2x8x8x128xf32, #tpu.memory_space<vmem>>, %arg2: memref<9x128x128xf32, #tpu.memory_space<vmem>>, %arg3: memref<1x128xf32, #tpu.memory_space<vmem>>, %arg4: memref<9x128x128xf32, #tpu.memory_space<vmem>>, %arg5: memref<1x128xf32, #tpu.memory_space<vmem>>, %arg6: memref<2x8x8x128xf32, #tpu.memory_space<vmem>>, %arg7: memref<2x10x10x128xf32, #tpu.memory_space<vmem>>, %arg8: memref<2x10x10x128xf32, #tpu.memory_space<vmem>>) attributes {dimension_semantics = [#tpu.dimension_semantics<arbitrary>], iteration_bounds = array<i64: 1>, scalar_prefetch = 0 : i64, scratch_operands = 2 : i64, tpu.core_type = #tpu.core_type<tc>, window_params = [{pipeline_mode = #tpu.pipeline_mode<synchronous>, transform_indices = @transform_0, window_bounds = array<i64: 2, 8, 8, 128>}, {pipeline_mode = #tpu.pipeline_mode<synchronous>, transform_indices = @transform_1, window_bounds = array<i64: 9, 128, 128>}, {pipeline_mode = #tpu.pipeline_mode<synchronous>, transform_indices = @transform_2, window_bounds = array<i64: 1, 128>}, {pipeline_mode = #tpu.pipeline_mode<synchronous>, transform_indices = @transform_3, window_bounds = array<i64: 9, 128, 128>}, {pipeline_mode = #tpu.pipeline_mode<synchronous>, transform_indices = @transform_4, window_bounds = array<i64: 1, 128>}, {pipeline_mode = #tpu.pipeline_mode<synchronous>, transform_indices = @transform_5, window_bounds = array<i64: 2, 8, 8, 128>}]} {
    %c0 = arith.constant 0 : index
    %c0_0 = arith.constant 0 : index
    %c0_1 = arith.constant 0 : index
    %c0_2 = arith.constant 0 : index
    %0 = vector.load %arg1[%c0, %c0_0, %c0_1, %c0_2] : memref<2x8x8x128xf32, #tpu.memory_space<vmem>>, vector<2x8x8x128xf32>
    %c0_3 = arith.constant 0 : index
    %c1 = arith.constant 1 : index
    %c1_4 = arith.constant 1 : index
    %c0_5 = arith.constant 0 : index
    %1 = vector.load %arg7[%c0_3, %c1, %c1_4, %c0_5] : memref<2x10x10x128xf32, #tpu.memory_space<vmem>>, vector<2x8x8x128xf32>
    tpu.vector_store %arg7[%c0_3, %c1, %c1_4, %c0_5], %0 {strides = array<i32>} : memref<2x10x10x128xf32, #tpu.memory_space<vmem>>, vector<2x8x8x128xf32>,
    %c0_6 = arith.constant 0 : index
    %c1_7 = arith.constant 1 : index
    %c2 = arith.constant 2 : index
    %c0_8 = arith.constant 0 : index
    %2 = vector.load %arg7[%c0_6, %c1_7, %c2, %c0_8] : memref<2x10x10x128xf32, #tpu.memory_space<vmem>>, vector<2x8x1x128xf32>
    %c0_9 = arith.constant 0 : index
    %c1_10 = arith.constant 1 : index
    %c0_11 = arith.constant 0 : index
    %c0_12 = arith.constant 0 : index
    %3 = vector.load %arg7[%c0_9, %c1_10, %c0_11, %c0_12] : memref<2x10x10x128xf32, #tpu.memory_space<vmem>>, vector<2x8x1x128xf32>
    tpu.vector_store %arg7[%c0_9, %c1_10, %c0_11, %c0_12], %2 {strides = array<i32>} : memref<2x10x10x128xf32, #tpu.memory_space<vmem>>, vector<2x8x1x128xf32>,
    %c0_13 = arith.constant 0 : index
    %c1_14 = arith.constant 1 : index
    %c7 = arith.constant 7 : index
    %c0_15 = arith.constant 0 : index
    %4 = vector.load %arg7[%c0_13, %c1_14, %c7, %c0_15] : memref<2x10x10x128xf32, #tpu.memory_space<vmem>>, vector<2x8x1x128xf32>
    %c0_16 = arith.constant 0 : index
    %c1_17 = arith.constant 1 : index
    %c9 = arith.constant 9 : index
    %c0_18 = arith.constant 0 : index
    %5 = vector.load %arg7[%c0_16, %c1_17, %c9, %c0_18] : memref<2x10x10x128xf32, #tpu.memory_space<vmem>>, vector<2x8x1x128xf32>
    tpu.vector_store %arg7[%c0_16, %c1_17, %c9, %c0_18], %4 {strides = array<i32>} : memref<2x10x10x128xf32, #tpu.memory_space<vmem>>, vector<2x8x1x128xf32>,
    %c0_19 = arith.constant 0 : index
    %c2_20 = arith.constant 2 : index
    %c0_21 = arith.constant 0 : index
    %c0_22 = arith.constant 0 : index
    %6 = vector.load %arg7[%c0_19, %c2_20, %c0_21, %c0_22] : memref<2x10x10x128xf32, #tpu.memory_space<vmem>>, vector<2x1x10x128xf32>
    %c0_23 = arith.constant 0 : index
    %c0_24 = arith.constant 0 : index
    %c0_25 = arith.constant 0 : index
    %c0_26 = arith.constant 0 : index
    %7 = vector.load %arg7[%c0_23, %c0_24, %c0_25, %c0_26] : memref<2x10x10x128xf32, #tpu.memory_space<vmem>>, vector<2x1x10x128xf32>
    tpu.vector_store %arg7[%c0_23, %c0_24, %c0_25, %c0_26], %6 {strides = array<i32>} : memref<2x10x10x128xf32, #tpu.memory_space<vmem>>, vector<2x1x10x128xf32>,
    %c0_27 = arith.constant 0 : index
    %c7_28 = arith.constant 7 : index
    %c0_29 = arith.constant 0 : index
    %c0_30 = arith.constant 0 : index
    %8 = vector.load %arg7[%c0_27, %c7_28, %c0_29, %c0_30] : memref<2x10x10x128xf32, #tpu.memory_space<vmem>>, vector<2x1x10x128xf32>
    %c0_31 = arith.constant 0 : index
    %c9_32 = arith.constant 9 : index
    %c0_33 = arith.constant 0 : index
    %c0_34 = arith.constant 0 : index
    %9 = vector.load %arg7[%c0_31, %c9_32, %c0_33, %c0_34] : memref<2x10x10x128xf32, #tpu.memory_space<vmem>>, vector<2x1x10x128xf32>
    tpu.vector_store %arg7[%c0_31, %c9_32, %c0_33, %c0_34], %8 {strides = array<i32>} : memref<2x10x10x128xf32, #tpu.memory_space<vmem>>, vector<2x1x10x128xf32>,
    %c0_35 = arith.constant 0 : index
    %c0_36 = arith.constant 0 : index
    %c0_37 = arith.constant 0 : index
    %c0_38 = arith.constant 0 : index
    %10 = vector.load %arg7[%c0_35, %c0_36, %c0_37, %c0_38] : memref<2x10x10x128xf32, #tpu.memory_space<vmem>>, vector<2x8x8x128xf32>
    %11 = vector.shape_cast %10 : vector<2x8x8x128xf32> to vector<128x128xf32>
    %c0_39 = arith.constant 0 : index
    %c0_40 = arith.constant 0 : index
    %c0_41 = arith.constant 0 : index
    %12 = vector.load %arg2[%c0_39, %c0_40, %c0_41] : memref<9x128x128xf32, #tpu.memory_space<vmem>>, vector<1x128x128xf32>
    %13 = vector.shape_cast %12 : vector<1x128x128xf32> to vector<128x128xf32>
    %cst = arith.constant dense<0.000000e+00> : vector<128x128xf32>
    %14 = tpu.matmul %11, %13, %cst {dimension_numbers = #tpu.dot_dimension_numbers<[1], [0], [0], [1], [0, 0, 1, 1], [], []>} : vector<128x128xf32>, vector<128x128xf32>, vector<128x128xf32> -> vector<128x128xf32>
    %c0_42 = arith.constant 0 : index
    %c0_43 = arith.constant 0 : index
    %c1_44 = arith.constant 1 : index
    %c0_45 = arith.constant 0 : index
    %15 = vector.load %arg7[%c0_42, %c0_43, %c1_44, %c0_45] : memref<2x10x10x128xf32, #tpu.memory_space<vmem>>, vector<2x8x8x128xf32>
    %16 = vector.shape_cast %15 : vector<2x8x8x128xf32> to vector<128x128xf32>
    %c1_46 = arith.constant 1 : index
    %c0_47 = arith.constant 0 : index
    %c0_48 = arith.constant 0 : index
    %17 = vector.load %arg2[%c1_46, %c0_47, %c0_48] : memref<9x128x128xf32, #tpu.memory_space<vmem>>, vector<1x128x128xf32>
    %18 = vector.shape_cast %17 : vector<1x128x128xf32> to vector<128x128xf32>
    %cst_49 = arith.constant dense<0.000000e+00> : vector<128x128xf32>
    %19 = tpu.matmul %16, %18, %cst_49 {dimension_numbers = #tpu.dot_dimension_numbers<[1], [0], [0], [1], [0, 0, 1, 1], [], []>} : vector<128x128xf32>, vector<128x128xf32>, vector<128x128xf32> -> vector<128x128xf32>
    %20 = arith.addf %14, %19 : vector<128x128xf32>
    %c0_50 = arith.constant 0 : index
    %c0_51 = arith.constant 0 : index
    %c2_52 = arith.constant 2 : index
    %c0_53 = arith.constant 0 : index
    %21 = vector.load %arg7[%c0_50, %c0_51, %c2_52, %c0_53] : memref<2x10x10x128xf32, #tpu.memory_space<vmem>>, vector<2x8x8x128xf32>
    %22 = vector.shape_cast %21 : vector<2x8x8x128xf32> to vector<128x128xf32>
    %c2_54 = arith.constant 2 : index
    %c0_55 = arith.constant 0 : index
    %c0_56 = arith.constant 0 : index
    %23 = vector.load %arg2[%c2_54, %c0_55, %c0_56] : memref<9x128x128xf32, #tpu.memory_space<vmem>>, vector<1x128x128xf32>
    %24 = vector.shape_cast %23 : vector<1x128x128xf32> to vector<128x128xf32>
    %cst_57 = arith.constant dense<0.000000e+00> : vector<128x128xf32>
    %25 = tpu.matmul %22, %24, %cst_57 {dimension_numbers = #tpu.dot_dimension_numbers<[1], [0], [0], [1], [0, 0, 1, 1], [], []>} : vector<128x128xf32>, vector<128x128xf32>, vector<128x128xf32> -> vector<128x128xf32>
    %26 = arith.addf %20, %25 : vector<128x128xf32>
    %c0_58 = arith.constant 0 : index
    %c1_59 = arith.constant 1 : index
    %c0_60 = arith.constant 0 : index
    %c0_61 = arith.constant 0 : index
    %27 = vector.load %arg7[%c0_58, %c1_59, %c0_60, %c0_61] : memref<2x10x10x128xf32, #tpu.memory_space<vmem>>, vector<2x8x8x128xf32>
    %28 = vector.shape_cast %27 : vector<2x8x8x128xf32> to vector<128x128xf32>
    %c3 = arith.constant 3 : index
    %c0_62 = arith.constant 0 : index
    %c0_63 = arith.constant 0 : index
    %29 = vector.load %arg2[%c3, %c0_62, %c0_63] : memref<9x128x128xf32, #tpu.memory_space<vmem>>, vector<1x128x128xf32>
    %30 = vector.shape_cast %29 : vector<1x128x128xf32> to vector<128x128xf32>
    %cst_64 = arith.constant dense<0.000000e+00> : vector<128x128xf32>
    %31 = tpu.matmul %28, %30, %cst_64 {dimension_numbers = #tpu.dot_dimension_numbers<[1], [0], [0], [1], [0, 0, 1, 1], [], []>} : vector<128x128xf32>, vector<128x128xf32>, vector<128x128xf32> -> vector<128x128xf32>
    %32 = arith.addf %26, %31 : vector<128x128xf32>
    %c0_65 = arith.constant 0 : index
    %c1_66 = arith.constant 1 : index
    %c1_67 = arith.constant 1 : index
    %c0_68 = arith.constant 0 : index
    %33 = vector.load %arg7[%c0_65, %c1_66, %c1_67, %c0_68] : memref<2x10x10x128xf32, #tpu.memory_space<vmem>>, vector<2x8x8x128xf32>
    %34 = vector.shape_cast %33 : vector<2x8x8x128xf32> to vector<128x128xf32>
    %c4 = arith.constant 4 : index
    %c0_69 = arith.constant 0 : index
    %c0_70 = arith.constant 0 : index
    %35 = vector.load %arg2[%c4, %c0_69, %c0_70] : memref<9x128x128xf32, #tpu.memory_space<vmem>>, vector<1x128x128xf32>
    %36 = vector.shape_cast %35 : vector<1x128x128xf32> to vector<128x128xf32>
    %cst_71 = arith.constant dense<0.000000e+00> : vector<128x128xf32>
    %37 = tpu.matmul %34, %36, %cst_71 {dimension_numbers = #tpu.dot_dimension_numbers<[1], [0], [0], [1], [0, 0, 1, 1], [], []>} : vector<128x128xf32>, vector<128x128xf32>, vector<128x128xf32> -> vector<128x128xf32>
    %38 = arith.addf %32, %37 : vector<128x128xf32>
    %c0_72 = arith.constant 0 : index
    %c1_73 = arith.constant 1 : index
    %c2_74 = arith.constant 2 : index
    %c0_75 = arith.constant 0 : index
    %39 = vector.load %arg7[%c0_72, %c1_73, %c2_74, %c0_75] : memref<2x10x10x128xf32, #tpu.memory_space<vmem>>, vector<2x8x8x128xf32>
    %40 = vector.shape_cast %39 : vector<2x8x8x128xf32> to vector<128x128xf32>
    %c5 = arith.constant 5 : index
    %c0_76 = arith.constant 0 : index
    %c0_77 = arith.constant 0 : index
    %41 = vector.load %arg2[%c5, %c0_76, %c0_77] : memref<9x128x128xf32, #tpu.memory_space<vmem>>, vector<1x128x128xf32>
    %42 = vector.shape_cast %41 : vector<1x128x128xf32> to vector<128x128xf32>
    %cst_78 = arith.constant dense<0.000000e+00> : vector<128x128xf32>
    %43 = tpu.matmul %40, %42, %cst_78 {dimension_numbers = #tpu.dot_dimension_numbers<[1], [0], [0], [1], [0, 0, 1, 1], [], []>} : vector<128x128xf32>, vector<128x128xf32>, vector<128x128xf32> -> vector<128x128xf32>
    %44 = arith.addf %38, %43 : vector<128x128xf32>
    %c0_79 = arith.constant 0 : index
    %c2_80 = arith.constant 2 : index
    %c0_81 = arith.constant 0 : index
    %c0_82 = arith.constant 0 : index
    %45 = vector.load %arg7[%c0_79, %c2_80, %c0_81, %c0_82] : memref<2x10x10x128xf32, #tpu.memory_space<vmem>>, vector<2x8x8x128xf32>
    %46 = vector.shape_cast %45 : vector<2x8x8x128xf32> to vector<128x128xf32>
    %c6 = arith.constant 6 : index
    %c0_83 = arith.constant 0 : index
    %c0_84 = arith.constant 0 : index
    %47 = vector.load %arg2[%c6, %c0_83, %c0_84] : memref<9x128x128xf32, #tpu.memory_space<vmem>>, vector<1x128x128xf32>
    %48 = vector.shape_cast %47 : vector<1x128x128xf32> to vector<128x128xf32>
    %cst_85 = arith.constant dense<0.000000e+00> : vector<128x128xf32>
    %49 = tpu.matmul %46, %48, %cst_85 {dimension_numbers = #tpu.dot_dimension_numbers<[1], [0], [0], [1], [0, 0, 1, 1], [], []>} : vector<128x128xf32>, vector<128x128xf32>, vector<128x128xf32> -> vector<128x128xf32>
    %50 = arith.addf %44, %49 : vector<128x128xf32>
    %c0_86 = arith.constant 0 : index
    %c2_87 = arith.constant 2 : index
    %c1_88 = arith.constant 1 : index
    %c0_89 = arith.constant 0 : index
    %51 = vector.load %arg7[%c0_86, %c2_87, %c1_88, %c0_89] : memref<2x10x10x128xf32, #tpu.memory_space<vmem>>, vector<2x8x8x128xf32>
    %52 = vector.shape_cast %51 : vector<2x8x8x128xf32> to vector<128x128xf32>
    %c7_90 = arith.constant 7 : index
    %c0_91 = arith.constant 0 : index
    %c0_92 = arith.constant 0 : index
    %53 = vector.load %arg2[%c7_90, %c0_91, %c0_92] : memref<9x128x128xf32, #tpu.memory_space<vmem>>, vector<1x128x128xf32>
    %54 = vector.shape_cast %53 : vector<1x128x128xf32> to vector<128x128xf32>
    %cst_93 = arith.constant dense<0.000000e+00> : vector<128x128xf32>
    %55 = tpu.matmul %52, %54, %cst_93 {dimension_numbers = #tpu.dot_dimension_numbers<[1], [0], [0], [1], [0, 0, 1, 1], [], []>} : vector<128x128xf32>, vector<128x128xf32>, vector<128x128xf32> -> vector<128x128xf32>
    %56 = arith.addf %50, %55 : vector<128x128xf32>
    %c0_94 = arith.constant 0 : index
    %c2_95 = arith.constant 2 : index
    %c2_96 = arith.constant 2 : index
    %c0_97 = arith.constant 0 : index
    %57 = vector.load %arg7[%c0_94, %c2_95, %c2_96, %c0_97] : memref<2x10x10x128xf32, #tpu.memory_space<vmem>>, vector<2x8x8x128xf32>
    %58 = vector.shape_cast %57 : vector<2x8x8x128xf32> to vector<128x128xf32>
    %c8 = arith.constant 8 : index
    %c0_98 = arith.constant 0 : index
    %c0_99 = arith.constant 0 : index
    %59 = vector.load %arg2[%c8, %c0_98, %c0_99] : memref<9x128x128xf32, #tpu.memory_space<vmem>>, vector<1x128x128xf32>
    %60 = vector.shape_cast %59 : vector<1x128x128xf32> to vector<128x128xf32>
    %cst_100 = arith.constant dense<0.000000e+00> : vector<128x128xf32>
    %61 = tpu.matmul %58, %60, %cst_100 {dimension_numbers = #tpu.dot_dimension_numbers<[1], [0], [0], [1], [0, 0, 1, 1], [], []>} : vector<128x128xf32>, vector<128x128xf32>, vector<128x128xf32> -> vector<128x128xf32>
    %62 = arith.addf %56, %61 : vector<128x128xf32>
    %c0_101 = arith.constant 0 : index
    %c0_102 = arith.constant 0 : index
    %63 = vector.load %arg3[%c0_101, %c0_102] : memref<1x128xf32, #tpu.memory_space<vmem>>, vector<1x128xf32>
    %64 = vector.broadcast %63 : vector<1x128xf32> to vector<128x128xf32>
    %65 = arith.addf %62, %64 : vector<128x128xf32>
    %cst_103 = arith.constant 0.000000e+00 : f32
    %66 = vector.broadcast %cst_103 : f32 to vector<128x128xf32>
    %67 = arith.cmpf ogt, %65, %66 : vector<128x128xf32>
    %cst_104 = arith.constant 0.000000e+00 : f32
    %68 = vector.broadcast %cst_104 : f32 to vector<128x128xf32>
    %69 = arith.minimumf %65, %68 : vector<128x128xf32>
    %70 = math.exp %69 : vector<128x128xf32>
    %cst_105 = arith.constant 1.000000e+00 : f32
    %71 = vector.broadcast %cst_105 : f32 to vector<128x128xf32>
    %72 = arith.subf %70, %71 : vector<128x128xf32>
    %73 = arith.select %67, %65, %72 : vector<128x128xi1>, vector<128x128xf32>
    %74 = vector.shape_cast %73 : vector<128x128xf32> to vector<2x8x8x128xf32>
    %c0_106 = arith.constant 0 : index
    %c1_107 = arith.constant 1 : index
    %c1_108 = arith.constant 1 : index
    %c0_109 = arith.constant 0 : index
    %75 = vector.load %arg8[%c0_106, %c1_107, %c1_108, %c0_109] : memref<2x10x10x128xf32, #tpu.memory_space<vmem>>, vector<2x8x8x128xf32>
    tpu.vector_store %arg8[%c0_106, %c1_107, %c1_108, %c0_109], %74 {strides = array<i32>} : memref<2x10x10x128xf32, #tpu.memory_space<vmem>>, vector<2x8x8x128xf32>,
    %c0_110 = arith.constant 0 : index
    %c1_111 = arith.constant 1 : index
    %c2_112 = arith.constant 2 : index
    %c0_113 = arith.constant 0 : index
    %76 = vector.load %arg8[%c0_110, %c1_111, %c2_112, %c0_113] : memref<2x10x10x128xf32, #tpu.memory_space<vmem>>, vector<2x8x1x128xf32>
    %c0_114 = arith.constant 0 : index
    %c1_115 = arith.constant 1 : index
    %c0_116 = arith.constant 0 : index
    %c0_117 = arith.constant 0 : index
    %77 = vector.load %arg8[%c0_114, %c1_115, %c0_116, %c0_117] : memref<2x10x10x128xf32, #tpu.memory_space<vmem>>, vector<2x8x1x128xf32>
    tpu.vector_store %arg8[%c0_114, %c1_115, %c0_116, %c0_117], %76 {strides = array<i32>} : memref<2x10x10x128xf32, #tpu.memory_space<vmem>>, vector<2x8x1x128xf32>,
    %c0_118 = arith.constant 0 : index
    %c1_119 = arith.constant 1 : index
    %c7_120 = arith.constant 7 : index
    %c0_121 = arith.constant 0 : index
    %78 = vector.load %arg8[%c0_118, %c1_119, %c7_120, %c0_121] : memref<2x10x10x128xf32, #tpu.memory_space<vmem>>, vector<2x8x1x128xf32>
    %c0_122 = arith.constant 0 : index
    %c1_123 = arith.constant 1 : index
    %c9_124 = arith.constant 9 : index
    %c0_125 = arith.constant 0 : index
    %79 = vector.load %arg8[%c0_122, %c1_123, %c9_124, %c0_125] : memref<2x10x10x128xf32, #tpu.memory_space<vmem>>, vector<2x8x1x128xf32>
    tpu.vector_store %arg8[%c0_122, %c1_123, %c9_124, %c0_125], %78 {strides = array<i32>} : memref<2x10x10x128xf32, #tpu.memory_space<vmem>>, vector<2x8x1x128xf32>,
    %c0_126 = arith.constant 0 : index
    %c2_127 = arith.constant 2 : index
    %c0_128 = arith.constant 0 : index
    %c0_129 = arith.constant 0 : index
    %80 = vector.load %arg8[%c0_126, %c2_127, %c0_128, %c0_129] : memref<2x10x10x128xf32, #tpu.memory_space<vmem>>, vector<2x1x10x128xf32>
    %c0_130 = arith.constant 0 : index
    %c0_131 = arith.constant 0 : index
    %c0_132 = arith.constant 0 : index
    %c0_133 = arith.constant 0 : index
    %81 = vector.load %arg8[%c0_130, %c0_131, %c0_132, %c0_133] : memref<2x10x10x128xf32, #tpu.memory_space<vmem>>, vector<2x1x10x128xf32>
    tpu.vector_store %arg8[%c0_130, %c0_131, %c0_132, %c0_133], %80 {strides = array<i32>} : memref<2x10x10x128xf32, #tpu.memory_space<vmem>>, vector<2x1x10x128xf32>,
    %c0_134 = arith.constant 0 : index
    %c7_135 = arith.constant 7 : index
    %c0_136 = arith.constant 0 : index
    %c0_137 = arith.constant 0 : index
    %82 = vector.load %arg8[%c0_134, %c7_135, %c0_136, %c0_137] : memref<2x10x10x128xf32, #tpu.memory_space<vmem>>, vector<2x1x10x128xf32>
    %c0_138 = arith.constant 0 : index
    %c9_139 = arith.constant 9 : index
    %c0_140 = arith.constant 0 : index
    %c0_141 = arith.constant 0 : index
    %83 = vector.load %arg8[%c0_138, %c9_139, %c0_140, %c0_141] : memref<2x10x10x128xf32, #tpu.memory_space<vmem>>, vector<2x1x10x128xf32>
    tpu.vector_store %arg8[%c0_138, %c9_139, %c0_140, %c0_141], %82 {strides = array<i32>} : memref<2x10x10x128xf32, #tpu.memory_space<vmem>>, vector<2x1x10x128xf32>,
    %c0_142 = arith.constant 0 : index
    %c0_143 = arith.constant 0 : index
    %c0_144 = arith.constant 0 : index
    %c0_145 = arith.constant 0 : index
    %84 = vector.load %arg8[%c0_142, %c0_143, %c0_144, %c0_145] : memref<2x10x10x128xf32, #tpu.memory_space<vmem>>, vector<2x8x8x128xf32>
    %85 = vector.shape_cast %84 : vector<2x8x8x128xf32> to vector<128x128xf32>
    %c0_146 = arith.constant 0 : index
    %c0_147 = arith.constant 0 : index
    %c0_148 = arith.constant 0 : index
    %86 = vector.load %arg4[%c0_146, %c0_147, %c0_148] : memref<9x128x128xf32, #tpu.memory_space<vmem>>, vector<1x128x128xf32>
    %87 = vector.shape_cast %86 : vector<1x128x128xf32> to vector<128x128xf32>
    %cst_149 = arith.constant dense<0.000000e+00> : vector<128x128xf32>
    %88 = tpu.matmul %85, %87, %cst_149 {dimension_numbers = #tpu.dot_dimension_numbers<[1], [0], [0], [1], [0, 0, 1, 1], [], []>} : vector<128x128xf32>, vector<128x128xf32>, vector<128x128xf32> -> vector<128x128xf32>
    %c0_150 = arith.constant 0 : index
    %c0_151 = arith.constant 0 : index
    %c1_152 = arith.constant 1 : index
    %c0_153 = arith.constant 0 : index
    %89 = vector.load %arg8[%c0_150, %c0_151, %c1_152, %c0_153] : memref<2x10x10x128xf32, #tpu.memory_space<vmem>>, vector<2x8x8x128xf32>
    %90 = vector.shape_cast %89 : vector<2x8x8x128xf32> to vector<128x128xf32>
    %c1_154 = arith.constant 1 : index
    %c0_155 = arith.constant 0 : index
    %c0_156 = arith.constant 0 : index
    %91 = vector.load %arg4[%c1_154, %c0_155, %c0_156] : memref<9x128x128xf32, #tpu.memory_space<vmem>>, vector<1x128x128xf32>
    %92 = vector.shape_cast %91 : vector<1x128x128xf32> to vector<128x128xf32>
    %cst_157 = arith.constant dense<0.000000e+00> : vector<128x128xf32>
    %93 = tpu.matmul %90, %92, %cst_157 {dimension_numbers = #tpu.dot_dimension_numbers<[1], [0], [0], [1], [0, 0, 1, 1], [], []>} : vector<128x128xf32>, vector<128x128xf32>, vector<128x128xf32> -> vector<128x128xf32>
    %94 = arith.addf %88, %93 : vector<128x128xf32>
    %c0_158 = arith.constant 0 : index
    %c0_159 = arith.constant 0 : index
    %c2_160 = arith.constant 2 : index
    %c0_161 = arith.constant 0 : index
    %95 = vector.load %arg8[%c0_158, %c0_159, %c2_160, %c0_161] : memref<2x10x10x128xf32, #tpu.memory_space<vmem>>, vector<2x8x8x128xf32>
    %96 = vector.shape_cast %95 : vector<2x8x8x128xf32> to vector<128x128xf32>
    %c2_162 = arith.constant 2 : index
    %c0_163 = arith.constant 0 : index
    %c0_164 = arith.constant 0 : index
    %97 = vector.load %arg4[%c2_162, %c0_163, %c0_164] : memref<9x128x128xf32, #tpu.memory_space<vmem>>, vector<1x128x128xf32>
    %98 = vector.shape_cast %97 : vector<1x128x128xf32> to vector<128x128xf32>
    %cst_165 = arith.constant dense<0.000000e+00> : vector<128x128xf32>
    %99 = tpu.matmul %96, %98, %cst_165 {dimension_numbers = #tpu.dot_dimension_numbers<[1], [0], [0], [1], [0, 0, 1, 1], [], []>} : vector<128x128xf32>, vector<128x128xf32>, vector<128x128xf32> -> vector<128x128xf32>
    %100 = arith.addf %94, %99 : vector<128x128xf32>
    %c0_166 = arith.constant 0 : index
    %c1_167 = arith.constant 1 : index
    %c0_168 = arith.constant 0 : index
    %c0_169 = arith.constant 0 : index
    %101 = vector.load %arg8[%c0_166, %c1_167, %c0_168, %c0_169] : memref<2x10x10x128xf32, #tpu.memory_space<vmem>>, vector<2x8x8x128xf32>
    %102 = vector.shape_cast %101 : vector<2x8x8x128xf32> to vector<128x128xf32>
    %c3_170 = arith.constant 3 : index
    %c0_171 = arith.constant 0 : index
    %c0_172 = arith.constant 0 : index
    %103 = vector.load %arg4[%c3_170, %c0_171, %c0_172] : memref<9x128x128xf32, #tpu.memory_space<vmem>>, vector<1x128x128xf32>
    %104 = vector.shape_cast %103 : vector<1x128x128xf32> to vector<128x128xf32>
    %cst_173 = arith.constant dense<0.000000e+00> : vector<128x128xf32>
    %105 = tpu.matmul %102, %104, %cst_173 {dimension_numbers = #tpu.dot_dimension_numbers<[1], [0], [0], [1], [0, 0, 1, 1], [], []>} : vector<128x128xf32>, vector<128x128xf32>, vector<128x128xf32> -> vector<128x128xf32>
    %106 = arith.addf %100, %105 : vector<128x128xf32>
    %c0_174 = arith.constant 0 : index
    %c1_175 = arith.constant 1 : index
    %c1_176 = arith.constant 1 : index
    %c0_177 = arith.constant 0 : index
    %107 = vector.load %arg8[%c0_174, %c1_175, %c1_176, %c0_177] : memref<2x10x10x128xf32, #tpu.memory_space<vmem>>, vector<2x8x8x128xf32>
    %108 = vector.shape_cast %107 : vector<2x8x8x128xf32> to vector<128x128xf32>
    %c4_178 = arith.constant 4 : index
    %c0_179 = arith.constant 0 : index
    %c0_180 = arith.constant 0 : index
    %109 = vector.load %arg4[%c4_178, %c0_179, %c0_180] : memref<9x128x128xf32, #tpu.memory_space<vmem>>, vector<1x128x128xf32>
    %110 = vector.shape_cast %109 : vector<1x128x128xf32> to vector<128x128xf32>
    %cst_181 = arith.constant dense<0.000000e+00> : vector<128x128xf32>
    %111 = tpu.matmul %108, %110, %cst_181 {dimension_numbers = #tpu.dot_dimension_numbers<[1], [0], [0], [1], [0, 0, 1, 1], [], []>} : vector<128x128xf32>, vector<128x128xf32>, vector<128x128xf32> -> vector<128x128xf32>
    %112 = arith.addf %106, %111 : vector<128x128xf32>
    %c0_182 = arith.constant 0 : index
    %c1_183 = arith.constant 1 : index
    %c2_184 = arith.constant 2 : index
    %c0_185 = arith.constant 0 : index
    %113 = vector.load %arg8[%c0_182, %c1_183, %c2_184, %c0_185] : memref<2x10x10x128xf32, #tpu.memory_space<vmem>>, vector<2x8x8x128xf32>
    %114 = vector.shape_cast %113 : vector<2x8x8x128xf32> to vector<128x128xf32>
    %c5_186 = arith.constant 5 : index
    %c0_187 = arith.constant 0 : index
    %c0_188 = arith.constant 0 : index
    %115 = vector.load %arg4[%c5_186, %c0_187, %c0_188] : memref<9x128x128xf32, #tpu.memory_space<vmem>>, vector<1x128x128xf32>
    %116 = vector.shape_cast %115 : vector<1x128x128xf32> to vector<128x128xf32>
    %cst_189 = arith.constant dense<0.000000e+00> : vector<128x128xf32>
    %117 = tpu.matmul %114, %116, %cst_189 {dimension_numbers = #tpu.dot_dimension_numbers<[1], [0], [0], [1], [0, 0, 1, 1], [], []>} : vector<128x128xf32>, vector<128x128xf32>, vector<128x128xf32> -> vector<128x128xf32>
    %118 = arith.addf %112, %117 : vector<128x128xf32>
    %c0_190 = arith.constant 0 : index
    %c2_191 = arith.constant 2 : index
    %c0_192 = arith.constant 0 : index
    %c0_193 = arith.constant 0 : index
    %119 = vector.load %arg8[%c0_190, %c2_191, %c0_192, %c0_193] : memref<2x10x10x128xf32, #tpu.memory_space<vmem>>, vector<2x8x8x128xf32>
    %120 = vector.shape_cast %119 : vector<2x8x8x128xf32> to vector<128x128xf32>
    %c6_194 = arith.constant 6 : index
    %c0_195 = arith.constant 0 : index
    %c0_196 = arith.constant 0 : index
    %121 = vector.load %arg4[%c6_194, %c0_195, %c0_196] : memref<9x128x128xf32, #tpu.memory_space<vmem>>, vector<1x128x128xf32>
    %122 = vector.shape_cast %121 : vector<1x128x128xf32> to vector<128x128xf32>
    %cst_197 = arith.constant dense<0.000000e+00> : vector<128x128xf32>
    %123 = tpu.matmul %120, %122, %cst_197 {dimension_numbers = #tpu.dot_dimension_numbers<[1], [0], [0], [1], [0, 0, 1, 1], [], []>} : vector<128x128xf32>, vector<128x128xf32>, vector<128x128xf32> -> vector<128x128xf32>
    %124 = arith.addf %118, %123 : vector<128x128xf32>
    %c0_198 = arith.constant 0 : index
    %c2_199 = arith.constant 2 : index
    %c1_200 = arith.constant 1 : index
    %c0_201 = arith.constant 0 : index
    %125 = vector.load %arg8[%c0_198, %c2_199, %c1_200, %c0_201] : memref<2x10x10x128xf32, #tpu.memory_space<vmem>>, vector<2x8x8x128xf32>
    %126 = vector.shape_cast %125 : vector<2x8x8x128xf32> to vector<128x128xf32>
    %c7_202 = arith.constant 7 : index
    %c0_203 = arith.constant 0 : index
    %c0_204 = arith.constant 0 : index
    %127 = vector.load %arg4[%c7_202, %c0_203, %c0_204] : memref<9x128x128xf32, #tpu.memory_space<vmem>>, vector<1x128x128xf32>
    %128 = vector.shape_cast %127 : vector<1x128x128xf32> to vector<128x128xf32>
    %cst_205 = arith.constant dense<0.000000e+00> : vector<128x128xf32>
    %129 = tpu.matmul %126, %128, %cst_205 {dimension_numbers = #tpu.dot_dimension_numbers<[1], [0], [0], [1], [0, 0, 1, 1], [], []>} : vector<128x128xf32>, vector<128x128xf32>, vector<128x128xf32> -> vector<128x128xf32>
    %130 = arith.addf %124, %129 : vector<128x128xf32>
    %c0_206 = arith.constant 0 : index
    %c2_207 = arith.constant 2 : index
    %c2_208 = arith.constant 2 : index
    %c0_209 = arith.constant 0 : index
    %131 = vector.load %arg8[%c0_206, %c2_207, %c2_208, %c0_209] : memref<2x10x10x128xf32, #tpu.memory_space<vmem>>, vector<2x8x8x128xf32>
    %132 = vector.shape_cast %131 : vector<2x8x8x128xf32> to vector<128x128xf32>
    %c8_210 = arith.constant 8 : index
    %c0_211 = arith.constant 0 : index
    %c0_212 = arith.constant 0 : index
    %133 = vector.load %arg4[%c8_210, %c0_211, %c0_212] : memref<9x128x128xf32, #tpu.memory_space<vmem>>, vector<1x128x128xf32>
    %134 = vector.shape_cast %133 : vector<1x128x128xf32> to vector<128x128xf32>
    %cst_213 = arith.constant dense<0.000000e+00> : vector<128x128xf32>
    %135 = tpu.matmul %132, %134, %cst_213 {dimension_numbers = #tpu.dot_dimension_numbers<[1], [0], [0], [1], [0, 0, 1, 1], [], []>} : vector<128x128xf32>, vector<128x128xf32>, vector<128x128xf32> -> vector<128x128xf32>
    %136 = arith.addf %130, %135 : vector<128x128xf32>
    %c0_214 = arith.constant 0 : index
    %c0_215 = arith.constant 0 : index
    %137 = vector.load %arg5[%c0_214, %c0_215] : memref<1x128xf32, #tpu.memory_space<vmem>>, vector<1x128xf32>
    %138 = vector.broadcast %137 : vector<1x128xf32> to vector<128x128xf32>
    %139 = arith.addf %136, %138 : vector<128x128xf32>
    %cst_216 = arith.constant 0.000000e+00 : f32
    %140 = vector.broadcast %cst_216 : f32 to vector<128x128xf32>
    %141 = arith.cmpf ogt, %139, %140 : vector<128x128xf32>
    %cst_217 = arith.constant 0.000000e+00 : f32
    %142 = vector.broadcast %cst_217 : f32 to vector<128x128xf32>
    %143 = arith.minimumf %139, %142 : vector<128x128xf32>
    %144 = math.exp %143 : vector<128x128xf32>
    %cst_218 = arith.constant 1.000000e+00 : f32
    %145 = vector.broadcast %cst_218 : f32 to vector<128x128xf32>
    %146 = arith.subf %144, %145 : vector<128x128xf32>
    %147 = arith.select %141, %139, %146 : vector<128x128xi1>, vector<128x128xf32>
    %148 = vector.shape_cast %147 : vector<128x128xf32> to vector<2x8x8x128xf32>
    %c0_219 = arith.constant 0 : index
    %c0_220 = arith.constant 0 : index
    %c0_221 = arith.constant 0 : index
    %c0_222 = arith.constant 0 : index
    %149 = vector.load %arg6[%c0_219, %c0_220, %c0_221, %c0_222] : memref<2x8x8x128xf32, #tpu.memory_space<vmem>>, vector<2x8x8x128xf32>
    tpu.vector_store %arg6[%c0_219, %c0_220, %c0_221, %c0_222], %148 {strides = array<i32>} : memref<2x8x8x128xf32, #tpu.memory_space<vmem>>, vector<2x8x8x128xf32>,
    return
  }
  func.func @transform_0(%arg0: i32) -> (i32, i32, i32, i32) {
    %c0_i32 = arith.constant 0 : i32
    %c0_i32_0 = arith.constant 0 : i32
    %c0_i32_1 = arith.constant 0 : i32
    %c0_i32_2 = arith.constant 0 : i32
    %c0_i32_3 = arith.constant 0 : i32
    return %c0_i32, %c0_i32_0, %c0_i32_1, %c0_i32_2 : i32, i32, i32, i32
  }
  func.func @transform_1(%arg0: i32) -> (i32, i32, i32) {
    %c0_i32 = arith.constant 0 : i32
    %c0_i32_0 = arith.constant 0 : i32
    %c0_i32_1 = arith.constant 0 : i32
    %c0_i32_2 = arith.constant 0 : i32
    return %c0_i32, %c0_i32_0, %c0_i32_1 : i32, i32, i32
  }
  func.func @transform_2(%arg0: i32) -> (i32, i32) {
    %c0_i32 = arith.constant 0 : i32
    %c0_i32_0 = arith.constant 0 : i32
    %c0_i32_1 = arith.constant 0 : i32
    return %c0_i32, %c0_i32_0 : i32, i32
  }
  func.func @transform_3(%arg0: i32) -> (i32, i32, i32) {
    %c0_i32 = arith.constant 0 : i32
    %c0_i32_0 = arith.constant 0 : i32
    %c0_i32_1 = arith.constant 0 : i32
    %c0_i32_2 = arith.constant 0 : i32
    return %c0_i32, %c0_i32_0, %c0_i32_1 : i32, i32, i32
  }
  func.func @transform_4(%arg0: i32) -> (i32, i32) {
    %c0_i32 = arith.constant 0 : i32
    %c0_i32_0 = arith.constant 0 : i32
    %c0_i32_1 = arith.constant 0 : i32
    return %c0_i32, %c0_i32_0 : i32, i32
  }
  func.func @transform_5(%arg0: i32) -> (i32, i32, i32, i32) {
    %c0_i32 = arith.constant 0 : i32
    %c0_i32_0 = arith.constant 0 : i32
    %c0_i32_1 = arith.constant 0 : i32
    %c0_i32_2 = arith.constant 0 : i32
    %c0_i32_3 = arith.constant 0 : i32
    return %c0_i32, %c0_i32_0, %c0_i32_1, %c0_i32_2 : i32, i32, i32, i32
  }
}

</mosaic_0001>

<bundles_post_ra>
// kernel: refine_upsample_block.1
= control target key start
LH: loop header
LB: loop body
LE: loop exit
PB: predicated region body
PF: predicated region fallthrough
CT: control target
= control target key end

     0   :  { %10 = vsyncpa [#allocation5], 0  ;;  %s7341_s0 = inlined_call_operand.hbm [shape: f32[2,8,8,128], index: 0, kind: input, shape index: {}]   ;;  %s7342_s1 = inlined_call_operand.hbm [shape: f32[9,128,128], index: 1, kind: input, shape index: {}]   ;;  %s7343_s2 = inlined_call_operand.vmem [shape: f32[1,128], index: 2, kind: input, shape index: {}]   ;;  %s7344_s3 = inlined_call_operand.hbm [shape: f32[9,128,128], index: 3, kind: input, shape index: {}]   ;;  %s7345_s4 = inlined_call_operand.vmem [shape: f32[1,128], index: 4, kind: input, shape index: {}]   ;;  %s7346_s5 = inlined_call_operand.hbm [shape: f32[2,8,8,128], index: 5, kind: output, shape index: {}]  }
   0x1   :  { %11 = vsyncpa [#allocation8], 0 }
   0x2   :  { %12 = vsyncpa [#allocation6], 0  ;;  %s6590_s18 = smov [#allocation7]   ;;  %s6591_s20 = smov [#allocation4]  }
   0x3   :  { %s30_s19 = sshll.u32 %s6590_s18, 4  ;;  %s18_s21 = sshll.u32 %s6591_s20, 4  ;;  %s31_s19 = int_to_ptr.vmem [resolvable:$true] %s30_s19  ;;  %s6626_s21 = int_to_ptr.vmem [resolvable:$true] %s18_s21 }
   0x4   :  { %s6496_s24 = scalar_lea.hbm %s7342_s1, 18432 }
   0x5   :  { %p6497_p0 = scmp.ne.s32.totalorder %s7342_s1, %s6496_s24  ;;  %p6500_p1 = scmp.lt.u32.totalorder %s6496_s24, %s7342_s1 }
   0x7   :  { %p6502_p2 = pnand %p6500_p1, %p6497_p0 }
   0x9   :  { %6505 = shalt.err (!%p6502_p2)
}
   0xa   :  { %s6506_s29 = scalar_lea.vmem %s31_s19, 18432  ;;  %p6511_p4 = scmp.lt.s32.totalorder %s31_s19, %s31_s19 }
   0xb   :  { %p6507_p3 = scmp.ne.s32.totalorder %s31_s19, %s6506_s29  ;;  %p6512_p5 = scmp.lt.s32.totalorder %s6506_s29, %s6506_s29 }
   0xd   :  { %p6513_p6 = por %p6512_p5, %p6511_p4 }
   0xf   :  { %p6514_p7 = pnand %p6513_p6, %p6507_p3 }
  0x11   :  { %6517 = shalt.err (!%p6514_p7)
}
  0x12   :  { %s6592_s30 = smov 128   ;;  %s6593_s6 = smov 8  }
  0x13   :  { %36 = dma.hbm_to_vmem [thread:$0]  %s7342_s1, 18432, %s31_s19, [#allocation8], %s6592_s30, %s6592_s30, %s6593_s6  }
  0x14   :  { %s6518_s11 = scalar_lea.hbm %s7341_s0, 2048 }
  0x15   :  { %p6519_p8 = scmp.ne.s32.totalorder %s7341_s0, %s6518_s11  ;;  %p6522_p9 = scmp.lt.u32.totalorder %s6518_s11, %s7341_s0 }
  0x17   :  { %p6524_p10 = pnand %p6522_p9, %p6519_p8 }
  0x19   :  { %6527 = shalt.err (!%p6524_p10)
}
  0x1a   :  { %s6528_s16 = scalar_lea.vmem %s6626_s21, 2048  ;;  %p6533_p12 = scmp.lt.s32.totalorder %s6626_s21, %s6626_s21 }
  0x1b   :  { %p6529_p11 = scmp.ne.s32.totalorder %s6626_s21, %s6528_s16  ;;  %p6534_p13 = scmp.lt.s32.totalorder %s6528_s16, %s6528_s16 }
  0x1d   :  { %p6535_p0 = por %p6534_p13, %p6533_p12 }
  0x1f   :  { %p6536_p1 = pnand %p6535_p0, %p6529_p11 }
  0x21   :  { %6539 = shalt.err (!%p6536_p1)
}
  0x22   :  { %24 = dma.hbm_to_vmem [thread:$0]  %s7341_s0, 2048, %s6626_s21, [#allocation5], %s6592_s30, %s6592_s30, %s6593_s6  }
  0x23   :  { %s6594_s18 = smov [#allocation9]   ;;  %s6540_s23 = scalar_lea.hbm %s7344_s3, 18432 }
  0x24   :  { %s44_s19 = sshll.u32 %s6594_s18, 4  ;;  %p6541_p2 = scmp.ne.s32.totalorder %s7344_s3, %s6540_s23  ;;  %s45_s19 = int_to_ptr.vmem [resolvable:$true] %s44_s19 }
  0x25   :  { %p6544_p3 = scmp.lt.u32.totalorder %s6540_s23, %s7344_s3 }
  0x27   :  { %p6546_p4 = pnand %p6544_p3, %p6541_p2 }
  0x29   :  { %6549 = shalt.err (!%p6546_p4)
}
  0x2a   :  { %s6550_s28 = scalar_lea.vmem %s45_s19, 18432  ;;  %p6555_p6 = scmp.lt.s32.totalorder %s45_s19, %s45_s19 }
  0x2b   :  { %p6551_p5 = scmp.ne.s32.totalorder %s45_s19, %s6550_s28  ;;  %p6556_p7 = scmp.lt.s32.totalorder %s6550_s28, %s6550_s28 }
  0x2d   :  { %p6557_p8 = por %p6556_p7, %p6555_p6 }
  0x2f   :  { %p6558_p9 = pnand %p6557_p8, %p6551_p5 }
  0x31   :  { %6561 = shalt.err (!%p6558_p9)
}
  0x32   :  { %50 = dma.hbm_to_vmem [thread:$0]  %s7344_s3, 18432, %s45_s19, [#allocation8], %s6592_s30, %s6592_s30, %s6593_s6  }
  0x33   :  { %6584 = dma.done.wait [#allocation5], 2048  }
  0x34   :  { %6585 = vsyncadd [#allocation5], 4294965248 }
  0x35   :  { %6586 = dma.done.wait [#allocation8], 36864  }
  0x36   :  { %6587 = vsyncadd [#allocation8], 4294930432  ;;  %v227_v0 = vld [vmem:[#allocation7 + $0x80] sm:$0xff]  ;;  %v228_v1 = vld [vmem:[#allocation7 + $0x88] sm:$0xff] }
  0x37   :  { %v229_v2 = vld [vmem:[#allocation7 + $0x90] sm:$0xff]  ;;  %v5594_v3 = vpack.c.bf16 %v228_v1, %v227_v0  ;;  %v230_v4 = vld [vmem:[#allocation7 + $0x98] sm:$0xff]  ;;  %v231_v6 = vld [vmem:[#allocation7 + $0xa0] sm:$0xff] }
  0x38   :  { %v5598_v5 = vpack.c.bf16 %v230_v4, %v229_v2  ;;  %v232_v7 = vld [vmem:[#allocation7 + $0xa8] sm:$0xff]  ;;  %v6680_v10 = vld [vmem:[#allocation4] sm:$0xff]  ;;  %v233_v11 = vld [vmem:[#allocation7 + $0xb0] sm:$0xff] }
  0x39   :  { %5595 = vmatprep.subr.bf16.mxu0 %v5594_v3  ;;  %v5602_v8 = vpack.c.bf16 %v232_v7, %v231_v6  ;;  %v6678_v9 = vld [vmem:[#allocation4 + $0x8] sm:$0xff]  ;;  %v234_v12 = vld [vmem:[#allocation7 + $0xb8] sm:$0xff]  ;;  %79 = vst [vmem:[#allocation2 + $0x11] sm:$0xff] %v6680_v10  ;;  %v6684_v13 = vld [vmem:[#allocation4 + $0x10] sm:$0xff] }
  0x3a   :  { %5597 = vmatpush3.bf16.msra.mxu0 %v5594_v3  ;;  %80 = vst [vmem:[#allocation2 + $0x21] sm:$0xff] %v6678_v9  ;;  %81 = vst [vmem:[#allocation2 + $0x31] sm:$0xff] %v6684_v13  ;;  %v6687_v14 = vld [vmem:[#allocation4 + $0x18] sm:$0xff]  ;;  %v6690_v15 = vld [vmem:[#allocation4 + $0x20] sm:$0xff]  ;;  %v5606_v16 = vpack.c.bf16 %v234_v12, %v233_v11 }
  0x3b   :  { %5599 = vmatprep.subr.bf16.mxu0 %v5598_v5  ;;  %82 = vst [vmem:[#allocation2 + $0x41] sm:$0xff] %v6687_v14  ;;  %v235_v17 = vld [vmem:[#allocation7 + $0xc0] sm:$0xff]  ;;  %83 = vst [vmem:[#allocation2 + $0x51] sm:$0xff] %v6690_v15  ;;  %v6693_v18 = vld [vmem:[#allocation4 + $0x28] sm:$0xff] }
  0x3c   :  { %v6695_v19 = vld [vmem:[#allocation4 + $0x30] sm:$0xff]  ;;  %v236_v20 = vld [vmem:[#allocation7 + $0xc8] sm:$0xff]  ;;  %84 = vst [vmem:[#allocation2 + $0x61] sm:$0xff] %v6693_v18  ;;  %v6701_v22 = vld [vmem:[#allocation4 + $0x40] sm:$0xff] }
  0x3d   :  { %85 = vst [vmem:[#allocation2 + $0x71] sm:$0xff] %v6695_v19  ;;  %v6699_v21 = vld [vmem:[#allocation4 + $0x48] sm:$0xff]  ;;  %87 = vst [vmem:[#allocation2 + $0xb1] sm:$0xff] %v6701_v22  ;;  %v6705_v23 = vld [vmem:[#allocation4 + $0x50] sm:$0xff]  ;;  %v5610_v25 = vpack.c.bf16 %v236_v20, %v235_v17 }
  0x3e   :  { %5601 = vmatpush3.bf16.msra.mxu0 %v5598_v5  ;;  %88 = vst [vmem:[#allocation2 + $0xc1] sm:$0xff] %v6699_v21  ;;  %89 = vst [vmem:[#allocation2 + $0xd1] sm:$0xff] %v6705_v23  ;;  %v6708_v24 = vld [vmem:[#allocation4 + $0x58] sm:$0xff]  ;;  %v6711_v28 = vld [vmem:[#allocation4 + $0x60] sm:$0xff] }
  0x3f   :  { %5603 = vmatprep.subr.bf16.mxu0 %v5602_v8  ;;  %90 = vst [vmem:[#allocation2 + $0xe1] sm:$0xff] %v6708_v24  ;;  %v237_v29 = vld [vmem:[#allocation7 + $0xd0] sm:$0xff]  ;;  %v238_v30 = vld [vmem:[#allocation7 + $0xd8] sm:$0xff]  ;;  %91 = vst [vmem:[#allocation2 + $0xf1] sm:$0xff] %v6711_v28 }
  0x40   :  { %v6714_v31 = vld [vmem:[#allocation4 + $0x68] sm:$0xff]  ;;  %v6717_v32 = vld [vmem:[#allocation4 + $0x70] sm:$0xff]  ;;  %v5614_v34 = vpack.c.bf16 %v238_v30, %v237_v29  ;;  %v239_v35 = vld [vmem:[#allocation7 + $0xe0] sm:$0xff] }
  0x41   :  { %v96_v26 = vld [vmem:[#allocation2 + $0x22] sm:$0x1]  ;;  %v128_v27 = vld [vmem:[#allocation2 + $0x27] sm:$0x1]  ;;  %92 = vst [vmem:[#allocation2 + $0x101] sm:$0xff] %v6714_v31  ;;  %93 = vst [vmem:[#allocation2 + $0x111] sm:$0xff] %v6717_v32 }
  0x42   :  { %5605 = vmatpush3.bf16.msra.mxu0 %v5602_v8  ;;  %112 = vst [vmem:[#allocation2 + $0x20] sm:$0x1] %v96_v26  ;;  %144 = vst [vmem:[#allocation2 + $0x29] sm:$0x1] %v128_v27  ;;  %v95_v33 = vld [vmem:[#allocation2 + $0x12] sm:$0x1] }
  0x43   :  { %5607 = vmatprep.subr.bf16.mxu0 %v5606_v16  ;;  %v240_v36 = vld [vmem:[#allocation7 + $0xe8] sm:$0xff]  ;;  %111 = vst [vmem:[#allocation2 + $0x10] sm:$0x1] %v95_v33  ;;  %v97_v37 = vld [vmem:[#allocation2 + $0x32] sm:$0x1]  ;;  %v242_v48 = vld [vmem:[#allocation7 + $0xf8] sm:$0xff] }
  0x44   :  { %113 = vst [vmem:[#allocation2 + $0x30] sm:$0x1] %v97_v37  ;;  %v98_v40 = vld [vmem:[#allocation2 + $0x42] sm:$0x1]  ;;  %v99_v41 = vld [vmem:[#allocation2 + $0x52] sm:$0x1]  ;;  %v5618_v44 = vpack.c.bf16 %v240_v36, %v239_v35 }
  0x45   :  { %v104_v38 = vld [vmem:[#allocation2 + $0xc2] sm:$0x1]  ;;  %v136_v39 = vld [vmem:[#allocation2 + $0xc7] sm:$0x1]  ;;  %114 = vst [vmem:[#allocation2 + $0x40] sm:$0x1] %v98_v40 }
  0x46   :  { %5609 = vmatpush3.bf16.msra.mxu0 %v5606_v16  ;;  %120 = vst [vmem:[#allocation2 + $0xc0] sm:$0x1] %v104_v38  ;;  %152 = vst [vmem:[#allocation2 + $0xc9] sm:$0x1] %v136_v39  ;;  %v100_v42 = vld [vmem:[#allocation2 + $0x62] sm:$0x1] }
  0x47   :  { %5611 = vmatprep.subr.bf16.mxu0 %v5610_v25  ;;  %115 = vst [vmem:[#allocation2 + $0x50] sm:$0x1] %v99_v41  ;;  %v101_v43 = vld [vmem:[#allocation2 + $0x72] sm:$0x1]  ;;  %116 = vst [vmem:[#allocation2 + $0x60] sm:$0x1] %v100_v42 }
  0x48   :  { %117 = vst [vmem:[#allocation2 + $0x70] sm:$0x1] %v101_v43  ;;  %v241_v47 = vld [vmem:[#allocation7 + $0xf0] sm:$0xff]  ;;  %v106_v51 = vld [vmem:[#allocation2 + $0xe2] sm:$0x1]  ;;  %v195_v55 = vld [vmem:[#allocation7 + $0x8] sm:$0xff] }
  0x49   :  { %v6720_v45 = vld [vmem:[#allocation2 + $0x20] sm:$0xff]  ;;  %v161_v46 = vld [vmem:[#allocation2 + $0x28] sm:$0x3]  ;;  %v103_v49 = vld [vmem:[#allocation2 + $0xb2] sm:$0x1]  ;;  %v5622_v53 = vpack.c.bf16 %v242_v48, %v241_v47 }
  0x4a   :  { %5613 = vmatpush3.bf16.msra.mxu0 %v5610_v25  ;;  %164 = vst [vmem:[#allocation2] sm:$0xff] %v6720_v45  ;;  %165 = vst [vmem:[#allocation2 + $0x8] sm:$0x3] %v161_v46  ;;  %v105_v50 = vld [vmem:[#allocation2 + $0xd2] sm:$0x1]  ;;  %v194_v54 = vld [vmem:[#allocation7] sm:$0xff] }
  0x4b   :  { %5615 = vmatprep.subr.bf16.mxu0 %v5614_v34  ;;  %119 = vst [vmem:[#allocation2 + $0xb0] sm:$0x1] %v103_v49  ;;  %121 = vst [vmem:[#allocation2 + $0xd0] sm:$0x1] %v105_v50  ;;  %v107_v52 = vld [vmem:[#allocation2 + $0xf2] sm:$0x1]  ;;  %v5626_v62 = vpack.c.bf16 %v195_v55, %v194_v54 }
  0x4c   :  { %122 = vst [vmem:[#allocation2 + $0xe0] sm:$0x1] %v106_v51  ;;  %123 = vst [vmem:[#allocation2 + $0xf0] sm:$0x1] %v107_v52  ;;  %v108_v58 = vld [vmem:[#allocation2 + $0x102] sm:$0x1] }
  0x4d   :  { %v6723_v56 = vld [vmem:[#allocation2 + $0xc0] sm:$0xff]  ;;  %v163_v57 = vld [vmem:[#allocation2 + $0xc8] sm:$0x3]  ;;  %v109_v59 = vld [vmem:[#allocation2 + $0x112] sm:$0x1] }
  0x4e   :  { %5617 = vmatpush3.bf16.msra.mxu0 %v5614_v34  ;;  %166 = vst [vmem:[#allocation2 + $0xa0] sm:$0xff] %v6723_v56  ;;  %167 = vst [vmem:[#allocation2 + $0xa8] sm:$0x3] %v163_v57  ;;  %v196_v63 = vld [vmem:[#allocation7 + $0x10] sm:$0xff]  ;;  %v197_v0 = vld [vmem:[#allocation7 + $0x18] sm:$0xff] }
  0x4f   :  { %5619 = vmatprep.subr.bf16.mxu0 %v5618_v44  ;;  %v6726_v60 = vld [vmem:[#allocation2 + $0x70] sm:$0xff]  ;;  %124 = vst [vmem:[#allocation2 + $0x100] sm:$0x1] %v108_v58  ;;  %125 = vst [vmem:[#allocation2 + $0x110] sm:$0x1] %v109_v59  ;;  %v5630_v3 = vpack.c.bf16 %v197_v0, %v196_v63  ;;  %v198_v5 = vld [vmem:[#allocation7 + $0x20] sm:$0xff] }
  0x50   :  { %174 = vst [vmem:[#allocation2 + $0x90] sm:$0xff] %v6726_v60  ;;  %v127_v1 = vld [vmem:[#allocation2 + $0x17] sm:$0x1]  ;;  %v130_v4 = vld [vmem:[#allocation2 + $0x47] sm:$0x1]  ;;  %v199_v6 = vld [vmem:[#allocation7 + $0x28] sm:$0xff] }
  0x51   :  { %v210_v61 = vld [vmem:[#allocation2 + $0x1] sm:$0xff]  ;;  %143 = vst [vmem:[#allocation2 + $0x19] sm:$0x1] %v127_v1  ;;  %v129_v2 = vld [vmem:[#allocation2 + $0x37] sm:$0x1]  ;;  %v5634_v16 = vpack.c.bf16 %v199_v6, %v198_v5  ;;  %v201_v25 = vld [vmem:[#allocation7 + $0x38] sm:$0xff] }
  0x52   :  { %5621 = vmatpush3.bf16.msra.mxu0 %v5618_v44  ;;  %4618 = vmatprep.mubr.f32.mxu0 %v210_v61  ;;  %145 = vst [vmem:[#allocation2 + $0x39] sm:$0x1] %v129_v2  ;;  %146 = vst [vmem:[#allocation2 + $0x49] sm:$0x1] %v130_v4  ;;  %v131_v7 = vld [vmem:[#allocation2 + $0x57] sm:$0x1] }
  0x53   :  { %5623 = vmatprep.subr.bf16.mxu0 %v5622_v53  ;;  %147 = vst [vmem:[#allocation2 + $0x59] sm:$0x1] %v131_v7  ;;  %v132_v11 = vld [vmem:[#allocation2 + $0x67] sm:$0x1]  ;;  %v133_v12 = vld [vmem:[#allocation2 + $0x77] sm:$0x1] }
  0x54   :  { %148 = vst [vmem:[#allocation2 + $0x69] sm:$0x1] %v132_v11  ;;  %149 = vst [vmem:[#allocation2 + $0x79] sm:$0x1] %v133_v12  ;;  %v135_v17 = vld [vmem:[#allocation2 + $0xb7] sm:$0x1] }
  0x55   :  { %v200_v20 = vld [vmem:[#allocation7 + $0x30] sm:$0xff]  ;;  %151 = vst [vmem:[#allocation2 + $0xb9] sm:$0x1] %v135_v17  ;;  %v138_v27 = vld [vmem:[#allocation2 + $0xe7] sm:$0x1]  ;;  %v203_v34 = vld [vmem:[#allocation7 + $0x48] sm:$0xff] }
  0x56   :  { %5625 = vmatpush3.bf16.msra.mxu0 %v5622_v53  ;;  %v6730_v8 = vld [vmem:[#allocation2 + $0x110] sm:$0xff]  ;;  %v5638_v29 = vpack.c.bf16 %v201_v25, %v200_v20  ;;  %154 = vst [vmem:[#allocation2 + $0xe9] sm:$0x1] %v138_v27  ;;  %v202_v33 = vld [vmem:[#allocation7 + $0x40] sm:$0xff]  ;;  %v205_v40 = vld [vmem:[#allocation7 + $0x58] sm:$0xff] }
  0x57   :  { %5627 = vmatprep.subr.bf16.mxu0 %v5626_v62  ;;  %176 = vst [vmem:[#allocation2 + $0x130] sm:$0xff] %v6730_v8  ;;  %v137_v26 = vld [vmem:[#allocation2 + $0xd7] sm:$0x1]  ;;  %v140_v35 = vld [vmem:[#allocation2 + $0x107] sm:$0x1]  ;;  %v5642_v38 = vpack.c.bf16 %v203_v34, %v202_v33  ;;  %v6739_v41 = vld [vmem:[#allocation4 + $0x38] sm:$0xff] }
  0x58   :  { %153 = vst [vmem:[#allocation2 + $0xd9] sm:$0x1] %v137_v26  ;;  %v139_v30 = vld [vmem:[#allocation2 + $0xf7] sm:$0x1]  ;;  %156 = vst [vmem:[#allocation2 + $0x109] sm:$0x1] %v140_v35 }
  0x59   :  { %4619 = vmatmul.mubr.f32.vlgmr.msra.gmra.mrb[0].mxu0 %v6680_v10  ;;  %155 = vst [vmem:[#allocation2 + $0xf9] sm:$0x1] %v139_v30  ;;  %v141_v36 = vld [vmem:[#allocation2 + $0x117] sm:$0x1]  ;;  %v218_v37 = vld [vmem:[#allocation2 + $0xa1] sm:$0xff]  ;;  %86 = vst [vmem:[#allocation2 + $0x81] sm:$0xff] %v6739_v41 }
  0x5a   :  { %5629 = vmatpush3.bf16.msra.mxu0 %v5626_v62  ;;  %4621 = vmatprep.mubr.f32.mxu0 %v6678_v9  ;;  %157 = vst [vmem:[#allocation2 + $0x119] sm:$0x1] %v141_v36  ;;  %v204_v39 = vld [vmem:[#allocation7 + $0x50] sm:$0xff]  ;;  %v206_v43 = vld [vmem:[#allocation7 + $0x60] sm:$0xff]  ;;  %v207_v44 = vld [vmem:[#allocation7 + $0x68] sm:$0xff] }
  0x5b   :  { %5631 = vmatprep.subr.bf16.mxu0 %v5630_v3  ;;  %v5646_v42 = vpack.c.bf16 %v205_v40, %v204_v39  ;;  %v6743_v46 = vld [vmem:[#allocation4 + $0x78] sm:$0xff]  ;;  %v5650_v47 = vpack.c.bf16 %v207_v44, %v206_v43  ;;  %v208_v48 = vld [vmem:[#allocation7 + $0x70] sm:$0xff]  ;;  %v550_v52 = vld [vmem:[#allocation7 + $0x100] sm:$0xff] }
  0x5c   :  { %94 = vst [vmem:[#allocation2 + $0x121] sm:$0xff] %v6743_v46  ;;  %v209_v49 = vld [vmem:[#allocation7 + $0x78] sm:$0xff]  ;;  %v551_v53 = vld [vmem:[#allocation7 + $0x108] sm:$0xff]  ;;  %v552_v57 = vld [vmem:[#allocation7 + $0x110] sm:$0xff] }
  0x5d   :  { %4622 = vmatmul.mubr.f32.gmra.mrb[2].mxu0 %v6684_v13  ;;  %v5654_v51 = vpack.c.bf16 %v209_v49, %v208_v48  ;;  %v5658_v55 = vpack.c.bf16 %v551_v53, %v550_v52  ;;  %v553_v58 = vld [vmem:[#allocation7 + $0x118] sm:$0xff]  ;;  %v6753_v59 = vld [vmem:[#allocation2 + $0x10] sm:$0xff]  ;;  %v554_v62 = vld [vmem:[#allocation7 + $0x120] sm:$0xff] }
  0x5e   :  { %5633 = vmatpush3.bf16.msra.mxu0 %v5630_v3  ;;  %4624 = vmatprep.mubr.f32.mxu0 %v6687_v14  ;;  %v5662_v61 = vpack.c.bf16 %v553_v58, %v552_v57  ;;  %v555_v63 = vld [vmem:[#allocation7 + $0x128] sm:$0xff]  ;;  %v6757_v0 = vld [vmem:[#allocation2 + $0x30] sm:$0xff]  ;;  %v6759_v1 = vld [vmem:[#allocation2 + $0x40] sm:$0xff] }
  0x5f   :  { %5635 = vmatprep.subr.bf16.mxu0 %v5634_v16  ;;  %v5666_v2 = vpack.c.bf16 %v555_v63, %v554_v62  ;;  %v556_v3 = vld [vmem:[#allocation7 + $0x130] sm:$0xff]  ;;  %v557_v4 = vld [vmem:[#allocation7 + $0x138] sm:$0xff]  ;;  %v6765_v7 = vld [vmem:[#allocation2 + $0x60] sm:$0xff] }
  0x60   :  { %v102_v50 = vld [vmem:[#allocation2 + $0x82] sm:$0x1]  ;;  %v134_v5 = vld [vmem:[#allocation2 + $0x87] sm:$0x1]  ;;  %v6763_v6 = vld [vmem:[#allocation2 + $0x50] sm:$0xff]  ;;  %v5670_v11 = vpack.c.bf16 %v557_v4, %v556_v3 }
  0x61   :  { %4625 = vmatmul.mubr.f32.gmra.mrb[4].mxu0 %v6690_v15  ;;  %118 = vst [vmem:[#allocation2 + $0x80] sm:$0x1] %v102_v50  ;;  %150 = vst [vmem:[#allocation2 + $0x89] sm:$0x1] %v134_v5  ;;  %v558_v12 = vld [vmem:[#allocation7 + $0x140] sm:$0xff]  ;;  %v560_v20 = vld [vmem:[#allocation7 + $0x150] sm:$0xff] }
  0x62   :  { %5637 = vmatpush3.bf16.msra.mxu0 %v5634_v16  ;;  %4627 = vmatprep.mubr.f32.mxu0 %v6693_v18  ;;  %v559_v16 = vld [vmem:[#allocation7 + $0x148] sm:$0xff]  ;;  %v561_v25 = vld [vmem:[#allocation7 + $0x158] sm:$0xff]  ;;  %v6771_v26 = vld [vmem:[#allocation2 + $0xb0] sm:$0xff] }
  0x63   :  { %5639 = vmatprep.subr.bf16.mxu0 %v5638_v29  ;;  %v110_v54 = vld [vmem:[#allocation2 + $0x122] sm:$0x1]  ;;  %v5674_v17 = vpack.c.bf16 %v559_v16, %v558_v12  ;;  %v5678_v27 = vpack.c.bf16 %v561_v25, %v560_v20  ;;  %v563_v30 = vld [vmem:[#allocation7 + $0x168] sm:$0xff]  ;;  %v6775_v33 = vld [vmem:[#allocation2 + $0xd0] sm:$0xff] }
  0x64   :  { %126 = vst [vmem:[#allocation2 + $0x120] sm:$0x1] %v110_v54  ;;  %v6777_v34 = vld [vmem:[#allocation2 + $0xe0] sm:$0xff]  ;;  %v564_v36 = vld [vmem:[#allocation7 + $0x170] sm:$0xff]  ;;  %v745_v44 = vld [vmem:[#allocation7 + $0x188] sm:$0xff] }
  0x65   :  { %4628 = vmatmul.mubr.f32.gmra.mrb[6].mxu0 %v6695_v19  ;;  %v6781_v39 = vld [vmem:[#allocation2 + $0xf0] sm:$0xff]  ;;  %v6783_v40 = vld [vmem:[#allocation2 + $0x100] sm:$0xff]  ;;  %v747_v50 = vld [vmem:[#allocation7 + $0x198] sm:$0xff] }
  0x66   :  { %5641 = vmatpush3.bf16.msra.mxu0 %v5638_v29  ;;  %4630 = vmatprep.mubr.f32.mxu0 %v218_v37  ;;  %v562_v29 = vld [vmem:[#allocation7 + $0x160] sm:$0xff]  ;;  %v565_v37 = vld [vmem:[#allocation7 + $0x178] sm:$0xff]  ;;  %v746_v49 = vld [vmem:[#allocation7 + $0x190] sm:$0xff] }
  0x67   :  { %5643 = vmatprep.subr.bf16.mxu0 %v5642_v38  ;;  %v5682_v35 = vpack.c.bf16 %v563_v30, %v562_v29  ;;  %v744_v43 = vld [vmem:[#allocation7 + $0x180] sm:$0xff]  ;;  %v5694_v53 = vpack.c.bf16 %v747_v50, %v746_v49  ;;  %v6794_v57 = vld [vmem:[#allocation2 + $0x32] sm:$0xff] }
  0x68   :  { %v5690_v48 = vpack.c.bf16 %v745_v44, %v744_v43  ;;  %v6790_v52 = vld [vmem:[#allocation2 + $0x22] sm:$0xff]  ;;  %v750_v62 = vld [vmem:[#allocation7 + $0x1b0] sm:$0xff]  ;;  %v751_v63 = vld [vmem:[#allocation7 + $0x1b8] sm:$0xff] }
  0x69   :  { %4631 = vmatmul.mubr.f32.gmra.mrb[8].mxu0 %v6701_v22  ;;  %v748_v54 = vld [vmem:[#allocation7 + $0x1a0] sm:$0xff]  ;;  %v5702_v4 = vpack.c.bf16 %v751_v63, %v750_v62  ;;  %v6806_v12 = vld [vmem:[#allocation2 + $0x72] sm:$0xff] }
  0x6a   :  { %5645 = vmatpush3.bf16.msra.mxu0 %v5642_v38  ;;  %4633 = vmatprep.mubr.f32.mxu0 %v6699_v21  ;;  %v142_v38 = vld [vmem:[#allocation2 + $0x127] sm:$0x1]  ;;  %v754_v20 = vld [vmem:[#allocation7 + $0x1d0] sm:$0xff]  ;;  %v755_v25 = vld [vmem:[#allocation7 + $0x1d8] sm:$0xff] }
  0x6b   :  { %5647 = vmatprep.subr.bf16.mxu0 %v5646_v42  ;;  %158 = vst [vmem:[#allocation2 + $0x129] sm:$0x1] %v142_v38  ;;  %v6796_v58 = vld [vmem:[#allocation2 + $0x42] sm:$0xff]  ;;  %v5710_v30 = vpack.c.bf16 %v755_v25, %v754_v20  ;;  %v758_v43 = vld [vmem:[#allocation7 + $0x1f0] sm:$0xff]  ;;  %v759_v44 = vld [vmem:[#allocation7 + $0x1f8] sm:$0xff] }
  0x6c   :  { %v6802_v3 = vld [vmem:[#allocation2 + $0x62] sm:$0xff]  ;;  %v5718_v49 = vpack.c.bf16 %v759_v44, %v758_v43  ;;  %v941_v62 = vld [vmem:[#allocation7 + $0x218] sm:$0xff] }
  0x6d   :  { %4634 = vmatmul.mubr.f32.gmra.mrb[10].mxu0 %v6705_v23  ;;  %v752_v5 = vld [vmem:[#allocation7 + $0x1c0] sm:$0xff]  ;;  %v170_v20 = vld [vmem:[#allocation2 + $0x78] sm:$0x3] }
  0x6e   :  { %5649 = vmatpush3.bf16.msra.mxu0 %v5646_v42  ;;  %4636 = vmatprep.mubr.f32.mxu0 %v6708_v24  ;;  %v5686_v42 = vpack.c.bf16 %v565_v37, %v564_v36  ;;  %v541_v16 = vld [vmem:[#allocation2 + $0xa2] sm:$0xff]  ;;  %v6815_v37 = vld [vmem:[#allocation2 + $0xd2] sm:$0xff]  ;;  %175 = vst [vmem:[#allocation2 + $0x98] sm:$0x3] %v170_v20 }
  0x6f   :  { %5651 = vmatprep.subr.bf16.mxu0 %v5650_v47  ;;  %v6811_v29 = vld [vmem:[#allocation2 + $0xc2] sm:$0xff] }
  0x70   :  { %v757_v36 = vld [vmem:[#allocation7 + $0x1e8] sm:$0xff]  ;;  %v938_v50 = vld [vmem:[#allocation7 + $0x200] sm:$0xff] }
  0x71   :  { %4637 = vmatmul.mubr.f32.gmra.mrb[12].mxu0 %v6711_v28  ;;  %v6817_v38 = vld [vmem:[#allocation2 + $0xe2] sm:$0xff] }
  0x72   :  { %5653 = vmatpush3.bf16.msra.mxu0 %v5650_v47  ;;  %4639 = vmatprep.mubr.f32.mxu0 %v6714_v31  ;;  %v533_v47 = vld [vmem:[#allocation2 + $0x2] sm:$0xff] }
  0x73   :  { %5655 = vmatprep.subr.bf16.mxu0 %v5654_v51  ;;  %v946_v25 = vld [vmem:[#allocation7 + $0x240] sm:$0xff] }
  0x74   :  { %v950_v44 = vld [vmem:[#allocation7 + $0x260] sm:$0xff] }
  0x75   :  { %4640 = vmatmul.mubr.f32.gmra.mrb[14].mxu0 %v6717_v32  ;;  %v1136_v20 = vld [vmem:[#allocation7 + $0x2a0] sm:$0xff] }
  0x76   :  { %5657 = vmatpush3.bf16.msra.mxu0 %v5654_v51  ;;  %4674 = vmatprep.mubr.f32.mxu0 %v6720_v45  ;;  %v6788_v51 = vld [vmem:[#allocation2 + $0x12] sm:$0xff] }
  0x77   :  { %5659 = vmatprep.subr.bf16.mxu0 %v5658_v55 }
  0x79   :  { %4675 = vmatmul.mubr.f32.vlgmr.msra.gmra.mrb[0].mxu0 %v6753_v59 }
  0x7a   :  { %5661 = vmatpush3.bf16.msra.mxu0 %v5658_v55  ;;  %4677 = vmatprep.mubr.f32.mxu0 %v6720_v45  ;;  %v749_v55 = vld [vmem:[#allocation7 + $0x1a8] sm:$0xff] }
  0x7b   :  { %5663 = vmatprep.subr.bf16.mxu0 %v5662_v61 }
  0x7d   :  { %4678 = vmatmul.mubr.f32.gmra.mrb[2].mxu0 %v6757_v0 }
  0x7e   :  { %5665 = vmatpush3.bf16.msra.mxu0 %v5662_v61  ;;  %4680 = vmatprep.mubr.f32.mxu0 %v6759_v1  ;;  %v5698_v61 = vpack.c.bf16 %v749_v55, %v748_v54  ;;  %v6827_v54 = vld [vmem:[#allocation2 + $0x112] sm:$0xff] }
  0x7f   :  { %5667 = vmatprep.subr.bf16.mxu0 %v5666_v2 }
  0x81   :  { %4681 = vmatmul.mubr.f32.gmra.mrb[4].mxu0 %v6763_v6 }
  0x82   :  { %5669 = vmatpush3.bf16.msra.mxu0 %v5666_v2  ;;  %4683 = vmatprep.mubr.f32.mxu0 %v6765_v7  ;;  %v6800_v2 = vld [vmem:[#allocation2 + $0x52] sm:$0xff] }
  0x83   :  { %5671 = vmatprep.subr.bf16.mxu0 %v5670_v11 }
  0x85   :  { %4684 = vmatmul.mubr.f32.gmra.mrb[6].mxu0 %v6726_v60 }
  0x86   :  { %5673 = vmatpush3.bf16.msra.mxu0 %v5670_v11  ;;  %4686 = vmatprep.mubr.f32.mxu0 %v6723_v56  ;;  %v753_v11 = vld [vmem:[#allocation7 + $0x1c8] sm:$0xff] }
  0x87   :  { %5675 = vmatprep.subr.bf16.mxu0 %v5674_v17 }
  0x89   :  { %4687 = vmatmul.mubr.f32.gmra.mrb[8].mxu0 %v6771_v26 }
  0x8a   :  { %5677 = vmatpush3.bf16.msra.mxu0 %v5674_v17  ;;  %4689 = vmatprep.mubr.f32.mxu0 %v6723_v56  ;;  %v5706_v17 = vpack.c.bf16 %v753_v11, %v752_v5  ;;  %v943_v5 = vld [vmem:[#allocation7 + $0x228] sm:$0xff] }
  0x8b   :  { %5679 = vmatprep.subr.bf16.mxu0 %v5678_v27 }
  0x8d   :  { %4690 = vmatmul.mubr.f32.gmra.mrb[10].mxu0 %v6775_v33 }
  0x8e   :  { %5681 = vmatpush3.bf16.msra.mxu0 %v5678_v27  ;;  %4692 = vmatprep.mubr.f32.mxu0 %v6777_v34  ;;  %v6809_v27 = vld [vmem:[#allocation2 + $0xb2] sm:$0xff] }
  0x8f   :  { %5683 = vmatprep.subr.bf16.mxu0 %v5682_v35 }
  0x91   :  { %4693 = vmatmul.mubr.f32.gmra.mrb[12].mxu0 %v6781_v39 }
  0x92   :  { %5685 = vmatpush3.bf16.msra.mxu0 %v5682_v35  ;;  %4695 = vmatprep.mubr.f32.mxu0 %v6783_v40  ;;  %v756_v35 = vld [vmem:[#allocation7 + $0x1e0] sm:$0xff] }
  0x93   :  { %5687 = vmatprep.subr.bf16.mxu0 %v5686_v42 }
  0x95   :  { %4696 = vmatmul.mubr.f32.gmra.mrb[14].mxu0 %v6730_v8 }
  0x96   :  { %5689 = vmatpush3.bf16.msra.mxu0 %v5686_v42  ;;  %4730 = vmatprep.mubr.f32.mxu0 %v533_v47  ;;  %v5714_v42 = vpack.c.bf16 %v757_v36, %v756_v35  ;;  %v6821_v47 = vld [vmem:[#allocation2 + $0xf2] sm:$0xff] }
  0x97   :  { %5691 = vmatprep.subr.bf16.mxu0 %v5690_v48  ;;  %v948_v36 = vld [vmem:[#allocation7 + $0x250] sm:$0xff] }
  0x99   :  { %4731 = vmatmul.mubr.f32.vlgmr.msra.gmra.mrb[0].mxu0 %v6788_v51 }
  0x9a   :  { %5693 = vmatpush3.bf16.msra.mxu0 %v5690_v48  ;;  %4733 = vmatprep.mubr.f32.mxu0 %v6790_v52  ;;  %v6823_v48 = vld [vmem:[#allocation2 + $0x102] sm:$0xff] }
  0x9b   :  { %5695 = vmatprep.subr.bf16.mxu0 %v5694_v53 }
  0x9d   :  { %4734 = vmatmul.mubr.f32.gmra.mrb[2].mxu0 %v6794_v57 }
  0x9e   :  { %5697 = vmatpush3.bf16.msra.mxu0 %v5694_v53  ;;  %4736 = vmatprep.mubr.f32.mxu0 %v6796_v58  ;;  %v939_v53 = vld [vmem:[#allocation7 + $0x208] sm:$0xff] }
  0x9f   :  { %5699 = vmatprep.subr.bf16.mxu0 %v5698_v61  ;;  %v5722_v55 = vpack.c.bf16 %v939_v53, %v938_v50  ;;  %v952_v53 = vld [vmem:[#allocation7 + $0x270] sm:$0xff] }
  0xa1   :  { %4737 = vmatmul.mubr.f32.gmra.mrb[4].mxu0 %v6800_v2 }
  0xa2   :  { %5701 = vmatpush3.bf16.msra.mxu0 %v5698_v61  ;;  %4739 = vmatprep.mubr.f32.mxu0 %v6802_v3  ;;  %v940_v61 = vld [vmem:[#allocation7 + $0x210] sm:$0xff] }
  0xa3   :  { %5703 = vmatprep.subr.bf16.mxu0 %v5702_v4  ;;  %v5726_v63 = vpack.c.bf16 %v941_v62, %v940_v61  ;;  %v172_v61 = vld [vmem:[#allocation2 + $0x118] sm:$0x3]  ;;  %v1132_v62 = vld [vmem:[#allocation7 + $0x280] sm:$0xff] }
  0xa4   :  { %177 = vst [vmem:[#allocation2 + $0x138] sm:$0x3] %v172_v61  ;;  %v1331_v61 = vld [vmem:[#allocation7 + $0x328] sm:$0xff] }
  0xa5   :  { %4740 = vmatmul.mubr.f32.gmra.mrb[6].mxu0 %v6806_v12 }
  0xa6   :  { %5705 = vmatpush3.bf16.msra.mxu0 %v5702_v4  ;;  %4742 = vmatprep.mubr.f32.mxu0 %v541_v16  ;;  %v942_v4 = vld [vmem:[#allocation7 + $0x220] sm:$0xff]  ;;  %v944_v16 = vld [vmem:[#allocation7 + $0x230] sm:$0xff] }
  0xa7   :  { %5707 = vmatprep.subr.bf16.mxu0 %v5706_v17  ;;  %v5730_v11 = vpack.c.bf16 %v943_v5, %v942_v4  ;;  %v6847_v4 = vld [vmem:[#allocation2 + $0x120] sm:$0xff] }
  0xa9   :  { %4743 = vmatmul.mubr.f32.gmra.mrb[8].mxu0 %v6809_v27 }
  0xaa   :  { %5709 = vmatpush3.bf16.msra.mxu0 %v5706_v17  ;;  %4745 = vmatprep.mubr.f32.mxu0 %v6811_v29  ;;  %v945_v17 = vld [vmem:[#allocation7 + $0x238] sm:$0xff] }
  0xab   :  { %5711 = vmatprep.subr.bf16.mxu0 %v5710_v30 }
  0xad   :  { %4746 = vmatmul.mubr.f32.gmra.mrb[10].mxu0 %v6815_v37 }
  0xae   :  { %5713 = vmatpush3.bf16.msra.mxu0 %v5710_v30  ;;  %4748 = vmatprep.mubr.f32.mxu0 %v6817_v38  ;;  %v947_v30 = vld [vmem:[#allocation7 + $0x248] sm:$0xff] }
  0xaf   :  { %5715 = vmatprep.subr.bf16.mxu0 %v5714_v42  ;;  %v5738_v35 = vpack.c.bf16 %v947_v30, %v946_v25  ;;  %v1138_v30 = vld [vmem:[#allocation7 + $0x2b0] sm:$0xff] }
  0xb1   :  { %4749 = vmatmul.mubr.f32.gmra.mrb[12].mxu0 %v6821_v47 }
  0xb2   :  { %5717 = vmatpush3.bf16.msra.mxu0 %v5714_v42  ;;  %4751 = vmatprep.mubr.f32.mxu0 %v6823_v48  ;;  %v949_v42 = vld [vmem:[#allocation7 + $0x258] sm:$0xff] }
  0xb3   :  { %5719 = vmatprep.subr.bf16.mxu0 %v5718_v49  ;;  %v5742_v43 = vpack.c.bf16 %v949_v42, %v948_v36  ;;  %v1140_v36 = vld [vmem:[#allocation7 + $0x2c0] sm:$0xff]  ;;  %v1141_v42 = vld [vmem:[#allocation7 + $0x2c8] sm:$0xff] }
  0xb5   :  { %4752 = vmatmul.mubr.f32.gmra.mrb[14].mxu0 %v6827_v54 }
  0xb6   :  { %5721 = vmatpush3.bf16.msra.mxu0 %v5718_v49  ;;  %4786 = vmatprep.mubr.f32.mxu0 %v6753_v59  ;;  %v5734_v59 = vpack.c.bf16 %v945_v17, %v944_v16  ;;  %v951_v49 = vld [vmem:[#allocation7 + $0x268] sm:$0xff]  ;;  %v1135_v16 = vld [vmem:[#allocation7 + $0x298] sm:$0xff] }
  0xb7   :  { %5723 = vmatprep.subr.bf16.mxu0 %v5722_v55  ;;  %v5746_v50 = vpack.c.bf16 %v951_v49, %v950_v44  ;;  %v1145_v44 = vld [vmem:[#allocation7 + $0x2e8] sm:$0xff]  ;;  %v1147_v49 = vld [vmem:[#allocation7 + $0x2f8] sm:$0xff] }
  0xb9   :  { %4787 = vmatmul.mubr.f32.vlgmr.msra.gmra.mrb[0].mxu0 %v6720_v45  ;;  %v6837_v45 = vld [vmem:[#allocation2 + $0x80] sm:$0xff] }
  0xba   :  { %5725 = vmatpush3.bf16.msra.mxu0 %v5722_v55  ;;  %4789 = vmatprep.mubr.f32.mxu0 %v6757_v0  ;;  %v953_v55 = vld [vmem:[#allocation7 + $0x278] sm:$0xff] }
  0xbb   :  { %5727 = vmatprep.subr.bf16.mxu0 %v5726_v63 }
  0xbd   :  { %4790 = vmatmul.mubr.f32.gmra.mrb[2].mxu0 %v6759_v1 }
  0xbe   :  { %5729 = vmatpush3.bf16.msra.mxu0 %v5726_v63  ;;  %4792 = vmatprep.mubr.f32.mxu0 %v6763_v6  ;;  %v1133_v63 = vld [vmem:[#allocation7 + $0x288] sm:$0xff] }
  0xbf   :  { %5731 = vmatprep.subr.bf16.mxu0 %v5730_v11  ;;  %v5754_v5 = vpack.c.bf16 %v1133_v63, %v1132_v62  ;;  %v1334_v62 = vld [vmem:[#allocation7 + $0x340] sm:$0xff]  ;;  %v1335_v63 = vld [vmem:[#allocation7 + $0x348] sm:$0xff] }
  0xc1   :  { %4793 = vmatmul.mubr.f32.gmra.mrb[4].mxu0 %v6765_v7 }
  0xc2   :  { %5733 = vmatpush3.bf16.msra.mxu0 %v5730_v11  ;;  %4795 = vmatprep.mubr.f32.mxu0 %v6726_v60  ;;  %v1134_v11 = vld [vmem:[#allocation7 + $0x290] sm:$0xff] }
  0xc3   :  { %5735 = vmatprep.subr.bf16.mxu0 %v5734_v59  ;;  %v5758_v17 = vpack.c.bf16 %v1135_v16, %v1134_v11  ;;  %v5802_v11 = vpack.c.bf16 %v1335_v63, %v1334_v62  ;;  %v1336_v16 = vld [vmem:[#allocation7 + $0x350] sm:$0xff]  ;;  %v1718_v62 = vld [vmem:[#allocation7 + $0x420] sm:$0xff]  ;;  %v1719_v63 = vld [vmem:[#allocation7 + $0x428] sm:$0xff] }
  0xc5   :  { %4796 = vmatmul.mubr.f32.gmra.mrb[6].mxu0 %v6837_v45 }
  0xc6   :  { %5737 = vmatpush3.bf16.msra.mxu0 %v5734_v59  ;;  %4798 = vmatprep.mubr.f32.mxu0 %v6771_v26  ;;  %v5750_v26 = vpack.c.bf16 %v953_v55, %v952_v53  ;;  %v1137_v59 = vld [vmem:[#allocation7 + $0x2a8] sm:$0xff]  ;;  %v1329_v55 = vld [vmem:[#allocation7 + $0x318] sm:$0xff] }
  0xc7   :  { %5739 = vmatprep.subr.bf16.mxu0 %v5738_v35  ;;  %v5762_v25 = vpack.c.bf16 %v1137_v59, %v1136_v20  ;;  %v1327_v53 = vld [vmem:[#allocation7 + $0x308] sm:$0xff]  ;;  %v1338_v59 = vld [vmem:[#allocation7 + $0x360] sm:$0xff] }
  0xc9   :  { %4799 = vmatmul.mubr.f32.gmra.mrb[8].mxu0 %v6723_v56 }
  0xca   :  { %5741 = vmatpush3.bf16.msra.mxu0 %v5738_v35  ;;  %4801 = vmatprep.mubr.f32.mxu0 %v6775_v33  ;;  %v1139_v35 = vld [vmem:[#allocation7 + $0x2b8] sm:$0xff] }
  0xcb   :  { %5743 = vmatprep.subr.bf16.mxu0 %v5742_v43 }
  0xcd   :  { %4802 = vmatmul.mubr.f32.gmra.mrb[10].mxu0 %v6777_v34 }
  0xce   :  { %5745 = vmatpush3.bf16.msra.mxu0 %v5742_v43  ;;  %4804 = vmatprep.mubr.f32.mxu0 %v6781_v39  ;;  %v1143_v43 = vld [vmem:[#allocation7 + $0x2d8] sm:$0xff] }
  0xcf   :  { %5747 = vmatprep.subr.bf16.mxu0 %v5746_v50 }
  0xd1   :  { %4805 = vmatmul.mubr.f32.gmra.mrb[12].mxu0 %v6783_v40 }
  0xd2   :  { %5749 = vmatpush3.bf16.msra.mxu0 %v5746_v50  ;;  %4807 = vmatprep.mubr.f32.mxu0 %v6730_v8  ;;  %v1326_v50 = vld [vmem:[#allocation7 + $0x300] sm:$0xff] }
  0xd3   :  { %5751 = vmatprep.subr.bf16.mxu0 %v5750_v26 }
  0xd5   :  { %4808 = vmatmul.mubr.f32.gmra.mrb[14].mxu0 %v6847_v4 }
  0xd6   :  { %5753 = vmatpush3.bf16.msra.mxu0 %v5750_v26  ;;  %4842 = vmatprep.mubr.f32.mxu0 %v6680_v10  ;;  %v5766_v10 = vpack.c.bf16 %v1139_v35, %v1138_v30  ;;  %v1333_v26 = vld [vmem:[#allocation7 + $0x338] sm:$0xff]  ;;  %v1340_v35 = vld [vmem:[#allocation7 + $0x370] sm:$0xff] }
  0xd7   :  { %5755 = vmatprep.subr.bf16.mxu0 %v5754_v5 }
  0xd9   :  { %4843 = vmatmul.mubr.f32.vlgmr.msra.gmra.mrb[0].mxu0 %v6678_v9  ;;  %v5770_v9 = vpack.c.bf16 %v1141_v42, %v1140_v36  ;;  %v1520_v36 = vld [vmem:[#allocation7 + $0x380] sm:$0xff]  ;;  %v1521_v42 = vld [vmem:[#allocation7 + $0x388] sm:$0xff] }
  0xda   :  { %5757 = vmatpush3.bf16.msra.mxu0 %v5754_v5  ;;  %4845 = vmatprep.mubr.f32.mxu0 %v6684_v13  ;;  %v1142_v13 = vld [vmem:[#allocation7 + $0x2d0] sm:$0xff]  ;;  %v6873_v5 = vld [vmem:[#allocation2 + $0x82] sm:$0xff] }
  0xdb   :  { %5759 = vmatprep.subr.bf16.mxu0 %v5758_v17 }
  0xdd   :  { %4846 = vmatmul.mubr.f32.gmra.mrb[2].mxu0 %v6687_v14  ;;  %v5774_v14 = vpack.c.bf16 %v1143_v43, %v1142_v13  ;;  %v1309_v13 = vld [vmem:[#allocation2 + $0x20] sm:$0xff]  ;;  %v5818_v43 = vpack.c.bf16 %v1521_v42, %v1520_v36  ;;  %v1724_v36 = vld [vmem:[#allocation7 + $0x450] sm:$0xff]  ;;  %v1725_v42 = vld [vmem:[#allocation7 + $0x458] sm:$0xff] }
  0xde   :  { %5761 = vmatpush3.bf16.msra.mxu0 %v5758_v17  ;;  %4848 = vmatprep.mubr.f32.mxu0 %v6690_v15  ;;  %v1144_v15 = vld [vmem:[#allocation7 + $0x2e0] sm:$0xff]  ;;  %v1337_v17 = vld [vmem:[#allocation7 + $0x358] sm:$0xff] }
  0xdf   :  { %5763 = vmatprep.subr.bf16.mxu0 %v5762_v25  ;;  %v5806_v20 = vpack.c.bf16 %v1337_v17, %v1336_v16  ;;  %v5858_v16 = vpack.c.bf16 %v1719_v63, %v1718_v62  ;;  %v1720_v17 = vld [vmem:[#allocation7 + $0x430] sm:$0xff] }
  0xe1   :  { %4849 = vmatmul.mubr.f32.gmra.mrb[4].mxu0 %v6693_v18  ;;  %v5778_v18 = vpack.c.bf16 %v1145_v44, %v1144_v15  ;;  %v1523_v15 = vld [vmem:[#allocation7 + $0x398] sm:$0xff] }
  0xe2   :  { %5765 = vmatpush3.bf16.msra.mxu0 %v5762_v25  ;;  %4851 = vmatprep.mubr.f32.mxu0 %v6695_v19  ;;  %v1146_v19 = vld [vmem:[#allocation7 + $0x2f0] sm:$0xff]  ;;  %v1339_v25 = vld [vmem:[#allocation7 + $0x368] sm:$0xff] }
  0xe3   :  { %5767 = vmatprep.subr.bf16.mxu0 %v5766_v10  ;;  %v5810_v30 = vpack.c.bf16 %v1339_v25, %v1338_v59  ;;  %v1722_v25 = vld [vmem:[#allocation7 + $0x440] sm:$0xff] }
  0xe5   :  { %4852 = vmatmul.mubr.f32.gmra.mrb[6].mxu0 %v6739_v41 }
  0xe6   :  { %5769 = vmatpush3.bf16.msra.mxu0 %v5766_v10  ;;  %4854 = vmatprep.mubr.f32.mxu0 %v6701_v22  ;;  %v5782_v22 = vpack.c.bf16 %v1147_v49, %v1146_v19  ;;  %v1341_v10 = vld [vmem:[#allocation7 + $0x378] sm:$0xff]  ;;  %v1525_v19 = vld [vmem:[#allocation7 + $0x3a8] sm:$0xff] }
  0xe7   :  { %5771 = vmatprep.subr.bf16.mxu0 %v5770_v9 }
  0xe9   :  { %4855 = vmatmul.mubr.f32.gmra.mrb[8].mxu0 %v6699_v21  ;;  %v5786_v21 = vpack.c.bf16 %v1327_v53, %v1326_v50  ;;  %v1527_v50 = vld [vmem:[#allocation7 + $0x3b8] sm:$0xff] }
  0xea   :  { %5773 = vmatpush3.bf16.msra.mxu0 %v5770_v9  ;;  %4857 = vmatprep.mubr.f32.mxu0 %v6705_v23  ;;  %v1328_v23 = vld [vmem:[#allocation7 + $0x310] sm:$0xff]  ;;  %v6883_v9 = vld [vmem:[#allocation2 + $0x122] sm:$0xff] }
  0xeb   :  { %5775 = vmatprep.subr.bf16.mxu0 %v5774_v14 }
  0xed   :  { %4858 = vmatmul.mubr.f32.gmra.mrb[10].mxu0 %v6708_v24  ;;  %v5790_v24 = vpack.c.bf16 %v1329_v55, %v1328_v23  ;;  %v1529_v23 = vld [vmem:[#allocation7 + $0x3c8] sm:$0xff]  ;;  %v1531_v55 = vld [vmem:[#allocation7 + $0x3d8] sm:$0xff] }
  0xee   :  { %5777 = vmatpush3.bf16.msra.mxu0 %v5774_v14  ;;  %4860 = vmatprep.mubr.f32.mxu0 %v6711_v28  ;;  %v1330_v28 = vld [vmem:[#allocation7 + $0x320] sm:$0xff]  ;;  %v1522_v14 = vld [vmem:[#allocation7 + $0x390] sm:$0xff] }
  0xef   :  { %5779 = vmatprep.subr.bf16.mxu0 %v5778_v18  ;;  %v5822_v44 = vpack.c.bf16 %v1523_v15, %v1522_v14  ;;  %v5870_v14 = vpack.c.bf16 %v1725_v42, %v1724_v36  ;;  %v1726_v15 = vld [vmem:[#allocation7 + $0x460] sm:$0xff] }
  0xf1   :  { %4861 = vmatmul.mubr.f32.gmra.mrb[12].mxu0 %v6714_v31  ;;  %v5794_v31 = vpack.c.bf16 %v1331_v61, %v1330_v28  ;;  %v1534_v28 = vld [vmem:[#allocation7 + $0x3f0] sm:$0xff]  ;;  %v1535_v61 = vld [vmem:[#allocation7 + $0x3f8] sm:$0xff] }
  0xf2   :  { %5781 = vmatpush3.bf16.msra.mxu0 %v5778_v18  ;;  %4863 = vmatprep.mubr.f32.mxu0 %v6717_v32  ;;  %v1332_v32 = vld [vmem:[#allocation7 + $0x330] sm:$0xff]  ;;  %v1524_v18 = vld [vmem:[#allocation7 + $0x3a0] sm:$0xff] }
  0xf3   :  { %5783 = vmatprep.subr.bf16.mxu0 %v5782_v22  ;;  %v5826_v49 = vpack.c.bf16 %v1525_v19, %v1524_v18  ;;  %v1514_v18 = vld [vmem:[#allocation2 + $0xf1] sm:$0xff] }
  0xf5   :  { %4864 = vmatmul.mubr.f32.gmra.mrb[14].mxu0 %v6743_v46 }
  0xf6   :  { %5785 = vmatpush3.bf16.msra.mxu0 %v5782_v22  ;;  %4898 = vmatprep.mubr.f32.mxu0 %v6788_v51  ;;  %v5798_v51 = vpack.c.bf16 %v1333_v26, %v1332_v32  ;;  %v1526_v22 = vld [vmem:[#allocation7 + $0x3b0] sm:$0xff]  ;;  %v1717_v26 = vld [vmem:[#allocation7 + $0x418] sm:$0xff] }
  0xf7   :  { %5787 = vmatprep.subr.bf16.mxu0 %v5786_v21  ;;  %v5830_v53 = vpack.c.bf16 %v1527_v50, %v1526_v22  ;;  %v1716_v32 = vld [vmem:[#allocation7 + $0x410] sm:$0xff]  ;;  %v1729_v22 = vld [vmem:[#allocation7 + $0x478] sm:$0xff] }
  0xf8   :  { %v1516_v50 = vld [vmem:[#allocation2 + $0x111] sm:$0xff] }
  0xf9   :  { %4899 = vmatmul.mubr.f32.vlgmr.msra.gmra.mrb[0].mxu0 %v6790_v52 }
  0xfa   :  { %5789 = vmatpush3.bf16.msra.mxu0 %v5786_v21  ;;  %4901 = vmatprep.mubr.f32.mxu0 %v6794_v57  ;;  %v1528_v21 = vld [vmem:[#allocation7 + $0x3c0] sm:$0xff] }
  0xfb   :  { %5791 = vmatprep.subr.bf16.mxu0 %v5790_v24 }
  0xfd   :  { %4902 = vmatmul.mubr.f32.gmra.mrb[2].mxu0 %v6796_v58 }
  0xfe   :  { %5793 = vmatpush3.bf16.msra.mxu0 %v5790_v24  ;;  %4904 = vmatprep.mubr.f32.mxu0 %v6800_v2  ;;  %v1533_v24 = vld [vmem:[#allocation7 + $0x3e8] sm:$0xff] }
  0xff   :  { %5795 = vmatprep.subr.bf16.mxu0 %v5794_v31 }
 0x101   :  { %4905 = vmatmul.mubr.f32.gmra.mrb[4].mxu0 %v6802_v3 }
 0x102   :  { %5797 = vmatpush3.bf16.msra.mxu0 %v5794_v31  ;;  %4907 = vmatprep.mubr.f32.mxu0 %v6806_v12  ;;  %v1715_v31 = vld [vmem:[#allocation7 + $0x408] sm:$0xff] }
 0x103   :  { %5799 = vmatprep.subr.bf16.mxu0 %v5798_v51 }
 0x105   :  { %4908 = vmatmul.mubr.f32.gmra.mrb[6].mxu0 %v6873_v5 }
 0x106   :  { %5801 = vmatpush3.bf16.msra.mxu0 %v5798_v51  ;;  %4910 = vmatprep.mubr.f32.mxu0 %v6809_v27  ;;  %v5814_v27 = vpack.c.bf16 %v1341_v10, %v1340_v35  ;;  %v5854_v51 = vpack.c.bf16 %v1717_v26, %v1716_v32  ;;  %v1510_v35 = vld [vmem:[#allocation2 + $0x91] sm:$0xff]  ;;  %v1511_v10 = vld [vmem:[#allocation2 + $0xc1] sm:$0xff] }
 0x107   :  { %5803 = vmatprep.subr.bf16.mxu0 %v5802_v11 }
 0x109   :  { %4911 = vmatmul.mubr.f32.gmra.mrb[8].mxu0 %v6811_v29 }
 0x10a   :  { %5805 = vmatpush3.bf16.msra.mxu0 %v5802_v11  ;;  %4913 = vmatprep.mubr.f32.mxu0 %v6815_v37  ;;  %v1506_v11 = vld [vmem:[#allocation2 + $0x51] sm:$0xff] }
 0x10b   :  { %5807 = vmatprep.subr.bf16.mxu0 %v5806_v20 }
 0x10d   :  { %4914 = vmatmul.mubr.f32.gmra.mrb[10].mxu0 %v6817_v38 }
 0x10e   :  { %5809 = vmatpush3.bf16.msra.mxu0 %v5806_v20  ;;  %4916 = vmatprep.mubr.f32.mxu0 %v6821_v47  ;;  %v1721_v20 = vld [vmem:[#allocation7 + $0x438] sm:$0xff] }
 0x10f   :  { %5811 = vmatprep.subr.bf16.mxu0 %v5810_v30  ;;  %v5862_v59 = vpack.c.bf16 %v1721_v20, %v1720_v17 }
 0x111   :  { %4917 = vmatmul.mubr.f32.gmra.mrb[12].mxu0 %v6823_v48 }
 0x112   :  { %5813 = vmatpush3.bf16.msra.mxu0 %v5810_v30  ;;  %4919 = vmatprep.mubr.f32.mxu0 %v6827_v54  ;;  %v1723_v30 = vld [vmem:[#allocation7 + $0x448] sm:$0xff] }
 0x113   :  { %5815 = vmatprep.subr.bf16.mxu0 %v5814_v27 }
 0x115   :  { %4920 = vmatmul.mubr.f32.gmra.mrb[14].mxu0 %v6883_v9 }
 0x116   :  { %5817 = vmatpush3.bf16.msra.mxu0 %v5814_v27  ;;  %4954 = vmatprep.mubr.f32.mxu0 %v1309_v13  ;;  %v5866_v27 = vpack.c.bf16 %v1723_v30, %v1722_v25  ;;  %v1512_v13 = vld [vmem:[#allocation2 + $0xd1] sm:$0xff] }
 0x117   :  { %5819 = vmatprep.subr.bf16.mxu0 %v5818_v43 }
 0x119   :  { %4955 = vmatmul.mubr.f32.vlgmr.msra.gmra.mrb[0].mxu0 %v6757_v0  ;;  %v5834_v0 = vpack.c.bf16 %v1529_v23, %v1528_v21  ;;  %v1518_v21 = vld [vmem:[#allocation2 + $0x131] sm:$0xff] }
 0x11a   :  { %5821 = vmatpush3.bf16.msra.mxu0 %v5818_v43  ;;  %4957 = vmatprep.mubr.f32.mxu0 %v6759_v1  ;;  %v1530_v1 = vld [vmem:[#allocation7 + $0x3d0] sm:$0xff]  ;;  %v1513_v43 = vld [vmem:[#allocation2 + $0xe1] sm:$0xff] }
 0x11b   :  { %5823 = vmatprep.subr.bf16.mxu0 %v5822_v44  ;;  %v1704_v23 = vld [vmem:[#allocation2 + $0x92] sm:$0xff] }
 0x11d   :  { %4958 = vmatmul.mubr.f32.gmra.mrb[2].mxu0 %v6763_v6  ;;  %v5838_v6 = vpack.c.bf16 %v1531_v55, %v1530_v1  ;;  %v2169_v1 = vld [vmem:[#allocation9 + $0xd0] sm:$0xff]  ;;  %v2170_v55 = vld [vmem:[#allocation9 + $0xd8] sm:$0xff] }
 0x11e   :  { %5825 = vmatpush3.bf16.msra.mxu0 %v5822_v44  ;;  %4960 = vmatprep.mubr.f32.mxu0 %v6765_v7  ;;  %v1532_v7 = vld [vmem:[#allocation7 + $0x3e0] sm:$0xff]  ;;  %v1727_v44 = vld [vmem:[#allocation7 + $0x468] sm:$0xff] }
 0x11f   :  { %5827 = vmatprep.subr.bf16.mxu0 %v5826_v49  ;;  %v5874_v19 = vpack.c.bf16 %v1727_v44, %v1726_v15 }
 0x121   :  { %4961 = vmatmul.mubr.f32.gmra.mrb[4].mxu0 %v6726_v60 }
 0x122   :  { %5829 = vmatpush3.bf16.msra.mxu0 %v5826_v49  ;;  %4963 = vmatprep.mubr.f32.mxu0 %v6837_v45  ;;  %v5842_v45 = vpack.c.bf16 %v1533_v24, %v1532_v7  ;;  %v1728_v49 = vld [vmem:[#allocation7 + $0x470] sm:$0xff]  ;;  %v2171_v7 = vld [vmem:[#allocation9 + $0xe0] sm:$0xff]  ;;  %v2172_v24 = vld [vmem:[#allocation9 + $0xe8] sm:$0xff] }
 0x123   :  { %5831 = vmatprep.subr.bf16.mxu0 %v5830_v53 }
 0x125   :  { %4964 = vmatmul.mubr.f32.gmra.mrb[6].mxu0 %v6726_v60  ;;  %v1714_v60 = vld [vmem:[#allocation7 + $0x400] sm:$0xff] }
 0x126   :  { %5833 = vmatpush3.bf16.msra.mxu0 %v5830_v53  ;;  %4966 = vmatprep.mubr.f32.mxu0 %v6723_v56  ;;  %v5846_v56 = vpack.c.bf16 %v1535_v61, %v1534_v28  ;;  %v5878_v53 = vpack.c.bf16 %v1729_v22, %v1728_v49  ;;  %v2173_v28 = vld [vmem:[#allocation9 + $0xf0] sm:$0xff]  ;;  %v2174_v61 = vld [vmem:[#allocation9 + $0xf8] sm:$0xff] }
 0x127   :  { %5835 = vmatprep.subr.bf16.mxu0 %v5834_v0 }
 0x129   :  { %4967 = vmatmul.mubr.f32.gmra.mrb[8].mxu0 %v6775_v33  ;;  %v1503_v33 = vld [vmem:[#allocation2 + $0x21] sm:$0xff] }
 0x12a   :  { %5837 = vmatpush3.bf16.msra.mxu0 %v5834_v0  ;;  %4969 = vmatprep.mubr.f32.mxu0 %v6777_v34  ;;  %v5850_v34 = vpack.c.bf16 %v1715_v31, %v1714_v60  ;;  %v2126_v60 = vld [vmem:[#allocation9] sm:$0xff]  ;;  %v2127_v31 = vld [vmem:[#allocation9 + $0x8] sm:$0xff] }
 0x12b   :  { %5839 = vmatprep.subr.bf16.mxu0 %v5838_v6 }
 0x12d   :  { %4970 = vmatmul.mubr.f32.gmra.mrb[10].mxu0 %v6781_v39  ;;  %v1504_v39 = vld [vmem:[#allocation2 + $0x31] sm:$0xff] }
 0x12e   :  { %5841 = vmatpush3.bf16.msra.mxu0 %v5838_v6  ;;  %4972 = vmatprep.mubr.f32.mxu0 %v6783_v40  ;;  %v1505_v40 = vld [vmem:[#allocation2 + $0x41] sm:$0xff]  ;;  %v5902_v6 = vpack.c.bf16 %v2170_v55, %v2169_v1 }
 0x12f   :  { %5843 = vmatprep.subr.bf16.mxu0 %v5842_v45 }
 0x131   :  { %4973 = vmatmul.mubr.f32.gmra.mrb[12].mxu0 %v6730_v8 }
 0x132   :  { %5845 = vmatpush3.bf16.msra.mxu0 %v5842_v45  ;;  %4975 = vmatprep.mubr.f32.mxu0 %v6847_v4  ;;  %v1507_v4 = vld [vmem:[#allocation2 + $0x61] sm:$0xff]  ;;  %v5906_v45 = vpack.c.bf16 %v2172_v24, %v2171_v7 }
 0x133   :  { %5847 = vmatprep.subr.bf16.mxu0 %v5846_v56 }
 0x135   :  { %4976 = vmatmul.mubr.f32.gmra.mrb[14].mxu0 %v6730_v8  ;;  %v1508_v8 = vld [vmem:[#allocation2 + $0x71] sm:$0xff] }
 0x136   :  { %5849 = vmatpush3.bf16.msra.mxu0 %v5846_v56  ;;  %5010 = vmatprep.mubr.f32.mxu0 %v1503_v33  ;;  %v5910_v56 = vpack.c.bf16 %v2174_v61, %v2173_v28  ;;  %v6917_v33 = vpack.c.bf16 %v2127_v31, %v2126_v60 }
 0x137   :  { %5851 = vmatprep.subr.bf16.mxu0 %v5850_v34 }
 0x139   :  { %5011 = vmatmul.mubr.f32.vlgmr.msra.gmra.mrb[0].mxu0 %v1504_v39 }
 0x13a   :  { %5853 = vmatpush3.bf16.msra.mxu0 %v5850_v34  ;;  %5013 = vmatprep.mubr.f32.mxu0 %v1505_v40  ;;  %v6923_v34 = vld [vmem:[%s7343_s2] ss:$0 sm:$0xff] }
 0x13b   :  { %5855 = vmatprep.subr.bf16.mxu0 %v5854_v51 }
 0x13d   :  { %5014 = vmatmul.mubr.f32.gmra.mrb[2].mxu0 %v1506_v11 }
 0x13e   :  { %5857 = vmatpush3.bf16.msra.mxu0 %v5854_v51  ;;  %5016 = vmatprep.mubr.f32.mxu0 %v1507_v4 }
 0x13f   :  { %5859 = vmatprep.subr.bf16.mxu0 %v5858_v16 }
 0x141   :  { %5017 = vmatmul.mubr.f32.gmra.mrb[4].mxu0 %v1508_v8 }
 0x142   :  { %5861 = vmatpush3.bf16.msra.mxu0 %v5858_v16  ;;  %5019 = vmatprep.mubr.f32.mxu0 %v6739_v41  ;;  %v1515_v41 = vld [vmem:[#allocation2 + $0x101] sm:$0xff] }
 0x143   :  { %5863 = vmatprep.subr.bf16.mxu0 %v5862_v59 }
 0x145   :  { %5020 = vmatmul.mubr.f32.gmra.mrb[6].mxu0 %v1510_v35 }
 0x146   :  { %5865 = vmatpush3.bf16.msra.mxu0 %v5862_v59  ;;  %5022 = vmatprep.mubr.f32.mxu0 %v1511_v10 }
 0x147   :  { %5867 = vmatprep.subr.bf16.mxu0 %v5866_v27 }
 0x149   :  { %5023 = vmatmul.mubr.f32.gmra.mrb[8].mxu0 %v1512_v13 }
 0x14a   :  { %5869 = vmatpush3.bf16.msra.mxu0 %v5866_v27  ;;  %5025 = vmatprep.mubr.f32.mxu0 %v1513_v43 }
 0x14b   :  { %5871 = vmatprep.subr.bf16.mxu0 %v5870_v14 }
 0x14d   :  { %5026 = vmatmul.mubr.f32.gmra.mrb[10].mxu0 %v1514_v18 }
 0x14e   :  { %5873 = vmatpush3.bf16.msra.mxu0 %v5870_v14  ;;  %5028 = vmatprep.mubr.f32.mxu0 %v1515_v41 }
 0x14f   :  { %5875 = vmatprep.subr.bf16.mxu0 %v5874_v19 }
 0x151   :  { %5029 = vmatmul.mubr.f32.gmra.mrb[12].mxu0 %v1516_v50 }
 0x152   :  { %5877 = vmatpush3.bf16.msra.mxu0 %v5874_v19  ;;  %5031 = vmatprep.mubr.f32.mxu0 %v6743_v46  ;;  %v1712_v46 = vld [vmem:[#allocation2 + $0x132] sm:$0xff] }
 0x153   :  { %5879 = vmatprep.subr.bf16.mxu0 %v5878_v53 }
 0x155   :  { %5032 = vmatmul.mubr.f32.gmra.mrb[14].mxu0 %v1518_v21 }
 0x156   :  { %5881 = vmatpush3.bf16.msra.mxu0 %v5878_v53  ;;  %5066 = vmatprep.mubr.f32.mxu0 %v6790_v52  ;;  %v2159_v52 = vld [vmem:[#allocation9 + $0x80] sm:$0xff] }
 0x159   :  { %5067 = vmatmul.mubr.f32.vlgmr.msra.gmra.mrb[0].mxu0 %v6794_v57  ;;  %v2160_v57 = vld [vmem:[#allocation9 + $0x88] sm:$0xff] }
 0x15a   :  { %5069 = vmatprep.mubr.f32.mxu0 %v6796_v58  ;;  %v5882_v58 = vpack.c.bf16 %v2160_v57, %v2159_v52 }
 0x15c   :  { %5883 = vmatprep.subr.bf16.mxu1 %v5882_v58 }
 0x15d   :  { %5070 = vmatmul.mubr.f32.gmra.mrb[2].mxu0 %v6800_v2  ;;  %5885 = vmatpush3.bf16.msra.mxu1 %v5882_v58  ;;  %v2161_v2 = vld [vmem:[#allocation9 + $0x90] sm:$0xff] }
 0x15e   :  { %5072 = vmatprep.mubr.f32.mxu0 %v6802_v3  ;;  %v2162_v3 = vld [vmem:[#allocation9 + $0x98] sm:$0xff] }
 0x161   :  { %5073 = vmatmul.mubr.f32.gmra.mrb[4].mxu0 %v6806_v12  ;;  %v5886_v12 = vpack.c.bf16 %v2162_v3, %v2161_v2 }
 0x162   :  { %5075 = vmatprep.mubr.f32.mxu0 %v6873_v5  ;;  %v2167_v5 = vld [vmem:[#allocation9 + $0xc0] sm:$0xff] }
 0x163   :  { %5887 = vmatprep.subr.bf16.mxu1 %v5886_v12 }
 0x164   :  { %5889 = vmatpush3.bf16.msra.mxu1 %v5886_v12 }
 0x165   :  { %5076 = vmatmul.mubr.f32.gmra.mrb[6].mxu0 %v1704_v23 }
 0x166   :  { %5078 = vmatprep.mubr.f32.mxu0 %v6811_v29  ;;  %v2163_v29 = vld [vmem:[#allocation9 + $0xa0] sm:$0xff] }
 0x169   :  { %5079 = vmatmul.mubr.f32.gmra.mrb[8].mxu0 %v6815_v37  ;;  %v2164_v37 = vld [vmem:[#allocation9 + $0xa8] sm:$0xff] }
 0x16a   :  { %5081 = vmatprep.mubr.f32.mxu0 %v6817_v38  ;;  %v5890_v38 = vpack.c.bf16 %v2164_v37, %v2163_v29 }
 0x16c   :  { %5891 = vmatprep.subr.bf16.mxu1 %v5890_v38 }
 0x16d   :  { %5082 = vmatmul.mubr.f32.gmra.mrb[10].mxu0 %v6821_v47  ;;  %5893 = vmatpush3.bf16.msra.mxu1 %v5890_v38  ;;  %v2165_v47 = vld [vmem:[#allocation9 + $0xb0] sm:$0xff] }
 0x16e   :  { %5084 = vmatprep.mubr.f32.mxu0 %v6823_v48  ;;  %v2166_v48 = vld [vmem:[#allocation9 + $0xb8] sm:$0xff] }
 0x171   :  { %5085 = vmatmul.mubr.f32.gmra.mrb[12].mxu0 %v6827_v54  ;;  %v5894_v54 = vpack.c.bf16 %v2166_v48, %v2165_v47 }
 0x172   :  { %5087 = vmatprep.mubr.f32.mxu0 %v6883_v9  ;;  %v2168_v9 = vld [vmem:[#allocation9 + $0xc8] sm:$0xff] }
 0x173   :  { %5895 = vmatprep.subr.bf16.mxu1 %v5894_v54  ;;  %v5898_v0 = vpack.c.bf16 %v2168_v9, %v2167_v5 }
 0x174   :  { %5897 = vmatpush3.bf16.msra.mxu1 %v5894_v54 }
 0x175   :  { %5088 = vmatmul.mubr.f32.gmra.mrb[14].mxu0 %v1712_v46  ;;  %5899 = vmatprep.subr.bf16.mxu1 %v5898_v0 }
 0x178   :  { %5901 = vmatpush3.bf16.msra.mxu1 %v5898_v0 }
 0x179   :  { %5903 = vmatprep.subr.bf16.mxu1 %v5902_v6 }
 0x17c   :  { %5905 = vmatpush3.bf16.msra.mxu1 %v5902_v6 }
 0x17d   :  { %5907 = vmatprep.subr.bf16.mxu1 %v5906_v45 }
 0x180   :  { %5909 = vmatpush3.bf16.msra.mxu1 %v5906_v45 }
 0x181   :  { %5911 = vmatprep.subr.bf16.mxu1 %v5910_v56 }
 0x184   :  { %5913 = vmatpush3.bf16.msra.mxu1 %v5910_v56 }
 0x185   :  { %5915 = vmatprep.subr.bf16.mxu1 %v6917_v33 }
 0x22c   :  { %v5068_v32 = vpop.f32.mrb[0].mxu0 }
 0x22d   :  { %v1899_v26 = vadd.f32 %v5068_v32, %v6923_v34  ;;  %v1796_v39 = vpop.f32.mrb[1].mxu0 }
 0x22e   :  { %v1898_v40 = vadd.f32 %v6923_v34, %v1796_v39 }
 0x22f   :  { %v1931_v51 = vmin.f32 %v1899_v26, 0.0  ;;  %vm1915_vm0 = vcmp.gt.f32.partialorder %v1899_v26, 0.0 }
 0x230   :  { %v1930_v62 = vmin.f32 %v1898_v40, 0.0  ;;  %v5071_v63 = vpop.f32.mrb[2].mxu0  ;;  %vm1914_vm1 = vcmp.gt.f32.partialorder %v1898_v40, 0.0 }
 0x231   :  { %v1948_v11 = vmul.f32 1.442695, %v1931_v51  ;;  %v1901_v4 = vadd.f32 %v5071_v63, %v6923_v34  ;;  %v1806_v16 = vpop.f32.mrb[3].mxu0 }
 0x232   :  { %v1946_v17 = vmul.f32 1.442695, %v1930_v62  ;;  %v6929_v20 = vadd.f32 %v6923_v34, %v1806_v16 }
 0x233   :  { %6432 = vpow2.f32 %v1948_v11  ;;  %v1933_v8 = vmin.f32 %v1901_v4, 0.0  ;;  %vm1917_vm2 = vcmp.gt.f32.partialorder %v1901_v4, 0.0 }
 0x234   :  { %6434 = vpow2.f32 %v1946_v17  ;;  %v1932_v59 = vmin.f32 %v6929_v20, 0.0  ;;  %v5074_v25 = vpop.f32.mrb[4].mxu0  ;;  %vm1916_vm3 = vcmp.gt.f32.partialorder %v6929_v20, 0.0 }
 0x235   :  { %v1952_v30 = vmul.f32 1.442695, %v1933_v8  ;;  %v6933_v35 = vadd.f32 %v5074_v25, %v6923_v34  ;;  %v1816_v10 = vpop.f32.mrb[5].mxu0 }
 0x236   :  { %v1950_v27 = vmul.f32 1.442695, %v1932_v59  ;;  %v6936_v36 = vadd.f32 %v6923_v34, %v1816_v10 }
 0x237   :  { %6436 = vpow2.f32 %v1952_v30  ;;  %v1935_v42 = vmin.f32 %v6933_v35, 0.0  ;;  %vm1919_vm4 = vcmp.gt.f32.partialorder %v6933_v35, 0.0 }
 0x238   :  { %6438 = vpow2.f32 %v1950_v27  ;;  %v1934_v13 = vmin.f32 %v6936_v36, 0.0  ;;  %v5077_v43 = vpop.f32.mrb[6].mxu0  ;;  %vm1918_vm5 = vcmp.gt.f32.partialorder %v6936_v36, 0.0 }
 0x239   :  { %v1956_v14 = vmul.f32 1.442695, %v1935_v42  ;;  %v6941_v15 = vadd.f32 %v5077_v43, %v6923_v34  ;;  %v1826_v44 = vpop.f32.mrb[7].mxu0 }
 0x23a   :  { %v1954_v18 = vmul.f32 1.442695, %v1934_v13  ;;  %v6944_v41 = vadd.f32 %v6923_v34, %v1826_v44 }
 0x23b   :  { %6440 = vpow2.f32 %v1956_v14  ;;  %v1937_v19 = vmin.f32 %v6941_v15, 0.0  ;;  %vm1921_vm6 = vcmp.gt.f32.partialorder %v6941_v15, 0.0 }
 0x23c   :  { %6442 = vpow2.f32 %v1954_v18  ;;  %v1936_v49 = vmin.f32 %v6944_v41, 0.0  ;;  %v5080_v22 = vpop.f32.mrb[8].mxu0  ;;  %vm1920_vm7 = vcmp.gt.f32.partialorder %v6944_v41, 0.0 }
 0x23d   :  { %v6433_v50 = vpop.eup %6432  ;;  %v1960_v53 = vmul.f32 1.442695, %v1937_v19  ;;  %v6949_v21 = vadd.f32 %v5080_v22, %v6923_v34  ;;  %v1836_v23 = vpop.f32.mrb[9].mxu0 }
 0x23e   :  { %v6435_v46 = vpop.eup %6434  ;;  %v3978_v52 = vadd.f32 -1.0, %v6433_v50  ;;  %v1958_v57 = vmul.f32 1.442695, %v1936_v49  ;;  %v6952_v58 = vadd.f32 %v6923_v34, %v1836_v23 }
 0x23f   :  { %v3977_v2 = vadd.f32 -1.0, %v6435_v46  ;;  %6444 = vpow2.f32 %v1960_v53  ;;  %v1939_v3 = vmin.f32 %v6949_v21, 0.0  ;;  %vm1923_vm8 = vcmp.gt.f32.partialorder %v6949_v21, 0.0 }
 0x240   :  { %v6955_v12 = vsel %vm1915_vm0, %v1899_v26, %v3978_v52  ;;  %6446 = vpow2.f32 %v1958_v57  ;;  %v1938_v29 = vmin.f32 %v6952_v58, 0.0  ;;  %v5083_v37 = vpop.f32.mrb[10].mxu0  ;;  %vm1922_vm9 = vcmp.gt.f32.partialorder %v6952_v58, 0.0 }
 0x241   :  { %v6437_v38 = vpop.eup %6436  ;;  %2012 = vst [vmem:[#allocation3 + $0x21] sm:$0xff] %v6955_v12  ;;  %v6959_v47 = vsel %vm1914_vm1, %v1898_v40, %v3977_v2  ;;  %v1964_v48 = vmul.f32 1.442695, %v1939_v3  ;;  %v6962_v54 = vadd.f32 %v5083_v37, %v6923_v34  ;;  %v1846_v5 = vpop.f32.mrb[11].mxu0 }
 0x242   :  { %v6439_v9 = vpop.eup %6438  ;;  %2011 = vst [vmem:[#allocation3 + $0x11] sm:$0xff] %v6959_v47  ;;  %v3980_v0 = vadd.f32 -1.0, %v6437_v38  ;;  %v1962_v1 = vmul.f32 1.442695, %v1938_v29  ;;  %v6966_v55 = vadd.f32 %v6923_v34, %v1846_v5 }
 0x243   :  { %v3979_v6 = vadd.f32 -1.0, %v6439_v9  ;;  %6448 = vpow2.f32 %v1964_v48  ;;  %v1941_v7 = vmin.f32 %v6962_v54, 0.0  ;;  %vm1925_vm10 = vcmp.gt.f32.partialorder %v6962_v54, 0.0 }
 0x244   :  { %v6969_v24 = vsel %vm1917_vm2, %v1901_v4, %v3980_v0  ;;  %6450 = vpow2.f32 %v1962_v1  ;;  %v1940_v45 = vmin.f32 %v6966_v55, 0.0  ;;  %v5086_v28 = vpop.f32.mrb[12].mxu0  ;;  %vm1924_vm11 = vcmp.gt.f32.partialorder %v6966_v55, 0.0 }
 0x245   :  { %v6441_v61 = vpop.eup %6440  ;;  %2014 = vst [vmem:[#allocation3 + $0x41] sm:$0xff] %v6969_v24  ;;  %v6975_v56 = vsel %vm1916_vm3, %v6929_v20, %v3979_v6  ;;  %v1968_v60 = vmul.f32 1.442695, %v1941_v7  ;;  %v6978_v31 = vadd.f32 %v5086_v28, %v6923_v34  ;;  %v1856_v32 = vpop.f32.mrb[13].mxu0 }
 0x246   :  { %v6443_v26 = vpop.eup %6442  ;;  %2013 = vst [vmem:[#allocation3 + $0x31] sm:$0xff] %v6975_v56  ;;  %v3982_v39 = vadd.f32 -1.0, %v6441_v61  ;;  %v1966_v40 = vmul.f32 1.442695, %v1940_v45  ;;  %v6982_v51 = vadd.f32 %v6923_v34, %v1856_v32  ;;  %v2128_v61 = vld [vmem:[#allocation9 + $0x10] sm:$0xff] }
 0x247   :  { %v3981_v62 = vadd.f32 -1.0, %v6443_v26  ;;  %6452 = vpow2.f32 %v1968_v60  ;;  %v1943_v63 = vmin.f32 %v6978_v31, 0.0  ;;  %v2129_v60 = vld [vmem:[#allocation9 + $0x18] sm:$0xff]  ;;  %vm1927_vm12 = vcmp.gt.f32.partialorder %v6978_v31, 0.0 }
 0x248   :  { %v2028_v11 = vld [vmem:[#allocation3 + $0x22] sm:$0x1]  ;;  %v2060_v4 = vld [vmem:[#allocation3 + $0x27] sm:$0x1]  ;;  %v6987_v16 = vsel %vm1919_vm4, %v6933_v35, %v3982_v39  ;;  %6454 = vpow2.f32 %v1966_v40  ;;  %v1942_v17 = vmin.f32 %v6982_v51, 0.0  ;;  %v5089_v42 = vpop.f32.mrb[14].mxu0 }
 0x249   :  { %v6445_v20 = vpop.eup %6444  ;;  %2044 = vst [vmem:[#allocation3 + $0x20] sm:$0x1] %v2028_v11  ;;  %2076 = vst [vmem:[#allocation3 + $0x29] sm:$0x1] %v2060_v4  ;;  %v2027_v8 = vld [vmem:[#allocation3 + $0x12] sm:$0x1]  ;;  %v6993_v25 = vsel %vm1918_vm5, %v6936_v36, %v3981_v62  ;;  %v6998_v43 = vadd.f32 %v5089_v42, %v6923_v34 }
 0x24a   :  { %v2059_v59 = vld [vmem:[#allocation3 + $0x17] sm:$0x1]  ;;  %2016 = vst [vmem:[#allocation3 + $0x61] sm:$0xff] %v6987_v16  ;;  %v1972_v30 = vmul.f32 1.442695, %v1943_v63  ;;  %v6447_v10 = vpop.eup %6446  ;;  %2015 = vst [vmem:[#allocation3 + $0x51] sm:$0xff] %v6993_v25 }
 0x24b   :  { %2043 = vst [vmem:[#allocation3 + $0x10] sm:$0x1] %v2027_v8  ;;  %2075 = vst [vmem:[#allocation3 + $0x19] sm:$0x1] %v2059_v59  ;;  %v3984_v35 = vadd.f32 -1.0, %v6445_v20  ;;  %v3983_v13 = vadd.f32 -1.0, %v6447_v10 }
 0x24c   :  { %v1970_v27 = vmul.f32 1.442695, %v1942_v17  ;;  %6456 = vpow2.f32 %v1972_v30  ;;  %v1866_v14 = vpop.f32.mrb[15].mxu0  ;;  %v2030_v18 = vld [vmem:[#allocation3 + $0x42] sm:$0x1]  ;;  %v1945_v50 = vmin.f32 %v6998_v43, 0.0  ;;  %v5918_v17 = vpack.c.bf16 %v2129_v60, %v2128_v61 }
 0x24d   :  { %v7001_v36 = vsel %vm1921_vm6, %v6941_v15, %v3984_v35  ;;  %v7005_v44 = vadd.f32 %v6923_v34, %v1866_v14  ;;  %v2062_v19 = vld [vmem:[#allocation3 + $0x47] sm:$0x1]  ;;  %v6449_v49 = vpop.eup %6448  ;;  %v7009_v22 = vsel %vm1920_vm7, %v6944_v41, %v3983_v13  ;;  %v2029_v53 = vld [vmem:[#allocation3 + $0x32] sm:$0x1]  ;;  %2046 = vst [vmem:[#allocation3 + $0x40] sm:$0x1] %v2030_v18 }
 0x24e   :  { %6458 = vpow2.f32 %v1970_v27  ;;  %2018 = vst [vmem:[#allocation3 + $0x81] sm:$0xff] %v7001_v36  ;;  %v2061_v15 = vld [vmem:[#allocation3 + $0x37] sm:$0x1]  ;;  %2078 = vst [vmem:[#allocation3 + $0x49] sm:$0x1] %v2062_v19  ;;  %v6451_v23 = vpop.eup %6450  ;;  %v3986_v46 = vadd.f32 -1.0, %v6449_v49 }
 0x24f   :  { %2017 = vst [vmem:[#allocation3 + $0x71] sm:$0xff] %v7009_v22  ;;  %v1944_v34 = vmin.f32 %v7005_v44, 0.0  ;;  %2045 = vst [vmem:[#allocation3 + $0x30] sm:$0x1] %v2029_v53  ;;  %v3985_v52 = vadd.f32 -1.0, %v6451_v23  ;;  %vm1926_vm13 = vcmp.gt.f32.partialorder %v6982_v51, 0.0 }
 0x250   :  { %2077 = vst [vmem:[#allocation3 + $0x39] sm:$0x1] %v2061_v15  ;;  %v1976_v57 = vmul.f32 1.442695, %v1945_v50  ;;  %v7016_v41 = vsel %vm1923_vm8, %v6949_v21, %v3986_v46  ;;  %v7019_v3 = vld [vmem:[#allocation3 + $0x20] sm:$0xff]  ;;  %v2131_v59 = vld [vmem:[#allocation9 + $0x28] sm:$0xff] }
 0x251   :  { %v1974_v2 = vmul.f32 1.442695, %v1944_v34  ;;  %v2093_v29 = vld [vmem:[#allocation3 + $0x28] sm:$0x3]  ;;  %v6453_v37 = vpop.eup %6452  ;;  %2020 = vst [vmem:[#allocation3 + $0xc1] sm:$0xff] %v7016_v41  ;;  %v7023_v38 = vsel %vm1922_vm9, %v6952_v58, %v3985_v52  ;;  %2096 = vst [vmem:[#allocation3] sm:$0xff] %v7019_v3 }
 0x252   :  { %6460 = vpow2.f32 %v1976_v57  ;;  %2097 = vst [vmem:[#allocation3 + $0x8] sm:$0x3] %v2093_v29  ;;  %v2031_v48 = vld [vmem:[#allocation3 + $0x52] sm:$0x1]  ;;  %v2032_v5 = vld [vmem:[#allocation3 + $0x62] sm:$0x1]  ;;  %v6455_v21 = vpop.eup %6454 }
 0x253   :  { %2019 = vst [vmem:[#allocation3 + $0xb1] sm:$0xff] %v7023_v38  ;;  %v3988_v9 = vadd.f32 -1.0, %v6453_v37  ;;  %6462 = vpow2.f32 %v1974_v2  ;;  %2047 = vst [vmem:[#allocation3 + $0x50] sm:$0x1] %v2031_v48  ;;  %v2063_v0 = vld [vmem:[#allocation3 + $0x57] sm:$0x1] }
 0x254   :  { %2048 = vst [vmem:[#allocation3 + $0x60] sm:$0x1] %v2032_v5  ;;  %v2064_v1 = vld [vmem:[#allocation3 + $0x67] sm:$0x1]  ;;  %v3987_v6 = vadd.f32 -1.0, %v6455_v21  ;;  %v2132_v10 = vld [vmem:[#allocation9 + $0x30] sm:$0xff] }
 0x255   :  { %2079 = vst [vmem:[#allocation3 + $0x59] sm:$0x1] %v2063_v0  ;;  %2080 = vst [vmem:[#allocation3 + $0x69] sm:$0x1] %v2064_v1  ;;  %v7029_v58 = vsel %vm1925_vm10, %v6962_v54, %v3988_v9  ;;  %v2034_v7 = vld [vmem:[#allocation3 + $0x82] sm:$0x1] }
 0x256   :  { %v6457_v45 = vpop.eup %6456  ;;  %2022 = vst [vmem:[#allocation3 + $0xe1] sm:$0xff] %v7029_v58  ;;  %v7034_v28 = vsel %vm1924_vm11, %v6966_v55, %v3987_v6  ;;  %v2033_v32 = vld [vmem:[#allocation3 + $0x72] sm:$0x1]  ;;  %2050 = vst [vmem:[#allocation3 + $0x80] sm:$0x1] %v2034_v7  ;;  %v2130_v8 = vld [vmem:[#allocation9 + $0x20] sm:$0xff] }
 0x257   :  { %2021 = vst [vmem:[#allocation3 + $0xd1] sm:$0xff] %v7034_v28  ;;  %v3990_v39 = vadd.f32 -1.0, %v6457_v45  ;;  %2049 = vst [vmem:[#allocation3 + $0x70] sm:$0x1] %v2033_v32  ;;  %v2065_v54 = vld [vmem:[#allocation3 + $0x77] sm:$0x1]  ;;  %v5922_v13 = vpack.c.bf16 %v2131_v59, %v2130_v8 }
 0x258   :  { %v6459_v26 = vpop.eup %6458  ;;  %2081 = vst [vmem:[#allocation3 + $0x79] sm:$0x1] %v2065_v54  ;;  %v2066_v62 = vld [vmem:[#allocation3 + $0x87] sm:$0x1]  ;;  %v2036_v63 = vld [vmem:[#allocation3 + $0xc2] sm:$0x1] }
 0x259   :  { %v3989_v40 = vadd.f32 -1.0, %v6459_v26  ;;  %v2068_v11 = vld [vmem:[#allocation3 + $0xc7] sm:$0x1]  ;;  %v7039_v55 = vsel %vm1927_vm12, %v6978_v31, %v3990_v39  ;;  %2082 = vst [vmem:[#allocation3 + $0x89] sm:$0x1] %v2066_v62  ;;  %v2133_v35 = vld [vmem:[#allocation9 + $0x38] sm:$0xff] }
 0x25a   :  { %v2142_v4 = vld [vmem:[#allocation3 + $0x1] sm:$0xff]  ;;  %2052 = vst [vmem:[#allocation3 + $0xc0] sm:$0x1] %v2036_v63  ;;  %2084 = vst [vmem:[#allocation3 + $0xc9] sm:$0x1] %v2068_v11  ;;  %vm1929_vm14 = vcmp.gt.f32.partialorder %v6998_v43, 0.0 }
 0x25b   :  { %2024 = vst [vmem:[#allocation3 + $0x101] sm:$0xff] %v7039_v55  ;;  %v7044_v20 = vsel %vm1926_vm13, %v6982_v51, %v3989_v40  ;;  %5122 = vmatprep.mubr.f32.mxu1 %v2142_v4  ;;  %v2035_v30 = vld [vmem:[#allocation3 + $0xb2] sm:$0x1]  ;;  %v2067_v27 = vld [vmem:[#allocation3 + $0xb7] sm:$0x1]  ;;  %vm1928_vm15 = vcmp.gt.f32.partialorder %v7005_v44, 0.0 }
 0x25c   :  { %2023 = vst [vmem:[#allocation3 + $0xf1] sm:$0xff] %v7044_v20  ;;  %5123 = vmatmul.mubr.f32.vlgmr.msra.gmra.mrb[0].mxu1 %v6959_v47  ;;  %2051 = vst [vmem:[#allocation3 + $0xb0] sm:$0x1] %v2035_v30  ;;  %v6461_v31 = vpop.eup %6460  ;;  %v2134_v34 = vld [vmem:[#allocation9 + $0x40] sm:$0xff]  ;;  %v2135_v52 = vld [vmem:[#allocation9 + $0x48] sm:$0xff] }
 0x25d   :  { %5125 = vmatprep.mubr.f32.mxu1 %v6955_v12  ;;  %5917 = vmatpush3.bf16.msra.mxu1 %v6917_v33  ;;  %v6463_v42 = vpop.eup %6462  ;;  %v3992_v51 = vadd.f32 -1.0, %v6461_v31  ;;  %v2038_v14 = vld [vmem:[#allocation3 + $0xe2] sm:$0x1]  ;;  %2083 = vst [vmem:[#allocation3 + $0xb9] sm:$0x1] %v2067_v27  ;;  %v5930_v2 = vpack.c.bf16 %v2135_v52, %v2134_v34  ;;  %v2136_v29 = vld [vmem:[#allocation9 + $0x50] sm:$0xff] }
 0x25e   :  { %5919 = vmatprep.subr.bf16.mxu1 %v5918_v17  ;;  %v2070_v18 = vld [vmem:[#allocation3 + $0xe7] sm:$0x1]  ;;  %v3991_v19 = vadd.f32 -1.0, %v6463_v42  ;;  %v7051_v47 = vld [vmem:[#allocation3 + $0x70] sm:$0xff]  ;;  %2054 = vst [vmem:[#allocation3 + $0xe0] sm:$0x1] %v2038_v14 }
 0x25f   :  { %v2037_v49 = vld [vmem:[#allocation3 + $0xd2] sm:$0x1]  ;;  %v2069_v12 = vld [vmem:[#allocation3 + $0xd7] sm:$0x1]  ;;  %2086 = vst [vmem:[#allocation3 + $0xe9] sm:$0x1] %v2070_v18  ;;  %v7054_v33 = vsel %vm1929_vm14, %v6998_v43, %v3992_v51  ;;  %v5926_v43 = vpack.c.bf16 %v2133_v35, %v2132_v10 }
 0x260   :  { %5126 = vmatmul.mubr.f32.gmra.mrb[2].mxu1 %v6975_v56  ;;  %2053 = vst [vmem:[#allocation3 + $0xd0] sm:$0x1] %v2037_v49  ;;  %2085 = vst [vmem:[#allocation3 + $0xd9] sm:$0x1] %v2069_v12  ;;  %v7061_v50 = vsel %vm1928_vm15, %v7005_v44, %v3991_v19  ;;  %v2102_v53 = vld [vmem:[#allocation3 + $0x78] sm:$0x3] }
 0x261   :  { %2106 = vst [vmem:[#allocation3 + $0x90] sm:$0xff] %v7051_v47  ;;  %2026 = vst [vmem:[#allocation3 + $0x121] sm:$0xff] %v7054_v33  ;;  %5128 = vmatprep.mubr.f32.mxu1 %v6969_v24  ;;  %5921 = vmatpush3.bf16.msra.mxu1 %v5918_v17  ;;  %v7065_v15 = vld [vmem:[#allocation3 + $0xc0] sm:$0xff]  ;;  %v2095_v23 = vld [vmem:[#allocation3 + $0xc8] sm:$0x3] }
 0x262   :  { %2025 = vst [vmem:[#allocation3 + $0x111] sm:$0xff] %v7061_v50  ;;  %5923 = vmatprep.subr.bf16.mxu1 %v5922_v13  ;;  %v2040_v46 = vld [vmem:[#allocation3 + $0x102] sm:$0x1]  ;;  %2107 = vst [vmem:[#allocation3 + $0x98] sm:$0x3] %v2102_v53  ;;  %v2137_v37 = vld [vmem:[#allocation9 + $0x58] sm:$0xff] }
 0x263   :  { %2098 = vst [vmem:[#allocation3 + $0xa0] sm:$0xff] %v7065_v15  ;;  %2099 = vst [vmem:[#allocation3 + $0xa8] sm:$0x3] %v2095_v23  ;;  %v2039_v44 = vld [vmem:[#allocation3 + $0xf2] sm:$0x1]  ;;  %v5934_v1 = vpack.c.bf16 %v2137_v37, %v2136_v29  ;;  %v2138_v6 = vld [vmem:[#allocation9 + $0x60] sm:$0xff] }
 0x264   :  { %2056 = vst [vmem:[#allocation3 + $0x100] sm:$0x1] %v2040_v46  ;;  %5129 = vmatmul.mubr.f32.gmra.mrb[4].mxu1 %v6993_v25  ;;  %2055 = vst [vmem:[#allocation3 + $0xf0] sm:$0x1] %v2039_v44  ;;  %v2071_v24 = vld [vmem:[#allocation3 + $0xf7] sm:$0x1] }
 0x265   :  { %v2072_v57 = vld [vmem:[#allocation3 + $0x107] sm:$0x1]  ;;  %5131 = vmatprep.mubr.f32.mxu1 %v6987_v16  ;;  %5925 = vmatpush3.bf16.msra.mxu1 %v5922_v13  ;;  %2087 = vst [vmem:[#allocation3 + $0xf9] sm:$0x1] %v2071_v24  ;;  %v2139_v7 = vld [vmem:[#allocation9 + $0x68] sm:$0xff]  ;;  %v2140_v61 = vld [vmem:[#allocation9 + $0x70] sm:$0xff] }
 0x266   :  { %2088 = vst [vmem:[#allocation3 + $0x109] sm:$0x1] %v2072_v57  ;;  %5927 = vmatprep.subr.bf16.mxu1 %v5926_v43  ;;  %v5938_v45 = vpack.c.bf16 %v2139_v7, %v2138_v6  ;;  %v2141_v60 = vld [vmem:[#allocation9 + $0x78] sm:$0xff]  ;;  %v2482_v54 = vld [vmem:[#allocation9 + $0x100] sm:$0xff]  ;;  %v2483_v40 = vld [vmem:[#allocation9 + $0x108] sm:$0xff] }
 0x267   :  { %v5942_v26 = vpack.c.bf16 %v2141_v60, %v2140_v61  ;;  %v5946_v62 = vpack.c.bf16 %v2483_v40, %v2482_v54  ;;  %v2484_v63 = vld [vmem:[#allocation9 + $0x110] sm:$0xff]  ;;  %v2485_v11 = vld [vmem:[#allocation9 + $0x118] sm:$0xff]  ;;  %v2486_v8 = vld [vmem:[#allocation9 + $0x120] sm:$0xff] }
 0x268   :  { %5132 = vmatmul.mubr.f32.gmra.mrb[6].mxu1 %v7009_v22  ;;  %v2042_v48 = vld [vmem:[#allocation3 + $0x122] sm:$0x1]  ;;  %v2074_v9 = vld [vmem:[#allocation3 + $0x127] sm:$0x1]  ;;  %v5950_v4 = vpack.c.bf16 %v2485_v11, %v2484_v63  ;;  %v7082_v17 = vld [vmem:[#allocation3 + $0x10] sm:$0xff] }
 0x269   :  { %5929 = vmatpush3.bf16.msra.mxu1 %v5926_v43  ;;  %v2041_v5 = vld [vmem:[#allocation3 + $0x112] sm:$0x1]  ;;  %v2073_v21 = vld [vmem:[#allocation3 + $0x117] sm:$0x1]  ;;  %2058 = vst [vmem:[#allocation3 + $0x120] sm:$0x1] %v2042_v48 }
 0x26a   :  { %v2150_v0 = vld [vmem:[#allocation3 + $0xa1] sm:$0xff]  ;;  %5931 = vmatprep.subr.bf16.mxu1 %v5930_v2  ;;  %2057 = vst [vmem:[#allocation3 + $0x110] sm:$0x1] %v2041_v5  ;;  %2089 = vst [vmem:[#allocation3 + $0x119] sm:$0x1] %v2073_v21  ;;  %v7086_v31 = vld [vmem:[#allocation3 + $0x30] sm:$0xff] }
 0x26b   :  { %2090 = vst [vmem:[#allocation3 + $0x129] sm:$0x1] %v2074_v9  ;;  %5134 = vmatprep.mubr.f32.mxu1 %v2150_v0  ;;  %v2487_v59 = vld [vmem:[#allocation9 + $0x128] sm:$0xff]  ;;  %v2488_v10 = vld [vmem:[#allocation9 + $0x130] sm:$0xff]  ;;  %v2489_v35 = vld [vmem:[#allocation9 + $0x138] sm:$0xff] }
 0x26c   :  { %5135 = vmatmul.mubr.f32.gmra.mrb[8].mxu1 %v7023_v38  ;;  %v5954_v30 = vpack.c.bf16 %v2487_v59, %v2486_v8  ;;  %v7089_v27 = vld [vmem:[#allocation3 + $0x40] sm:$0xff]  ;;  %v5958_v42 = vpack.c.bf16 %v2489_v35, %v2488_v10  ;;  %v7092_v51 = vld [vmem:[#allocation3 + $0x50] sm:$0xff]  ;;  %v2491_v14 = vld [vmem:[#allocation9 + $0x148] sm:$0xff] }
 0x26d   :  { %5137 = vmatprep.mubr.f32.mxu1 %v7016_v41  ;;  %5933 = vmatpush3.bf16.msra.mxu1 %v5930_v2  ;;  %v2490_v13 = vld [vmem:[#allocation9 + $0x140] sm:$0xff]  ;;  %v2492_v49 = vld [vmem:[#allocation9 + $0x150] sm:$0xff]  ;;  %v2493_v12 = vld [vmem:[#allocation9 + $0x158] sm:$0xff] }
 0x26e   :  { %5935 = vmatprep.subr.bf16.mxu1 %v5934_v1  ;;  %v7095_v18 = vld [vmem:[#allocation3 + $0x60] sm:$0xff]  ;;  %v5962_v19 = vpack.c.bf16 %v2491_v14, %v2490_v13  ;;  %v5966_v53 = vpack.c.bf16 %v2493_v12, %v2492_v49  ;;  %v7100_v43 = vld [vmem:[#allocation3 + $0xb0] sm:$0xff]  ;;  %v2495_v46 = vld [vmem:[#allocation9 + $0x168] sm:$0xff] }
 0x26f   :  { %v2494_v23 = vld [vmem:[#allocation9 + $0x160] sm:$0xff]  ;;  %v7104_v52 = vld [vmem:[#allocation3 + $0xd0] sm:$0xff]  ;;  %v2497_v24 = vld [vmem:[#allocation9 + $0x178] sm:$0xff] }
 0x270   :  { %5138 = vmatmul.mubr.f32.gmra.mrb[10].mxu1 %v7034_v28  ;;  %v5970_v34 = vpack.c.bf16 %v2495_v46, %v2494_v23  ;;  %v2496_v44 = vld [vmem:[#allocation9 + $0x170] sm:$0xff]  ;;  %v7107_v57 = vld [vmem:[#allocation3 + $0xe0] sm:$0xff]  ;;  %v2677_v48 = vld [vmem:[#allocation9 + $0x188] sm:$0xff] }
 0x271   :  { %5140 = vmatprep.mubr.f32.mxu1 %v7029_v58  ;;  %5937 = vmatpush3.bf16.msra.mxu1 %v5934_v1  ;;  %v7075_v32 = vld [vmem:[#allocation3 + $0x110] sm:$0xff]  ;;  %v2104_v39 = vld [vmem:[#allocation3 + $0x118] sm:$0x3]  ;;  %v5974_v2 = vpack.c.bf16 %v2497_v24, %v2496_v44  ;;  %v2676_v37 = vld [vmem:[#allocation9 + $0x180] sm:$0xff] }
 0x272   :  { %5939 = vmatprep.subr.bf16.mxu1 %v5938_v45  ;;  %2108 = vst [vmem:[#allocation3 + $0x130] sm:$0xff] %v7075_v32  ;;  %2109 = vst [vmem:[#allocation3 + $0x138] sm:$0x3] %v2104_v39  ;;  %v7110_v29 = vld [vmem:[#allocation3 + $0xf0] sm:$0xff]  ;;  %v7113_v5 = vld [vmem:[#allocation3 + $0x100] sm:$0xff]  ;;  %v5978_v21 = vpack.c.bf16 %v2677_v48, %v2676_v37 }
 0x273   :  { %v2678_v9 = vld [vmem:[#allocation9 + $0x190] sm:$0xff]  ;;  %v2679_v0 = vld [vmem:[#allocation9 + $0x198] sm:$0xff]  ;;  %v2465_v1 = vld [vmem:[#allocation3 + $0x2] sm:$0xff] }
 0x274   :  { %5141 = vmatmul.mubr.f32.gmra.mrb[12].mxu1 %v7044_v20  ;;  %v5982_v6 = vpack.c.bf16 %v2679_v0, %v2678_v9  ;;  %v7117_v7 = vld [vmem:[#allocation3 + $0x12] sm:$0xff]  ;;  %v2681_v61 = vld [vmem:[#allocation9 + $0x1a8] sm:$0xff]  ;;  %v2688_v49 = vld [vmem:[#allocation9 + $0x1e0] sm:$0xff] }
 0x275   :  { %5143 = vmatprep.mubr.f32.mxu1 %v7039_v55  ;;  %5941 = vmatpush3.bf16.msra.mxu1 %v5938_v45  ;;  %v2680_v45 = vld [vmem:[#allocation9 + $0x1a0] sm:$0xff]  ;;  %v7123_v39 = vld [vmem:[#allocation3 + $0x32] sm:$0xff]  ;;  %v2685_v8 = vld [vmem:[#allocation9 + $0x1c8] sm:$0xff] }
 0x276   :  { %5943 = vmatprep.subr.bf16.mxu1 %v5942_v26  ;;  %v7120_v60 = vld [vmem:[#allocation3 + $0x22] sm:$0xff]  ;;  %v2682_v54 = vld [vmem:[#allocation9 + $0x1b0] sm:$0xff]  ;;  %v2683_v40 = vld [vmem:[#allocation9 + $0x1b8] sm:$0xff] }
 0x277   :  { %v5990_v63 = vpack.c.bf16 %v2683_v40, %v2682_v54  ;;  %v7129_v11 = vld [vmem:[#allocation3 + $0x52] sm:$0xff]  ;;  %v7132_v59 = vld [vmem:[#allocation3 + $0x62] sm:$0xff] }
 0x278   :  { %5144 = vmatmul.mubr.f32.gmra.mrb[14].mxu1 %v7061_v50  ;;  %v7135_v10 = vld [vmem:[#allocation3 + $0x72] sm:$0xff]  ;;  %v2473_v13 = vld [vmem:[#allocation3 + $0xa2] sm:$0xff] }
 0x279   :  { %5945 = vmatpush3.bf16.msra.mxu1 %v5942_v26  ;;  %5178 = vmatprep.mubr.f32.mxu1 %v7019_v3  ;;  %v5986_v26 = vpack.c.bf16 %v2681_v61, %v2680_v45  ;;  %v2686_v35 = vld [vmem:[#allocation9 + $0x1d0] sm:$0xff]  ;;  %v2689_v12 = vld [vmem:[#allocation9 + $0x1e8] sm:$0xff]  ;;  %v2691_v44 = vld [vmem:[#allocation9 + $0x1f8] sm:$0xff] }
 0x27a   :  { %5947 = vmatprep.subr.bf16.mxu1 %v5946_v62  ;;  %v6002_v23 = vpack.c.bf16 %v2689_v12, %v2688_v49  ;;  %v7144_v46 = vld [vmem:[#allocation3 + $0xd2] sm:$0xff]  ;;  %v7147_v24 = vld [vmem:[#allocation3 + $0xe2] sm:$0xff] }
 0x27b   :  { %v7150_v37 = vld [vmem:[#allocation3 + $0xf2] sm:$0xff]  ;;  %v2870_v48 = vld [vmem:[#allocation9 + $0x200] sm:$0xff]  ;;  %v2875_v54 = vld [vmem:[#allocation9 + $0x228] sm:$0xff] }
 0x27c   :  { %5179 = vmatmul.mubr.f32.vlgmr.msra.gmra.mrb[0].mxu1 %v7082_v17  ;;  %v7153_v9 = vld [vmem:[#allocation3 + $0x102] sm:$0xff]  ;;  %v2873_v45 = vld [vmem:[#allocation9 + $0x218] sm:$0xff] }
 0x27d   :  { %5181 = vmatprep.mubr.f32.mxu1 %v7019_v3  ;;  %5949 = vmatpush3.bf16.msra.mxu1 %v5946_v62  ;;  %v7126_v62 = vld [vmem:[#allocation3 + $0x42] sm:$0xff] }
 0x27e   :  { %5951 = vmatprep.subr.bf16.mxu1 %v5950_v4  ;;  %v2882_v12 = vld [vmem:[#allocation9 + $0x260] sm:$0xff] }
 0x280   :  { %5182 = vmatmul.mubr.f32.gmra.mrb[2].mxu1 %v7086_v31 }
 0x281   :  { %5184 = vmatprep.mubr.f32.mxu1 %v7089_v27  ;;  %5953 = vmatpush3.bf16.msra.mxu1 %v5950_v4  ;;  %v2684_v4 = vld [vmem:[#allocation9 + $0x1c0] sm:$0xff] }
 0x282   :  { %5955 = vmatprep.subr.bf16.mxu1 %v5954_v30 }
 0x284   :  { %5185 = vmatmul.mubr.f32.gmra.mrb[4].mxu1 %v7092_v51 }
 0x285   :  { %5187 = vmatprep.mubr.f32.mxu1 %v7095_v18  ;;  %5957 = vmatpush3.bf16.msra.mxu1 %v5954_v30  ;;  %v5994_v30 = vpack.c.bf16 %v2685_v8, %v2684_v4  ;;  %v2877_v4 = vld [vmem:[#allocation9 + $0x238] sm:$0xff]  ;;  %v2878_v8 = vld [vmem:[#allocation9 + $0x240] sm:$0xff] }
 0x286   :  { %5959 = vmatprep.subr.bf16.mxu1 %v5958_v42 }
 0x288   :  { %5188 = vmatmul.mubr.f32.gmra.mrb[6].mxu1 %v7051_v47 }
 0x289   :  { %5190 = vmatprep.mubr.f32.mxu1 %v7065_v15  ;;  %5961 = vmatpush3.bf16.msra.mxu1 %v5958_v42  ;;  %v2687_v42 = vld [vmem:[#allocation9 + $0x1d8] sm:$0xff] }
 0x28a   :  { %5963 = vmatprep.subr.bf16.mxu1 %v5962_v19  ;;  %v5998_v14 = vpack.c.bf16 %v2687_v42, %v2686_v35  ;;  %v7166_v42 = vld [vmem:[#allocation3 + $0x80] sm:$0xff] }
 0x28c   :  { %5191 = vmatmul.mubr.f32.gmra.mrb[8].mxu1 %v7100_v43 }
 0x28d   :  { %5193 = vmatprep.mubr.f32.mxu1 %v7065_v15  ;;  %5965 = vmatpush3.bf16.msra.mxu1 %v5962_v19  ;;  %v7138_v19 = vld [vmem:[#allocation3 + $0xb2] sm:$0xff] }
 0x28e   :  { %5967 = vmatprep.subr.bf16.mxu1 %v5966_v53 }
 0x290   :  { %5194 = vmatmul.mubr.f32.gmra.mrb[10].mxu1 %v7104_v52 }
 0x291   :  { %5196 = vmatprep.mubr.f32.mxu1 %v7107_v57  ;;  %5969 = vmatpush3.bf16.msra.mxu1 %v5966_v53  ;;  %v7141_v53 = vld [vmem:[#allocation3 + $0xc2] sm:$0xff] }
 0x292   :  { %5971 = vmatprep.subr.bf16.mxu1 %v5970_v34 }
 0x294   :  { %5197 = vmatmul.mubr.f32.gmra.mrb[12].mxu1 %v7110_v29 }
 0x295   :  { %5199 = vmatprep.mubr.f32.mxu1 %v7113_v5  ;;  %5973 = vmatpush3.bf16.msra.mxu1 %v5970_v34  ;;  %v2690_v34 = vld [vmem:[#allocation9 + $0x1f0] sm:$0xff] }
 0x296   :  { %5975 = vmatprep.subr.bf16.mxu1 %v5974_v2 }
 0x298   :  { %5200 = vmatmul.mubr.f32.gmra.mrb[14].mxu1 %v7075_v32 }
 0x299   :  { %5977 = vmatpush3.bf16.msra.mxu1 %v5974_v2  ;;  %5234 = vmatprep.mubr.f32.mxu1 %v2465_v1  ;;  %v6006_v2 = vpack.c.bf16 %v2691_v44, %v2690_v34  ;;  %v7156_v1 = vld [vmem:[#allocation3 + $0x112] sm:$0xff] }
 0x29a   :  { %5979 = vmatprep.subr.bf16.mxu1 %v5978_v21  ;;  %v2884_v44 = vld [vmem:[#allocation9 + $0x270] sm:$0xff] }
 0x29c   :  { %5235 = vmatmul.mubr.f32.vlgmr.msra.gmra.mrb[0].mxu1 %v7117_v7 }
 0x29d   :  { %5237 = vmatprep.mubr.f32.mxu1 %v7120_v60  ;;  %5981 = vmatpush3.bf16.msra.mxu1 %v5978_v21  ;;  %v2871_v21 = vld [vmem:[#allocation9 + $0x208] sm:$0xff] }
 0x29e   :  { %5983 = vmatprep.subr.bf16.mxu1 %v5982_v6  ;;  %v6010_v0 = vpack.c.bf16 %v2871_v21, %v2870_v48  ;;  %v3064_v48 = vld [vmem:[#allocation9 + $0x280] sm:$0xff]  ;;  %v3065_v21 = vld [vmem:[#allocation9 + $0x288] sm:$0xff] }
 0x2a0   :  { %5238 = vmatmul.mubr.f32.gmra.mrb[2].mxu1 %v7123_v39 }
 0x2a1   :  { %5240 = vmatprep.mubr.f32.mxu1 %v7126_v62  ;;  %5985 = vmatpush3.bf16.msra.mxu1 %v5982_v6  ;;  %v2872_v6 = vld [vmem:[#allocation9 + $0x210] sm:$0xff] }
 0x2a2   :  { %5987 = vmatprep.subr.bf16.mxu1 %v5986_v26  ;;  %v6014_v61 = vpack.c.bf16 %v2873_v45, %v2872_v6  ;;  %v7176_v6 = vld [vmem:[#allocation3 + $0x120] sm:$0xff]  ;;  %v3066_v45 = vld [vmem:[#allocation9 + $0x290] sm:$0xff] }
 0x2a4   :  { %5241 = vmatmul.mubr.f32.gmra.mrb[4].mxu1 %v7129_v11 }
 0x2a5   :  { %5243 = vmatprep.mubr.f32.mxu1 %v7132_v59  ;;  %5989 = vmatpush3.bf16.msra.mxu1 %v5986_v26  ;;  %v2874_v26 = vld [vmem:[#allocation9 + $0x220] sm:$0xff] }
 0x2a6   :  { %5991 = vmatprep.subr.bf16.mxu1 %v5990_v63  ;;  %v6018_v40 = vpack.c.bf16 %v2875_v54, %v2874_v26  ;;  %v2853_v26 = vld [vmem:[#allocation3 + $0x11] sm:$0xff] }
 0x2a8   :  { %5244 = vmatmul.mubr.f32.gmra.mrb[6].mxu1 %v7135_v10 }
 0x2a9   :  { %5246 = vmatprep.mubr.f32.mxu1 %v2473_v13  ;;  %5993 = vmatpush3.bf16.msra.mxu1 %v5990_v63  ;;  %v2876_v63 = vld [vmem:[#allocation9 + $0x230] sm:$0xff] }
 0x2aa   :  { %5995 = vmatprep.subr.bf16.mxu1 %v5994_v30  ;;  %v2880_v13 = vld [vmem:[#allocation9 + $0x250] sm:$0xff] }
 0x2ac   :  { %5247 = vmatmul.mubr.f32.gmra.mrb[8].mxu1 %v7138_v19 }
 0x2ad   :  { %5249 = vmatprep.mubr.f32.mxu1 %v7141_v53  ;;  %5997 = vmatpush3.bf16.msra.mxu1 %v5994_v30  ;;  %v2879_v30 = vld [vmem:[#allocation9 + $0x248] sm:$0xff] }
 0x2ae   :  { %5999 = vmatprep.subr.bf16.mxu1 %v5998_v14  ;;  %v6026_v35 = vpack.c.bf16 %v2879_v30, %v2878_v8  ;;  %v7183_v8 = vld [vmem:[#allocation3 + $0x41] sm:$0xff]  ;;  %v3070_v30 = vld [vmem:[#allocation9 + $0x2b0] sm:$0xff] }
 0x2b0   :  { %5250 = vmatmul.mubr.f32.gmra.mrb[10].mxu1 %v7144_v46 }
 0x2b1   :  { %5252 = vmatprep.mubr.f32.mxu1 %v7147_v24  ;;  %6001 = vmatpush3.bf16.msra.mxu1 %v5998_v14  ;;  %v2881_v14 = vld [vmem:[#allocation9 + $0x258] sm:$0xff] }
 0x2b2   :  { %6003 = vmatprep.subr.bf16.mxu1 %v6002_v23  ;;  %v6030_v49 = vpack.c.bf16 %v2881_v14, %v2880_v13  ;;  %v3072_v14 = vld [vmem:[#allocation9 + $0x2c0] sm:$0xff] }
 0x2b4   :  { %5253 = vmatmul.mubr.f32.gmra.mrb[12].mxu1 %v7150_v37 }
 0x2b5   :  { %5255 = vmatprep.mubr.f32.mxu1 %v7153_v9  ;;  %6005 = vmatpush3.bf16.msra.mxu1 %v6002_v23  ;;  %v2883_v23 = vld [vmem:[#allocation9 + $0x268] sm:$0xff] }
 0x2b6   :  { %6007 = vmatprep.subr.bf16.mxu1 %v6006_v2  ;;  %v6034_v34 = vpack.c.bf16 %v2883_v23, %v2882_v12  ;;  %v3074_v12 = vld [vmem:[#allocation9 + $0x2d0] sm:$0xff]  ;;  %v3075_v23 = vld [vmem:[#allocation9 + $0x2d8] sm:$0xff] }
 0x2b8   :  { %5256 = vmatmul.mubr.f32.gmra.mrb[14].mxu1 %v7156_v1 }
 0x2b9   :  { %6009 = vmatpush3.bf16.msra.mxu1 %v6006_v2  ;;  %5290 = vmatprep.mubr.f32.mxu1 %v7082_v17  ;;  %v6022_v17 = vpack.c.bf16 %v2877_v4, %v2876_v63  ;;  %v2885_v2 = vld [vmem:[#allocation9 + $0x278] sm:$0xff]  ;;  %v3068_v63 = vld [vmem:[#allocation9 + $0x2a0] sm:$0xff]  ;;  %v3069_v4 = vld [vmem:[#allocation9 + $0x2a8] sm:$0xff] }
 0x2ba   :  { %6011 = vmatprep.subr.bf16.mxu1 %v6010_v0 }
 0x2bc   :  { %5291 = vmatmul.mubr.f32.vlgmr.msra.gmra.mrb[0].mxu1 %v7019_v3 }
 0x2bd   :  { %5293 = vmatprep.mubr.f32.mxu1 %v7086_v31  ;;  %6013 = vmatpush3.bf16.msra.mxu1 %v6010_v0  ;;  %v6042_v0 = vpack.c.bf16 %v3065_v21, %v3064_v48  ;;  %v3261_v48 = vld [vmem:[#allocation9 + $0x318] sm:$0xff]  ;;  %v3263_v21 = vld [vmem:[#allocation9 + $0x328] sm:$0xff] }
 0x2be   :  { %6015 = vmatprep.subr.bf16.mxu1 %v6014_v61 }
 0x2c0   :  { %5294 = vmatmul.mubr.f32.gmra.mrb[2].mxu1 %v7089_v27 }
 0x2c1   :  { %5296 = vmatprep.mubr.f32.mxu1 %v7092_v51  ;;  %6017 = vmatpush3.bf16.msra.mxu1 %v6014_v61  ;;  %v3067_v61 = vld [vmem:[#allocation9 + $0x298] sm:$0xff] }
 0x2c2   :  { %6019 = vmatprep.subr.bf16.mxu1 %v6018_v40  ;;  %v6046_v54 = vpack.c.bf16 %v3067_v61, %v3066_v45  ;;  %v3267_v45 = vld [vmem:[#allocation9 + $0x348] sm:$0xff] }
 0x2c4   :  { %5297 = vmatmul.mubr.f32.gmra.mrb[4].mxu1 %v7095_v18 }
 0x2c5   :  { %5299 = vmatprep.mubr.f32.mxu1 %v7051_v47  ;;  %6021 = vmatpush3.bf16.msra.mxu1 %v6018_v40  ;;  %v7179_v40 = vld [vmem:[#allocation3 + $0x21] sm:$0xff] }
 0x2c6   :  { %6023 = vmatprep.subr.bf16.mxu1 %v6022_v17 }
 0x2c8   :  { %5300 = vmatmul.mubr.f32.gmra.mrb[6].mxu1 %v7166_v42 }
 0x2c9   :  { %5302 = vmatprep.mubr.f32.mxu1 %v7100_v43  ;;  %6025 = vmatpush3.bf16.msra.mxu1 %v6022_v17  ;;  %v6038_v43 = vpack.c.bf16 %v2885_v2, %v2884_v44  ;;  %v6050_v17 = vpack.c.bf16 %v3069_v4, %v3068_v63  ;;  %v3077_v44 = vld [vmem:[#allocation9 + $0x2e8] sm:$0xff]  ;;  %v3079_v2 = vld [vmem:[#allocation9 + $0x2f8] sm:$0xff] }
 0x2ca   :  { %6027 = vmatprep.subr.bf16.mxu1 %v6026_v35  ;;  %v3269_v63 = vld [vmem:[#allocation9 + $0x358] sm:$0xff] }
 0x2cc   :  { %5303 = vmatmul.mubr.f32.gmra.mrb[8].mxu1 %v7065_v15 }
 0x2cd   :  { %5305 = vmatprep.mubr.f32.mxu1 %v7104_v52  ;;  %6029 = vmatpush3.bf16.msra.mxu1 %v6026_v35  ;;  %v3071_v35 = vld [vmem:[#allocation9 + $0x2b8] sm:$0xff] }
 0x2ce   :  { %6031 = vmatprep.subr.bf16.mxu1 %v6030_v49  ;;  %v6054_v13 = vpack.c.bf16 %v3071_v35, %v3070_v30  ;;  %v3271_v30 = vld [vmem:[#allocation9 + $0x368] sm:$0xff] }
 0x2d0   :  { %5306 = vmatmul.mubr.f32.gmra.mrb[10].mxu1 %v7107_v57 }
 0x2d1   :  { %5308 = vmatprep.mubr.f32.mxu1 %v7110_v29  ;;  %6033 = vmatpush3.bf16.msra.mxu1 %v6030_v49  ;;  %v3073_v49 = vld [vmem:[#allocation9 + $0x2c8] sm:$0xff] }
 0x2d2   :  { %6035 = vmatprep.subr.bf16.mxu1 %v6034_v34 }
 0x2d4   :  { %5309 = vmatmul.mubr.f32.gmra.mrb[12].mxu1 %v7113_v5 }
 0x2d5   :  { %5311 = vmatprep.mubr.f32.mxu1 %v7075_v32  ;;  %6037 = vmatpush3.bf16.msra.mxu1 %v6034_v34  ;;  %v3076_v34 = vld [vmem:[#allocation9 + $0x2e0] sm:$0xff] }
 0x2d6   :  { %6039 = vmatprep.subr.bf16.mxu1 %v6038_v43 }
 0x2d8   :  { %5312 = vmatmul.mubr.f32.gmra.mrb[14].mxu1 %v7176_v6 }
 0x2d9   :  { %6041 = vmatpush3.bf16.msra.mxu1 %v6038_v43  ;;  %5346 = vmatprep.mubr.f32.mxu1 %v2853_v26  ;;  %v3259_v43 = vld [vmem:[#allocation9 + $0x308] sm:$0xff] }
 0x2da   :  { %6043 = vmatprep.subr.bf16.mxu1 %v6042_v0  ;;  %v7205_v26 = vld [vmem:[#allocation3 + $0x82] sm:$0xff] }
 0x2dc   :  { %5347 = vmatmul.mubr.f32.vlgmr.msra.gmra.mrb[0].mxu1 %v7179_v40 }
 0x2dd   :  { %5349 = vmatprep.mubr.f32.mxu1 %v6975_v56  ;;  %6045 = vmatpush3.bf16.msra.mxu1 %v6042_v0  ;;  %v6058_v56 = vpack.c.bf16 %v3073_v49, %v3072_v14  ;;  %v3265_v0 = vld [vmem:[#allocation9 + $0x338] sm:$0xff]  ;;  %v3452_v49 = vld [vmem:[#allocation9 + $0x380] sm:$0xff] }
 0x2de   :  { %6047 = vmatprep.subr.bf16.mxu1 %v6046_v54  ;;  %v3273_v14 = vld [vmem:[#allocation9 + $0x378] sm:$0xff] }
 0x2e0   :  { %5350 = vmatmul.mubr.f32.gmra.mrb[2].mxu1 %v7183_v8 }
 0x2e1   :  { %5352 = vmatprep.mubr.f32.mxu1 %v6993_v25  ;;  %6049 = vmatpush3.bf16.msra.mxu1 %v6046_v54  ;;  %v6062_v25 = vpack.c.bf16 %v3075_v23, %v3074_v12  ;;  %v3268_v54 = vld [vmem:[#allocation9 + $0x350] sm:$0xff]  ;;  %v7215_v23 = vld [vmem:[#allocation3 + $0x122] sm:$0xff] }
 0x2e2   :  { %6051 = vmatprep.subr.bf16.mxu1 %v6050_v17  ;;  %v6094_v4 = vpack.c.bf16 %v3269_v63, %v3268_v54  ;;  %v3654_v54 = vld [vmem:[#allocation9 + $0x440] sm:$0xff]  ;;  %v3655_v63 = vld [vmem:[#allocation9 + $0x448] sm:$0xff] }
 0x2e4   :  { %5353 = vmatmul.mubr.f32.gmra.mrb[4].mxu1 %v6987_v16  ;;  %v6066_v16 = vpack.c.bf16 %v3077_v44, %v3076_v34  ;;  %v3455_v34 = vld [vmem:[#allocation9 + $0x398] sm:$0xff] }
 0x2e5   :  { %5355 = vmatprep.mubr.f32.mxu1 %v7009_v22  ;;  %6053 = vmatpush3.bf16.msra.mxu1 %v6050_v17  ;;  %v3078_v22 = vld [vmem:[#allocation9 + $0x2f0] sm:$0xff]  ;;  %v3270_v17 = vld [vmem:[#allocation9 + $0x360] sm:$0xff] }
 0x2e6   :  { %6055 = vmatprep.subr.bf16.mxu1 %v6054_v13  ;;  %v6098_v35 = vpack.c.bf16 %v3271_v30, %v3270_v17  ;;  %v3442_v17 = vld [vmem:[#allocation3 + $0x91] sm:$0xff] }
 0x2e7   :  { %v3656_v30 = vld [vmem:[#allocation9 + $0x450] sm:$0xff] }
 0x2e8   :  { %5356 = vmatmul.mubr.f32.gmra.mrb[6].mxu1 %v7001_v36  ;;  %v6070_v36 = vpack.c.bf16 %v3079_v2, %v3078_v22  ;;  %v3457_v22 = vld [vmem:[#allocation9 + $0x3a8] sm:$0xff] }
 0x2e9   :  { %5358 = vmatprep.mubr.f32.mxu1 %v7023_v38  ;;  %6057 = vmatpush3.bf16.msra.mxu1 %v6054_v13  ;;  %v3258_v38 = vld [vmem:[#allocation9 + $0x300] sm:$0xff]  ;;  %v3272_v13 = vld [vmem:[#allocation9 + $0x370] sm:$0xff] }
 0x2ea   :  { %6059 = vmatprep.subr.bf16.mxu1 %v6058_v56 }
 0x2ec   :  { %5359 = vmatmul.mubr.f32.gmra.mrb[8].mxu1 %v7016_v41  ;;  %v6074_v41 = vpack.c.bf16 %v3259_v43, %v3258_v38  ;;  %v3459_v38 = vld [vmem:[#allocation9 + $0x3b8] sm:$0xff]  ;;  %v3460_v43 = vld [vmem:[#allocation9 + $0x3c0] sm:$0xff] }
 0x2ed   :  { %5361 = vmatprep.mubr.f32.mxu1 %v7034_v28  ;;  %6061 = vmatpush3.bf16.msra.mxu1 %v6058_v56  ;;  %v3260_v28 = vld [vmem:[#allocation9 + $0x310] sm:$0xff]  ;;  %v3453_v56 = vld [vmem:[#allocation9 + $0x388] sm:$0xff] }
 0x2ee   :  { %6063 = vmatprep.subr.bf16.mxu1 %v6062_v25  ;;  %v6106_v12 = vpack.c.bf16 %v3453_v56, %v3452_v49  ;;  %v3658_v49 = vld [vmem:[#allocation9 + $0x460] sm:$0xff]  ;;  %v3659_v56 = vld [vmem:[#allocation9 + $0x468] sm:$0xff] }
 0x2f0   :  { %5362 = vmatmul.mubr.f32.gmra.mrb[10].mxu1 %v7029_v58  ;;  %v6078_v58 = vpack.c.bf16 %v3261_v48, %v3260_v28  ;;  %v3463_v28 = vld [vmem:[#allocation9 + $0x3d8] sm:$0xff]  ;;  %v3465_v48 = vld [vmem:[#allocation9 + $0x3e8] sm:$0xff] }
 0x2f1   :  { %5364 = vmatprep.mubr.f32.mxu1 %v7044_v20  ;;  %6065 = vmatpush3.bf16.msra.mxu1 %v6062_v25  ;;  %v3262_v20 = vld [vmem:[#allocation9 + $0x320] sm:$0xff]  ;;  %v3454_v25 = vld [vmem:[#allocation9 + $0x390] sm:$0xff] }
 0x2f2   :  { %6067 = vmatprep.subr.bf16.mxu1 %v6066_v16  ;;  %v6110_v44 = vpack.c.bf16 %v3455_v34, %v3454_v25  ;;  %v6162_v25 = vpack.c.bf16 %v3659_v56, %v3658_v49  ;;  %v3446_v34 = vld [vmem:[#allocation3 + $0xf1] sm:$0xff] }
 0x2f4   :  { %5365 = vmatmul.mubr.f32.gmra.mrb[12].mxu1 %v7039_v55  ;;  %v6082_v55 = vpack.c.bf16 %v3263_v21, %v3262_v20  ;;  %v3467_v20 = vld [vmem:[#allocation9 + $0x3f8] sm:$0xff]  ;;  %v3647_v21 = vld [vmem:[#allocation9 + $0x408] sm:$0xff] }
 0x2f5   :  { %5367 = vmatprep.mubr.f32.mxu1 %v7061_v50  ;;  %6069 = vmatpush3.bf16.msra.mxu1 %v6066_v16  ;;  %v3264_v50 = vld [vmem:[#allocation9 + $0x330] sm:$0xff]  ;;  %v3456_v16 = vld [vmem:[#allocation9 + $0x3a0] sm:$0xff] }
 0x2f6   :  { %6071 = vmatprep.subr.bf16.mxu1 %v6070_v36  ;;  %v6114_v2 = vpack.c.bf16 %v3457_v22, %v3456_v16  ;;  %v3661_v16 = vld [vmem:[#allocation9 + $0x478] sm:$0xff]  ;;  %v3447_v22 = vld [vmem:[#allocation3 + $0x101] sm:$0xff] }
 0x2f8   :  { %5368 = vmatmul.mubr.f32.gmra.mrb[14].mxu1 %v7054_v33  ;;  %v6086_v33 = vpack.c.bf16 %v3265_v0, %v3264_v50  ;;  %v3650_v50 = vld [vmem:[#allocation9 + $0x420] sm:$0xff]  ;;  %v3651_v0 = vld [vmem:[#allocation9 + $0x428] sm:$0xff] }
 0x2f9   :  { %6073 = vmatpush3.bf16.msra.mxu1 %v6070_v36  ;;  %5402 = vmatprep.mubr.f32.mxu1 %v7117_v7  ;;  %v3266_v7 = vld [vmem:[#allocation9 + $0x340] sm:$0xff]  ;;  %v3458_v36 = vld [vmem:[#allocation9 + $0x3b0] sm:$0xff] }
 0x2fa   :  { %6075 = vmatprep.subr.bf16.mxu1 %v6074_v41  ;;  %v6090_v61 = vpack.c.bf16 %v3267_v45, %v3266_v7  ;;  %v3652_v7 = vld [vmem:[#allocation9 + $0x430] sm:$0xff]  ;;  %v3653_v45 = vld [vmem:[#allocation9 + $0x438] sm:$0xff] }
 0x2fc   :  { %5403 = vmatmul.mubr.f32.vlgmr.msra.gmra.mrb[0].mxu1 %v7120_v60 }
 0x2fd   :  { %5405 = vmatprep.mubr.f32.mxu1 %v7123_v39  ;;  %6077 = vmatpush3.bf16.msra.mxu1 %v6074_v41  ;;  %v3461_v41 = vld [vmem:[#allocation9 + $0x3c8] sm:$0xff] }
 0x2fe   :  { %6079 = vmatprep.subr.bf16.mxu1 %v6078_v58 }
 0x300   :  { %5406 = vmatmul.mubr.f32.gmra.mrb[2].mxu1 %v7126_v62 }
 0x301   :  { %5408 = vmatprep.mubr.f32.mxu1 %v7129_v11  ;;  %6081 = vmatpush3.bf16.msra.mxu1 %v6078_v58  ;;  %v3466_v58 = vld [vmem:[#allocation9 + $0x3f0] sm:$0xff] }
 0x302   :  { %6083 = vmatprep.subr.bf16.mxu1 %v6082_v55 }
 0x304   :  { %5409 = vmatmul.mubr.f32.gmra.mrb[4].mxu1 %v7132_v59 }
 0x305   :  { %5411 = vmatprep.mubr.f32.mxu1 %v7135_v10  ;;  %6085 = vmatpush3.bf16.msra.mxu1 %v6082_v55  ;;  %v3649_v55 = vld [vmem:[#allocation9 + $0x418] sm:$0xff] }
 0x306   :  { %6087 = vmatprep.subr.bf16.mxu1 %v6086_v33 }
 0x308   :  { %5412 = vmatmul.mubr.f32.gmra.mrb[6].mxu1 %v7205_v26 }
 0x309   :  { %5414 = vmatprep.mubr.f32.mxu1 %v7138_v19  ;;  %6089 = vmatpush3.bf16.msra.mxu1 %v6086_v33  ;;  %v6102_v19 = vpack.c.bf16 %v3273_v14, %v3272_v13  ;;  %v3438_v33 = vld [vmem:[#allocation3 + $0x51] sm:$0xff]  ;;  %v3443_v13 = vld [vmem:[#allocation3 + $0xc1] sm:$0xff] }
 0x30a   :  { %6091 = vmatprep.subr.bf16.mxu1 %v6090_v61 }
 0x30c   :  { %5415 = vmatmul.mubr.f32.gmra.mrb[8].mxu1 %v7141_v53 }
 0x30d   :  { %5417 = vmatprep.mubr.f32.mxu1 %v7144_v46  ;;  %6093 = vmatpush3.bf16.msra.mxu1 %v6090_v61  ;;  %v3439_v61 = vld [vmem:[#allocation3 + $0x61] sm:$0xff] }
 0x30e   :  { %6095 = vmatprep.subr.bf16.mxu1 %v6094_v4 }
 0x310   :  { %5418 = vmatmul.mubr.f32.gmra.mrb[10].mxu1 %v7147_v24 }
 0x311   :  { %5420 = vmatprep.mubr.f32.mxu1 %v7150_v37  ;;  %6097 = vmatpush3.bf16.msra.mxu1 %v6094_v4  ;;  %v3441_v4 = vld [vmem:[#allocation3 + $0x81] sm:$0xff] }
 0x312   :  { %6099 = vmatprep.subr.bf16.mxu1 %v6098_v35 }
 0x314   :  { %5421 = vmatmul.mubr.f32.gmra.mrb[12].mxu1 %v7153_v9 }
 0x315   :  { %5423 = vmatprep.mubr.f32.mxu1 %v7156_v1  ;;  %6101 = vmatpush3.bf16.msra.mxu1 %v6098_v35  ;;  %v3657_v35 = vld [vmem:[#allocation9 + $0x458] sm:$0xff] }
 0x316   :  { %6103 = vmatprep.subr.bf16.mxu1 %v6102_v19  ;;  %v6158_v14 = vpack.c.bf16 %v3657_v35, %v3656_v30 }
 0x318   :  { %5424 = vmatmul.mubr.f32.gmra.mrb[14].mxu1 %v7215_v23 }
 0x319   :  { %6105 = vmatpush3.bf16.msra.mxu1 %v6102_v19  ;;  %5458 = vmatprep.mubr.f32.mxu1 %v7019_v3  ;;  %v6118_v3 = vpack.c.bf16 %v3459_v38, %v3458_v36  ;;  %v3444_v19 = vld [vmem:[#allocation3 + $0xd1] sm:$0xff]  ;;  %v3449_v38 = vld [vmem:[#allocation3 + $0x121] sm:$0xff] }
 0x31a   :  { %6107 = vmatprep.subr.bf16.mxu1 %v6106_v12  ;;  %v3448_v36 = vld [vmem:[#allocation3 + $0x111] sm:$0xff] }
 0x31c   :  { %5459 = vmatmul.mubr.f32.vlgmr.msra.gmra.mrb[0].mxu1 %v7086_v31  ;;  %v6122_v31 = vpack.c.bf16 %v3461_v41, %v3460_v43  ;;  %v3636_v43 = vld [vmem:[#allocation3 + $0x92] sm:$0xff] }
 0x31d   :  { %5461 = vmatprep.mubr.f32.mxu1 %v7089_v27  ;;  %6109 = vmatpush3.bf16.msra.mxu1 %v6106_v12  ;;  %v3462_v27 = vld [vmem:[#allocation9 + $0x3d0] sm:$0xff]  ;;  %v3445_v12 = vld [vmem:[#allocation3 + $0xe1] sm:$0xff] }
 0x31e   :  { %6111 = vmatprep.subr.bf16.mxu1 %v6110_v44 }
 0x320   :  { %5462 = vmatmul.mubr.f32.gmra.mrb[2].mxu1 %v7092_v51  ;;  %v6126_v51 = vpack.c.bf16 %v3463_v28, %v3462_v27 }
 0x321   :  { %5464 = vmatprep.mubr.f32.mxu1 %v7095_v18  ;;  %6113 = vmatpush3.bf16.msra.mxu1 %v6110_v44  ;;  %v3464_v18 = vld [vmem:[#allocation9 + $0x3e0] sm:$0xff]  ;;  %v3660_v44 = vld [vmem:[#allocation9 + $0x470] sm:$0xff] }
 0x322   :  { %6115 = vmatprep.subr.bf16.mxu1 %v6114_v2 }
 0x324   :  { %5465 = vmatmul.mubr.f32.gmra.mrb[4].mxu1 %v7051_v47 }
 0x325   :  { %5467 = vmatprep.mubr.f32.mxu1 %v7166_v42  ;;  %6117 = vmatpush3.bf16.msra.mxu1 %v6114_v2  ;;  %v6130_v42 = vpack.c.bf16 %v3465_v48, %v3464_v18  ;;  %v6166_v2 = vpack.c.bf16 %v3661_v16, %v3660_v44 }
 0x326   :  { %6119 = vmatprep.subr.bf16.mxu1 %v6118_v3 }
 0x328   :  { %5468 = vmatmul.mubr.f32.gmra.mrb[6].mxu1 %v7051_v47  ;;  %v6134_v47 = vpack.c.bf16 %v3467_v20, %v3466_v58 }
 0x329   :  { %5470 = vmatprep.mubr.f32.mxu1 %v7065_v15  ;;  %6121 = vmatpush3.bf16.msra.mxu1 %v6118_v3  ;;  %v3646_v15 = vld [vmem:[#allocation9 + $0x400] sm:$0xff]  ;;  %v3450_v3 = vld [vmem:[#allocation3 + $0x131] sm:$0xff] }
 0x32a   :  { %6123 = vmatprep.subr.bf16.mxu1 %v6122_v31 }
 0x32c   :  { %5471 = vmatmul.mubr.f32.gmra.mrb[8].mxu1 %v7104_v52  ;;  %v6138_v52 = vpack.c.bf16 %v3647_v21, %v3646_v15 }
 0x32d   :  { %5473 = vmatprep.mubr.f32.mxu1 %v7107_v57  ;;  %6125 = vmatpush3.bf16.msra.mxu1 %v6122_v31  ;;  %v3648_v57 = vld [vmem:[#allocation9 + $0x410] sm:$0xff] }
 0x32e   :  { %6127 = vmatprep.subr.bf16.mxu1 %v6126_v51 }
 0x330   :  { %5474 = vmatmul.mubr.f32.gmra.mrb[10].mxu1 %v7110_v29  ;;  %v6142_v29 = vpack.c.bf16 %v3649_v55, %v3648_v57 }
 0x331   :  { %5476 = vmatprep.mubr.f32.mxu1 %v7113_v5  ;;  %6129 = vmatpush3.bf16.msra.mxu1 %v6126_v51  ;;  %v3436_v5 = vld [vmem:[#allocation3 + $0x31] sm:$0xff] }
 0x332   :  { %6131 = vmatprep.subr.bf16.mxu1 %v6130_v42 }
 0x334   :  { %5477 = vmatmul.mubr.f32.gmra.mrb[12].mxu1 %v7075_v32 }
 0x335   :  { %5479 = vmatprep.mubr.f32.mxu1 %v7176_v6  ;;  %6133 = vmatpush3.bf16.msra.mxu1 %v6130_v42  ;;  %v6146_v6 = vpack.c.bf16 %v3651_v0, %v3650_v50 }
 0x336   :  { %6135 = vmatprep.subr.bf16.mxu1 %v6134_v47 }
 0x338   :  { %5480 = vmatmul.mubr.f32.gmra.mrb[14].mxu1 %v7075_v32  ;;  %v6150_v32 = vpack.c.bf16 %v3653_v45, %v3652_v7 }
 0x339   :  { %6137 = vmatpush3.bf16.msra.mxu1 %v6134_v47  ;;  %5514 = vmatprep.mubr.f32.mxu1 %v7179_v40  ;;  %v3440_v40 = vld [vmem:[#allocation3 + $0x71] sm:$0xff] }
 0x33a   :  { %6139 = vmatprep.subr.bf16.mxu1 %v6138_v52 }
 0x33c   :  { %5515 = vmatmul.mubr.f32.vlgmr.msra.gmra.mrb[0].mxu1 %v3436_v5 }
 0x33d   :  { %5517 = vmatprep.mubr.f32.mxu1 %v7183_v8  ;;  %6141 = vmatpush3.bf16.msra.mxu1 %v6138_v52  ;;  %v6154_v8 = vpack.c.bf16 %v3655_v63, %v3654_v54 }
 0x33e   :  { %6143 = vmatprep.subr.bf16.mxu1 %v6142_v29 }
 0x340   :  { %5518 = vmatmul.mubr.f32.gmra.mrb[2].mxu1 %v3438_v33 }
 0x341   :  { %5520 = vmatprep.mubr.f32.mxu1 %v3439_v61  ;;  %6145 = vmatpush3.bf16.msra.mxu1 %v6142_v29 }
 0x342   :  { %6147 = vmatprep.subr.bf16.mxu1 %v6146_v6 }
 0x344   :  { %5521 = vmatmul.mubr.f32.gmra.mrb[4].mxu1 %v3440_v40 }
 0x345   :  { %5523 = vmatprep.mubr.f32.mxu1 %v3441_v4  ;;  %6149 = vmatpush3.bf16.msra.mxu1 %v6146_v6 }
 0x346   :  { %6151 = vmatprep.subr.bf16.mxu1 %v6150_v32 }
 0x348   :  { %5524 = vmatmul.mubr.f32.gmra.mrb[6].mxu1 %v3442_v17 }
 0x349   :  { %5526 = vmatprep.mubr.f32.mxu1 %v3443_v13  ;;  %6153 = vmatpush3.bf16.msra.mxu1 %v6150_v32 }
 0x34a   :  { %6155 = vmatprep.subr.bf16.mxu1 %v6154_v8 }
 0x34c   :  { %5527 = vmatmul.mubr.f32.gmra.mrb[8].mxu1 %v3444_v19 }
 0x34d   :  { %5529 = vmatprep.mubr.f32.mxu1 %v3445_v12  ;;  %6157 = vmatpush3.bf16.msra.mxu1 %v6154_v8 }
 0x34e   :  { %6159 = vmatprep.subr.bf16.mxu1 %v6158_v14 }
 0x350   :  { %5530 = vmatmul.mubr.f32.gmra.mrb[10].mxu1 %v3446_v34 }
 0x351   :  { %5532 = vmatprep.mubr.f32.mxu1 %v3447_v22  ;;  %6161 = vmatpush3.bf16.msra.mxu1 %v6158_v14 }
 0x352   :  { %6163 = vmatprep.subr.bf16.mxu1 %v6162_v25 }
 0x354   :  { %5533 = vmatmul.mubr.f32.gmra.mrb[12].mxu1 %v3448_v36 }
 0x355   :  { %5535 = vmatprep.mubr.f32.mxu1 %v3449_v38  ;;  %6165 = vmatpush3.bf16.msra.mxu1 %v6162_v25 }
 0x356   :  { %6167 = vmatprep.subr.bf16.mxu1 %v6166_v2 }
 0x358   :  { %5536 = vmatmul.mubr.f32.gmra.mrb[14].mxu1 %v3450_v3 }
 0x359   :  { %6169 = vmatpush3.bf16.msra.mxu1 %v6166_v2  ;;  %5570 = vmatprep.mubr.f32.mxu1 %v7120_v60  ;;  %v3644_v60 = vld [vmem:[#allocation3 + $0x132] sm:$0xff] }
 0x35c   :  { %5571 = vmatmul.mubr.f32.vlgmr.msra.gmra.mrb[0].mxu1 %v7123_v39  ;;  %v7253_v39 = vld [vmem:[%s7345_s4] ss:$0 sm:$0xff]  ;;  %s6595_s4 = smov [#allocation10]  }
 0x35d   :  { %5573 = vmatprep.mubr.f32.mxu1 %v7126_v62  ;;  %s3963_s8 = sshll.u32 %s6595_s4, 4  ;;  %s3964_s8 = int_to_ptr.vmem [resolvable:$true] %s3963_s8 }
 0x35e   :  { %s6562_s9 = scalar_lea.vmem %s3964_s8, 2048  ;;  %p6567_p11 = scmp.lt.s32.totalorder %s3964_s8, %s3964_s8 }
 0x35f   :  { %p6563_p10 = scmp.ne.s32.totalorder %s3964_s8, %s6562_s9  ;;  %p6568_p12 = scmp.lt.s32.totalorder %s6562_s9, %s6562_s9 }
 0x360   :  { %5574 = vmatmul.mubr.f32.gmra.mrb[2].mxu1 %v7129_v11 }
 0x361   :  { %5576 = vmatprep.mubr.f32.mxu1 %v7132_v59  ;;  %p6569_p13 = por %p6568_p12, %p6567_p11 }
 0x363   :  { %p6570_p0 = pnand %p6569_p13, %p6563_p10 }
 0x364   :  { %5577 = vmatmul.mubr.f32.gmra.mrb[4].mxu1 %v7135_v10 }
 0x365   :  { %5579 = vmatprep.mubr.f32.mxu1 %v7205_v26 }
 0x368   :  { %5580 = vmatmul.mubr.f32.gmra.mrb[6].mxu1 %v3636_v43 }
 0x369   :  { %5582 = vmatprep.mubr.f32.mxu1 %v7141_v53 }
 0x36c   :  { %5583 = vmatmul.mubr.f32.gmra.mrb[8].mxu1 %v7144_v46 }
 0x36d   :  { %5585 = vmatprep.mubr.f32.mxu1 %v7147_v24 }
 0x370   :  { %5586 = vmatmul.mubr.f32.gmra.mrb[10].mxu1 %v7150_v37 }
 0x371   :  { %5588 = vmatprep.mubr.f32.mxu1 %v7153_v9 }
 0x374   :  { %5589 = vmatmul.mubr.f32.gmra.mrb[12].mxu1 %v7156_v1 }
 0x375   :  { %5591 = vmatprep.mubr.f32.mxu1 %v7215_v23 }
 0x378   :  { %5592 = vmatmul.mubr.f32.gmra.mrb[14].mxu1 %v3644_v60 }
 0x42f   :  { %v5572_v62 = vpop.f32.mrb[0].mxu1 }
 0x430   :  { %v3831_v11 = vadd.f32 %v5572_v62, %v7253_v39  ;;  %v3728_v59 = vpop.f32.mrb[1].mxu1 }
 0x431   :  { %v3830_v10 = vadd.f32 %v7253_v39, %v3728_v59 }
 0x432   :  { %v3863_v53 = vmin.f32 %v3831_v11, 0.0  ;;  %vm3847_vm0 = vcmp.gt.f32.partialorder %v3831_v11, 0.0 }
 0x433   :  { %v3862_v46 = vmin.f32 %v3830_v10, 0.0  ;;  %v5575_v24 = vpop.f32.mrb[2].mxu1  ;;  %vm3846_vm1 = vcmp.gt.f32.partialorder %v3830_v10, 0.0 }
 0x434   :  { %v3880_v37 = vmul.f32 1.442695, %v3863_v53  ;;  %v3833_v9 = vadd.f32 %v5575_v24, %v7253_v39  ;;  %v3738_v1 = vpop.f32.mrb[3].mxu1 }
 0x435   :  { %v3878_v26 = vmul.f32 1.442695, %v3862_v46  ;;  %v7259_v23 = vadd.f32 %v7253_v39, %v3738_v1 }
 0x436   :  { %6464 = vpow2.f32 %v3880_v37  ;;  %v3865_v41 = vmin.f32 %v3833_v9, 0.0  ;;  %vm3849_vm2 = vcmp.gt.f32.partialorder %v3833_v9, 0.0 }
 0x437   :  { %6466 = vpow2.f32 %v3878_v26  ;;  %v3864_v31 = vmin.f32 %v7259_v23, 0.0  ;;  %v5578_v27 = vpop.f32.mrb[4].mxu1  ;;  %vm3848_vm3 = vcmp.gt.f32.partialorder %v7259_v23, 0.0 }
 0x438   :  { %v3884_v28 = vmul.f32 1.442695, %v3865_v41  ;;  %v7263_v51 = vadd.f32 %v5578_v27, %v7253_v39  ;;  %v3748_v18 = vpop.f32.mrb[5].mxu1 }
 0x439   :  { %v3882_v48 = vmul.f32 1.442695, %v3864_v31  ;;  %v7266_v42 = vadd.f32 %v7253_v39, %v3748_v18 }
 0x43a   :  { %6468 = vpow2.f32 %v3884_v28  ;;  %v3867_v58 = vmin.f32 %v7263_v51, 0.0  ;;  %vm3851_vm4 = vcmp.gt.f32.partialorder %v7263_v51, 0.0 }
 0x43b   :  { %6470 = vpow2.f32 %v3882_v48  ;;  %v3866_v20 = vmin.f32 %v7266_v42, 0.0  ;;  %v5581_v47 = vpop.f32.mrb[6].mxu1  ;;  %vm3850_vm5 = vcmp.gt.f32.partialorder %v7266_v42, 0.0 }
 0x43c   :  { %v3888_v15 = vmul.f32 1.442695, %v3867_v58  ;;  %v7271_v21 = vadd.f32 %v5581_v47, %v7253_v39  ;;  %v3758_v52 = vpop.f32.mrb[7].mxu1 }
 0x43d   :  { %v3886_v57 = vmul.f32 1.442695, %v3866_v20  ;;  %v7274_v55 = vadd.f32 %v7253_v39, %v3758_v52 }
 0x43e   :  { %6472 = vpow2.f32 %v3888_v15  ;;  %v3869_v29 = vmin.f32 %v7271_v21, 0.0  ;;  %vm3853_vm6 = vcmp.gt.f32.partialorder %v7271_v21, 0.0 }
 0x43f   :  { %6474 = vpow2.f32 %v3886_v57  ;;  %v3868_v5 = vmin.f32 %v7274_v55, 0.0  ;;  %v5584_v50 = vpop.f32.mrb[8].mxu1  ;;  %vm3852_vm7 = vcmp.gt.f32.partialorder %v7274_v55, 0.0 }
 0x440   :  { %v6465_v0 = vpop.eup %6464  ;;  %v3892_v6 = vmul.f32 1.442695, %v3869_v29  ;;  %v7279_v33 = vadd.f32 %v5584_v50, %v7253_v39  ;;  %v3768_v7 = vpop.f32.mrb[9].mxu1 }
 0x441   :  { %v6467_v45 = vpop.eup %6466  ;;  %v3995_v61 = vadd.f32 -1.0, %v6465_v0  ;;  %v3890_v32 = vmul.f32 1.442695, %v3868_v5  ;;  %v7282_v40 = vadd.f32 %v7253_v39, %v3768_v7 }
 0x442   :  { %v3994_v54 = vadd.f32 -1.0, %v6467_v45  ;;  %6476 = vpow2.f32 %v3892_v6  ;;  %v3871_v63 = vmin.f32 %v7279_v33, 0.0  ;;  %vm3855_vm8 = vcmp.gt.f32.partialorder %v7279_v33, 0.0 }
 0x443   :  { %v3927_v4 = vsel %vm3847_vm0, %v3831_v11, %v3995_v61  ;;  %6478 = vpow2.f32 %v3890_v32  ;;  %v3870_v8 = vmin.f32 %v7282_v40, 0.0  ;;  %v5587_v17 = vpop.f32.mrb[10].mxu1  ;;  %vm3854_vm9 = vcmp.gt.f32.partialorder %v7282_v40, 0.0 }
 0x444   :  { %v6469_v30 = vpop.eup %6468  ;;  %3943 = vst [vmem:[#allocation10 + $0x8] sm:$0xff] %v3927_v4  ;;  %v3926_v35 = vsel %vm3846_vm1, %v3830_v10, %v3994_v54  ;;  %v3896_v13 = vmul.f32 1.442695, %v3871_v63  ;;  %v7287_v14 = vadd.f32 %v5587_v17, %v7253_v39  ;;  %v3778_v19 = vpop.f32.mrb[11].mxu1 }
 0x445   :  { %v6471_v49 = vpop.eup %6470  ;;  %3942 = vst [vmem:[#allocation10] sm:$0xff] %v3926_v35  ;;  %v3997_v56 = vadd.f32 -1.0, %v6469_v30  ;;  %v3894_v12 = vmul.f32 1.442695, %v3870_v8  ;;  %v7290_v25 = vadd.f32 %v7253_v39, %v3778_v19 }
 0x446   :  { %v3996_v34 = vadd.f32 -1.0, %v6471_v49  ;;  %6480 = vpow2.f32 %v3896_v13  ;;  %v3873_v44 = vmin.f32 %v7287_v14, 0.0  ;;  %vm3857_vm10 = vcmp.gt.f32.partialorder %v7287_v14, 0.0 }
 0x447   :  { %v3929_v16 = vsel %vm3849_vm2, %v3833_v9, %v3997_v56  ;;  %6482 = vpow2.f32 %v3894_v12  ;;  %v3872_v22 = vmin.f32 %v7290_v25, 0.0  ;;  %v5590_v2 = vpop.f32.mrb[12].mxu1  ;;  %vm3856_vm11 = vcmp.gt.f32.partialorder %v7290_v25, 0.0 }
 0x448   :  { %v6473_v36 = vpop.eup %6472  ;;  %3945 = vst [vmem:[#allocation10 + $0x18] sm:$0xff] %v3929_v16  ;;  %v3928_v38 = vsel %vm3848_vm3, %v7259_v23, %v3996_v34  ;;  %v3900_v3 = vmul.f32 1.442695, %v3873_v44  ;;  %v7297_v43 = vadd.f32 %v5590_v2, %v7253_v39  ;;  %v3788_v60 = vpop.f32.mrb[13].mxu1 }
 0x449   :  { %v6475_v62 = vpop.eup %6474  ;;  %3944 = vst [vmem:[#allocation10 + $0x10] sm:$0xff] %v3928_v38  ;;  %v3999_v11 = vadd.f32 -1.0, %v6473_v36  ;;  %v3898_v59 = vmul.f32 1.442695, %v3872_v22  ;;  %v7300_v10 = vadd.f32 %v7253_v39, %v3788_v60 }
 0x44a   :  { %v3998_v53 = vadd.f32 -1.0, %v6475_v62  ;;  %6484 = vpow2.f32 %v3900_v3  ;;  %v3875_v46 = vmin.f32 %v7297_v43, 0.0  ;;  %vm3859_vm12 = vcmp.gt.f32.partialorder %v7297_v43, 0.0 }
 0x44b   :  { %v3931_v24 = vsel %vm3851_vm4, %v7263_v51, %v3999_v11  ;;  %6486 = vpow2.f32 %v3898_v59  ;;  %v3874_v37 = vmin.f32 %v7300_v10, 0.0  ;;  %v5593_v9 = vpop.f32.mrb[14].mxu1  ;;  %vm3858_vm13 = vcmp.gt.f32.partialorder %v7300_v10, 0.0 }
 0x44c   :  { %v6477_v1 = vpop.eup %6476  ;;  %3947 = vst [vmem:[#allocation10 + $0x28] sm:$0xff] %v3931_v24  ;;  %v3930_v26 = vsel %vm3850_vm5, %v7266_v42, %v3998_v53  ;;  %v3904_v23 = vmul.f32 1.442695, %v3875_v46  ;;  %v3845_v41 = vadd.f32 %v5593_v9, %v7253_v39  ;;  %v3798_v31 = vpop.f32.mrb[15].mxu1 }
 0x44d   :  { %v6479_v27 = vpop.eup %6478  ;;  %3946 = vst [vmem:[#allocation10 + $0x20] sm:$0xff] %v3930_v26  ;;  %v4001_v28 = vadd.f32 -1.0, %v6477_v1  ;;  %v3902_v18 = vmul.f32 1.442695, %v3874_v37  ;;  %v3844_v51 = vadd.f32 %v7253_v39, %v3798_v31 }
 0x44e   :  { %v4000_v48 = vadd.f32 -1.0, %v6479_v27  ;;  %6488 = vpow2.f32 %v3904_v23  ;;  %v3877_v58 = vmin.f32 %v3845_v41, 0.0  ;;  %vm3861_vm14 = vcmp.gt.f32.partialorder %v3845_v41, 0.0 }
 0x44f   :  { %v3933_v20 = vsel %vm3853_vm6, %v7271_v21, %v4001_v28  ;;  %6490 = vpow2.f32 %v3902_v18  ;;  %v3876_v42 = vmin.f32 %v3844_v51, 0.0  ;;  %vm3860_vm15 = vcmp.gt.f32.partialorder %v3844_v51, 0.0 }
 0x450   :  { %v6481_v47 = vpop.eup %6480  ;;  %3949 = vst [vmem:[#allocation10 + $0x38] sm:$0xff] %v3933_v20  ;;  %v3932_v15 = vsel %vm3852_vm7, %v7274_v55, %v4000_v48  ;;  %v3908_v52 = vmul.f32 1.442695, %v3877_v58 }
 0x451   :  { %v6483_v57 = vpop.eup %6482  ;;  %3948 = vst [vmem:[#allocation10 + $0x30] sm:$0xff] %v3932_v15  ;;  %v4003_v29 = vadd.f32 -1.0, %v6481_v47  ;;  %v3906_v39 = vmul.f32 1.442695, %v3876_v42 }
 0x452   :  { %v4002_v5 = vadd.f32 -1.0, %v6483_v57  ;;  %6492 = vpow2.f32 %v3908_v52 }
 0x453   :  { %v3935_v50 = vsel %vm3855_vm8, %v7279_v33, %v4003_v29  ;;  %6494 = vpow2.f32 %v3906_v39 }
 0x454   :  { %v6485_v21 = vpop.eup %6484  ;;  %3951 = vst [vmem:[#allocation10 + $0x48] sm:$0xff] %v3935_v50  ;;  %v3934_v0 = vsel %vm3854_vm9, %v7282_v40, %v4002_v5 }
 0x455   :  { %v6487_v6 = vpop.eup %6486  ;;  %3950 = vst [vmem:[#allocation10 + $0x40] sm:$0xff] %v3934_v0  ;;  %v4005_v55 = vadd.f32 -1.0, %v6485_v21 }
 0x456   :  { %v4004_v7 = vadd.f32 -1.0, %v6487_v6 }
 0x457   :  { %v3937_v45 = vsel %vm3857_vm10, %v7287_v14, %v4005_v55 }
 0x458   :  { %v6489_v61 = vpop.eup %6488  ;;  %3953 = vst [vmem:[#allocation10 + $0x58] sm:$0xff] %v3937_v45  ;;  %v3936_v33 = vsel %vm3856_vm11, %v7290_v25, %v4004_v7 }
 0x459   :  { %v6491_v32 = vpop.eup %6490  ;;  %3952 = vst [vmem:[#allocation10 + $0x50] sm:$0xff] %v3936_v33  ;;  %v4007_v54 = vadd.f32 -1.0, %v6489_v61 }
 0x45a   :  { %v4006_v40 = vadd.f32 -1.0, %v6491_v32 }
 0x45b   :  { %v3939_v63 = vsel %vm3859_vm12, %v7297_v43, %v4007_v54 }
 0x45c   :  { %v6493_v4 = vpop.eup %6492  ;;  %3955 = vst [vmem:[#allocation10 + $0x68] sm:$0xff] %v3939_v63  ;;  %v3938_v8 = vsel %vm3858_vm13, %v7300_v10, %v4006_v40 }
 0x45d   :  { %v6495_v17 = vpop.eup %6494  ;;  %3954 = vst [vmem:[#allocation10 + $0x60] sm:$0xff] %v3938_v8  ;;  %v4009_v30 = vadd.f32 -1.0, %v6493_v4 }
 0x45e   :  { %v4008_v35 = vadd.f32 -1.0, %v6495_v17 }
 0x45f   :  { %v3941_v13 = vsel %vm3861_vm14, %v3845_v41, %v4009_v30 }
 0x460   :  { %3957 = vst [vmem:[#allocation10 + $0x78] sm:$0xff] %v3941_v13  ;;  %v3940_v14 = vsel %vm3860_vm15, %v3844_v51, %v4008_v35 }
 0x461   :  { %3956 = vst [vmem:[#allocation10 + $0x70] sm:$0xff] %v3940_v14 }
 0x462   :  { %6573 = shalt.err (!%p6570_p0)
}
 0x463   :  { %s6574_s12 = scalar_lea.hbm %s7346_s5, 2048 }
 0x464   :  { %p6575_p1 = scmp.ne.s32.totalorder %s7346_s5, %s6574_s12  ;;  %p6578_p2 = scmp.lt.u32.totalorder %s6574_s12, %s7346_s5 }
 0x466   :  { %p6580_p3 = pnand %p6578_p2, %p6575_p1 }
 0x468   :  { %6583 = shalt.err (!%p6580_p3)
}
 0x469   :  { %3969 = dma.vmem_to_hbm [thread:$0]  %s3964_s8, 2048, %s7346_s5, [#allocation6], %s6592_s30, %s6592_s30, %s6593_s6  }
 0x46a   :  { %6588 = dma.done.wait [#allocation6], 2048  }
 0x46b   :  { %6589 = vsyncadd [#allocation6], 4294965248 }
 0x46c   :  { %3973 = vsyncpa [#allocation5], 1 }
 0x46d   :  { %3974 = vsyncpa [#allocation8], 1 }
 0x46e   :  { %3975 = vsyncpa [#allocation6], 1 }

</bundles_post_ra>
